<compile_context>
chip_gen: v5e
topology: v5e:2x2
jax: 0.10.0
libtpu: 0.0.40
codegen_flags: <defaults>
</compile_context>

<pallas_src>
import numpy as np
import jax
import jax.numpy as jnp
from jax.experimental import pallas as pl
from jax.experimental.pallas import tpu as pltpu

LANE = 128
_SMALL_FASTPATH_BYTES = 256 << 10      # below this, plain XLA beats a custom call
_SMALL_OPERAND_BYTES = 4 << 20         # max size of the in-kernel-broadcast operand


def _ceil(a, b):
    return -(-a // b)


def _device_kind():
    try:
        return jax.devices()[0].device_kind.lower()
    except Exception:
        return ""


_KIND = _device_kind()
_IS_V5 = "v5" in _KIND                 # v5e/v5p: 16 MiB scoped-VMEM default
_IS_V7X = "v7" in _KIND                # 2 TensorCores / 64 MiB physical VMEM
_VMEM_SAFE_CAP = (56 << 20) if _IS_V7X else (100 << 20)


def _target_block_bytes():
    """Per-array block buffer target (doubled by pipelining)."""
    return (2 << 20) if _IS_V5 else (4 << 20)


def _vmem_limit(block_bytes):
    """Explicit scoped-VMEM request: double-buffered working set + headroom."""
    return int(min(max(2 * block_bytes + (4 << 20), 16 << 20), _VMEM_SAFE_CAP))


def _grid_semantics(steps):
    # On v7x shard the row-block axis across the two TensorCores; plain
    # "parallel" elsewhere (near-zero measured effect, but harmless).
    if _IS_V7X and steps >= 2:
        return getattr(pltpu, "CORE_PARALLEL", "parallel")
    return "parallel"


def _sublane(dtype):
    """Minimum sublane multiple for a dtype: 8 (32-bit), 16 (bf16), 32 (int8)."""
    bits = jnp.dtype(dtype).itemsize * 8
    return max(8, 256 // bits)


_C_CANDIDATES = (1024, 512, 2048, 256, 4096, 128, 8192, 16384)


def _plan_2d(n):
    """Lane-dense (rows, C) factorization of n; None if 128 does not divide n."""
    for C in _C_CANDIDATES:
        if C <= n and n % C == 0:
            return n // C, C
    return None


def _block_rows(rows, C, item, sub):
    target = _target_block_bytes()
    tr = max(sub, (target // max(1, C * item)) // sub * sub)
    tr = min(tr, rows)
    # v7x only: if a single block would cover everything, split in two so both
    # TensorCores get work (the grid axis is CORE_PARALLEL there).
    if _IS_V7X and tr >= rows and rows >= 2 * sub:
        tr = _ceil(_ceil(rows, 2), sub) * sub
    return max(1, tr)


# ---------------------------------------------------------------------------
# element-wise kernels (dtype promotion happens inside the kernel)
# ---------------------------------------------------------------------------
def _binary_kernel(op, relu):
    def kernel(x_ref, y_ref, o_ref):
        dt = o_ref.dtype
        r = op(x_ref[...].astype(dt), y_ref[...].astype(dt))
        if relu:
            r = jnp.maximum(r, jnp.zeros((), dt))
        o_ref[...] = r.astype(dt)
    return kernel


def _scalar_kernel(op, relu):
    def kernel(s_ref, x_ref, o_ref):
        dt = o_ref.dtype
        r = op(x_ref[...].astype(dt), s_ref[0, 0].astype(dt))
        if relu:
            r = jnp.maximum(r, jnp.zeros((), dt))
        o_ref[...] = r.astype(dt)
    return kernel


def _run_binary_2d(x2, y2, op, relu, dt, rows, C):
    dts = (x2.dtype, y2.dtype, dt)
    sub = max(_sublane(d) for d in dts)
    item = max(jnp.dtype(d).itemsize for d in dts)
    TR = _block_rows(rows, C, item, sub)
    steps = _ceil(rows, TR)
    blk = TR * C * sum(jnp.dtype(d).itemsize for d in dts)
    return pl.pallas_call(
        _binary_kernel(op, relu),
        out_shape=jax.ShapeDtypeStruct((rows, C), dt),
        grid_spec=pl.GridSpec(
            grid=(steps,),
            in_specs=[pl.BlockSpec((TR, C), lambda i: (i, 0)),
                      pl.BlockSpec((TR, C), lambda i: (i, 0))],
            out_specs=pl.BlockSpec((TR, C), lambda i: (i, 0)),
        ),
        compiler_params=pltpu.CompilerParams(
            dimension_semantics=(_grid_semantics(steps),),
            vmem_limit_bytes=_vmem_limit(blk)),
    )(x2, y2)


def _run_scalar_2d(x2, s_arr, op, relu, dt, rows, C):
    dts = (x2.dtype, dt)
    sub = max(_sublane(d) for d in dts)
    item = max(jnp.dtype(d).itemsize for d in dts)
    TR = _block_rows(rows, C, item, sub)
    steps = _ceil(rows, TR)
    blk = TR * C * sum(jnp.dtype(d).itemsize for d in dts)
    return pl.pallas_call(
        _scalar_kernel(op, relu),
        out_shape=jax.ShapeDtypeStruct((rows, C), dt),
        grid_spec=pl.GridSpec(
            grid=(steps,),
            in_specs=[pl.BlockSpec((1, 1), lambda i: (0, 0),
                                   memory_space=pltpu.MemorySpace.SMEM),
                      pl.BlockSpec((TR, C), lambda i: (i, 0))],
            out_specs=pl.BlockSpec((TR, C), lambda i: (i, 0)),
        ),
        compiler_params=pltpu.CompilerParams(
            dimension_semantics=(_grid_semantics(steps),),
            vmem_limit_bytes=_vmem_limit(blk)),
    )(s_arr, x2)


def _flat_binary(x, y, op, relu, dt):
    """x.shape == y.shape (any dtypes). Returns the flat (n,) result in dt."""
    n = x.size
    plan = _plan_2d(n)
    if plan is not None:
        rows, C = plan
        return _run_binary_2d(x.reshape(rows, C), y.reshape(rows, C),
                              op, relu, dt, rows, C).reshape(-1)
    # No multiple-of-128 factorization: Pallas on the aligned bulk, the tiny
    # (<128 element) tail in plain XLA, one concatenate to stitch them.
    xf, yf = x.reshape(-1), y.reshape(-1)
    m = (n // LANE) * LANE
    rows, C = _plan_2d(m)
    bulk = _run_binary_2d(xf[:m].reshape(rows, C), yf[:m].reshape(rows, C),
                          op, relu, dt, rows, C).reshape(-1)
    tail = op(xf[m:].astype(dt), yf[m:].astype(dt)).astype(dt)
    if relu:
        tail = jnp.maximum(tail, jnp.zeros((), dt))
    return jnp.concatenate([bulk, tail])


def _flat_scalar(x, s, s_arr, op, relu, dt):
    n = x.size
    plan = _plan_2d(n)
    if plan is not None:
        rows, C = plan
        return _run_scalar_2d(x.reshape(rows, C), s_arr, op, relu, dt,
                              rows, C).reshape(-1)
    xf = x.reshape(-1)
    m = (n // LANE) * LANE
    rows, C = _plan_2d(m)
    bulk = _run_scalar_2d(xf[:m].reshape(rows, C), s_arr, op, relu, dt,
                          rows, C).reshape(-1)
    tail = op(xf[m:].astype(dt), jnp.asarray(s).astype(dt)).astype(dt)
    if relu:
        tail = jnp.maximum(tail, jnp.zeros((), dt))
    return jnp.concatenate([bulk, tail])


# ---------------------------------------------------------------------------
# one-sided broadcast (bias / per-channel scale) handled inside the kernel
# ---------------------------------------------------------------------------
def _axis_split(out_shape, small_shape):
    """Factor out_shape as (A, M, B) so the small operand varies only over a
    contiguous middle block of axes; None if not of that form."""
    nd = len(out_shape)
    sm = (1,) * (nd - len(small_shape)) + tuple(int(d) for d in small_shape)
    nz = [i for i, d in enumerate(sm) if d != 1]
    if not nz:
        return None
    i0, i1 = nz[0], nz[-1] + 1
    for i in range(i0, i1):
        if sm[i] != out_shape[i]:
            return None
    A = int(np.prod(out_shape[:i0], dtype=np.int64))
    M = int(np.prod(out_shape[i0:i1], dtype=np.int64))
    B = int(np.prod(out_shape[i1:], dtype=np.int64))
    return A, M, B


def _run_broadcast(big, small, op, relu, dt, plan):
    A, M, B = plan
    out_item = jnp.dtype(dt).itemsize
    item = max(jnp.dtype(d).itemsize for d in (big.dtype, small.dtype, dt))
    target = _target_block_bytes()

    if B >= LANE:
        big3 = big.reshape(A, M, B)
        small3 = small.reshape(1, M, 1)
        TB = min(B, max(LANE, (target // max(1, M * item)) // LANE * LANE))
        TA = max(1, min(A, target // max(1, M * TB * item)))
        blk = TA * M * TB * (big.dtype.itemsize + out_item) + M * small.dtype.itemsize
        if 2 * blk + (4 << 20) > _VMEM_SAFE_CAP:
            return None                        # TODO(synk): also tile the M axis
        grid = (_ceil(A, TA), _ceil(B, TB))
        out3 = pl.pallas_call(
            _binary_kernel(op, relu),
            out_shape=jax.ShapeDtypeStruct((A, M, B), dt),
            grid_spec=pl.GridSpec(
                grid=grid,
                in_specs=[pl.BlockSpec((TA, M, TB), lambda a, b: (a, 0, b)),
                          pl.BlockSpec((1, M, 1), lambda a, b: (0, 0, 0))],
                out_specs=pl.BlockSpec((TA, M, TB), lambda a, b: (a, 0, b)),
            ),
            compiler_params=pltpu.CompilerParams(
                dimension_semantics=("parallel", "parallel"),
                vmem_limit_bytes=_vmem_limit(blk)),
        )(big3, small3)
        return out3.reshape(-1)

    # Small trailing extent: fold it onto the lane axis so stores stay
    # lane-dense (the tiny small-operand expansion to M*B elements is free).
    W = M * B
    if W < LANE:
        return None
    sub = max(_sublane(d) for d in (big.dtype, small.dtype, dt))
    big2 = big.reshape(A, W)
    small2 = jnp.broadcast_to(small.reshape(M, 1), (M, B)).reshape(1, W)
    TA = _block_rows(A, W, item, sub)
    blk = TA * W * (big.dtype.itemsize + out_item) + W * small.dtype.itemsize
    if 2 * blk + (4 << 20) > _VMEM_SAFE_CAP:
        return None                            # TODO(synk): tile very wide rows
    steps = _ceil(A, TA)
    out2 = pl.pallas_call(
        _binary_kernel(op, relu),
        out_shape=jax.ShapeDtypeStruct((A, W), dt),
        grid_spec=pl.GridSpec(
            grid=(steps,),
            in_specs=[pl.BlockSpec((TA, W), lambda i: (i, 0)),
                      pl.BlockSpec((1, W), lambda i: (0, 0))],
            out_specs=pl.BlockSpec((TA, W), lambda i: (i, 0)),
        ),
        compiler_params=pltpu.CompilerParams(
            dimension_semantics=(_grid_semantics(steps),),
            vmem_limit_bytes=_vmem_limit(blk)),
    )(big2, small2)
    return out2.reshape(-1)


# ---------------------------------------------------------------------------
# public element-wise entry points
# ---------------------------------------------------------------------------
def _elementwise_scalar(x, s, op, relu=False, out_dtype=None):
    if out_dtype is None:
        out_dtype = jnp.result_type(x, s)      # weak-type aware (torch-like)
    dt = jnp.dtype(out_dtype)
    if jnp.ndim(s) > 0:
        s = jnp.asarray(s).reshape(())
    xa = jnp.asarray(x)
    shape = xa.shape
    if xa.size * dt.itemsize < _SMALL_FASTPATH_BYTES:
        r = jnp.asarray(op(xa, s)).astype(dt)
        if relu:
            r = jnp.maximum(r, jnp.zeros((), dt))
        return r
    sm_dt = jnp.float32 if jnp.issubdtype(dt, jnp.floating) else jnp.int32
    s_arr = jnp.asarray(s).astype(sm_dt).reshape(1, 1)
    return _flat_scalar(xa, s, s_arr, op, relu, dt).reshape(shape)


def _elementwise_binary(x, y, op, relu=False):
    dt = jnp.dtype(jnp.result_type(x, y))
    out_shape = jnp.broadcast_shapes(jnp.shape(x), jnp.shape(y))
    n = int(np.prod(out_shape, dtype=np.int64))
    if n * dt.itemsize < _SMALL_FASTPATH_BYTES:
        r = jnp.asarray(op(x, y)).astype(dt)
        if relu:
            r = jnp.maximum(r, jnp.zeros((), dt))
        return r
    xa, ya = jnp.asarray(x), jnp.asarray(y)
    # size-1 operand: SMEM-scalar kernel (no materialized broadcast in HBM)
    if ya.size == 1:
        return _elementwise_scalar(xa, ya.reshape(()), op, relu=relu, out_dtype=dt)
    if xa.size == 1:
        return _elementwise_scalar(ya, xa.reshape(()), op, relu=relu, out_dtype=dt)
    if xa.shape == ya.shape:
        return _flat_binary(xa, ya, op, relu, dt).reshape(out_shape)
    # one-sided broadcast (bias / per-channel scale): broadcast in-kernel
    big = small = None
    if xa.shape == out_shape:
        big, small = xa, ya
    elif ya.shape == out_shape:
        big, small = ya, xa
    if big is not None and small.size * small.dtype.itemsize <= _SMALL_OPERAND_BYTES:
        plan = _axis_split(out_shape, small.shape)
        if plan is not None:
            res = _run_broadcast(big, small, op, relu, dt, plan)
            if res is not None:
                return res.reshape(out_shape)
    # TODO(synk): two-sided / non-contiguous broadcasts still materialize the
    # broadcast copy before the kernel.
    xb, yb = jnp.broadcast_arrays(xa, ya)
    return _flat_binary(xb, yb, op, relu, dt).reshape(out_shape)


# ---------------------------------------------------------------------------
# cat: tiled pipelined copy of each input slab into the output at its offset
# ---------------------------------------------------------------------------
def _cat_kernel_3d(Ks):
    def kernel(*refs):
        in_refs, o_ref = refs[:-1], refs[-1]
        dt = o_ref.dtype
        off = 0
        for r, k in zip(in_refs, Ks):
            o_ref[:, off:off + k, :] = r[...].astype(dt)
            off += k
    return kernel


def _cat_kernel_2d(Ws):
    def kernel(*refs):
        in_refs, o_ref = refs[:-1], refs[-1]
        dt = o_ref.dtype
        off = 0
        for r, w in zip(in_refs, Ws):
            o_ref[:, off:off + w] = r[...].astype(dt)
            off += w
    return kernel


def _cat(xs, dim=0):
    if not isinstance(xs, (list, tuple)) or len(xs) == 0:
        raise ValueError("cat expects a non-empty sequence of tensors")
    xs = [jnp.asarray(x) for x in xs]
    dt = jnp.dtype(jnp.result_type(*xs))
    nd = xs[0].ndim
    if dim < 0:
        dim += nd
    if not (0 <= dim < max(nd, 1)):
        raise ValueError("cat: dim out of range")
    ref_shape = xs[0].shape
    for x in xs[1:]:
        if x.ndim != nd or any(x.shape[i] != ref_shape[i]
                               for i in range(nd) if i != dim):
            raise ValueError("cat: all tensors must match except along `dim`")

    K_total = int(sum(int(x.shape[dim]) for x in xs))
    B = int(np.prod(ref_shape[:dim], dtype=np.int64))
    inner = int(np.prod(ref_shape[dim + 1:], dtype=np.int64))
    out_shape = ref_shape[:dim] + (K_total,) + ref_shape[dim + 1:]

    if K_total == 0 or B * inner == 0:
        return jnp.zeros(out_shape, dt)
    xs = [x for x in xs if x.shape[dim] > 0]           # drop empty slabs
    if len(xs) == 1:
        return xs[0].astype(dt)
    Ks = [int(x.shape[dim]) for x in xs]

    out_item = jnp.dtype(dt).itemsize
    if B * K_total * inner * out_item < _SMALL_FASTPATH_BYTES:
        return jnp.concatenate([x.astype(dt) for x in xs], axis=dim)

    item = max([out_item] + [x.dtype.itemsize for x in xs])
    slab = _target_block_bytes()

    if inner >= LANE:
        # 3-D path: (B, K_i, inner) slabs, lane-dense inner tiles, multiple
        # batch rows per grid step when per-row slabs are small.
        IT = min(inner, max(LANE, (slab // max(1, K_total * item)) // LANE * LANE))
        TB = max(1, min(B, slab // max(1, K_total * IT * out_item)))
        blk = TB * IT * (K_total * out_item
                         + sum(k * x.dtype.itemsize for k, x in zip(Ks, xs)))
        if 2 * blk + (4 << 20) > _VMEM_SAFE_CAP:
            # TODO(synk): tile the concat (K) axis with per-input sub-blocks
            return jnp.concatenate([x.astype(dt) for x in xs], axis=dim)
        ins = [x.reshape(B, k, inner) for x, k in zip(xs, Ks)]
        in_specs = [pl.BlockSpec((TB, int(k), IT), lambda b, j: (b, 0, j))
                    for k in Ks]
        out_spec = pl.BlockSpec((TB, K_total, IT), lambda b, j: (b, 0, j))
        grid = (_ceil(B, TB), _ceil(inner, IT))
        out3 = pl.pallas_call(
            _cat_kernel_3d(Ks),
            out_shape=jax.ShapeDtypeStruct((B, K_total, inner), dt),
            grid_spec=pl.GridSpec(grid=grid, in_specs=in_specs,
                                  out_specs=out_spec),
            compiler_params=pltpu.CompilerParams(
                dimension_semantics=("parallel", "parallel"),
                vmem_limit_bytes=_vmem_limit(blk)),
        )(*ins)
        return out3.reshape(out_shape)

    # inner < LANE (incl. last-axis concat): fold the concat axis onto the
    # lane dimension so output stores are lane-dense, tile over batch rows.
    Ws = [k * inner for k in Ks]
    W_total = K_total * inner
    sub = max([_sublane(dt)] + [_sublane(x.dtype) for x in xs])
    TBr = max(sub, (slab // max(1, W_total * item)) // sub * sub)
    TBr = min(TBr, B)
    blk = TBr * (W_total * out_item
                 + sum(w * x.dtype.itemsize for w, x in zip(Ws, xs)))
    if 2 * blk + (4 << 20) > _VMEM_SAFE_CAP:
        # TODO(synk): tile the folded concat axis for extremely wide rows
        return jnp.concatenate([x.astype(dt) for x in xs], axis=dim)
    ins = [x.reshape(B, w) for x, w in zip(xs, Ws)]
    in_specs = [pl.BlockSpec((TBr, int(w)), lambda i: (i, 0)) for w in Ws]
    out_spec = pl.BlockSpec((TBr, W_total), lambda i: (i, 0))
    steps = _ceil(B, TBr)
    out2 = pl.pallas_call(
        _cat_kernel_2d(Ws),
        out_shape=jax.ShapeDtypeStruct((B, W_total), dt),
        grid_spec=pl.GridSpec(grid=(steps,), in_specs=in_specs,
                              out_specs=out_spec),
        compiler_params=pltpu.CompilerParams(
            dimension_semantics=(_grid_semantics(steps),),
            vmem_limit_bytes=_vmem_limit(blk)),
    )(*ins)
    return out2.reshape(out_shape)


# ---------------------------------------------------------------------------
# FloatFunctional equivalent
# ---------------------------------------------------------------------------
class FloatFunctional:
    """JAX/Pallas port of the PyTorch FloatFunctional state collector."""

    def __init__(self, quant_gemm_only=True, quant_relu_only=False):
        self.quant_gemm_only = quant_gemm_only
        self.quant_relu_only = quant_relu_only
        # activation_quantizer is torch.nn.Identity() in the reference module
        self.activation_quantizer = lambda t: t
        self.idx = None
        self.param_added = False

    @classmethod
    def from_float(cls, mod, qconfig=None, param_list=None):
        qconfig = qconfig or {}
        functional = cls()
        functional.quant_gemm_only = qconfig.get('quant_gemm_only', True)
        functional.quant_relu_only = qconfig.get('quant_relu_only', False)
        if not functional.quant_gemm_only and 'activation' in qconfig:
            functional.activation_quantizer = qconfig['activation']()
        return functional

    def forward(self, x):
        raise RuntimeError("FloatFunctional is not intended to use the "
                           "'forward'. Please use the underlying operation")

    __call__ = forward

    def add(self, x, y):
        r = _elementwise_binary(x, y, jnp.add)
        if not self.quant_relu_only:
            r = self.activation_quantizer(r)
        return r

    def add_scalar(self, x, y):
        if jnp.ndim(y) == 0 or jnp.size(y) == 1:
            r = _elementwise_scalar(x, y, jnp.add)
        else:
            r = _elementwise_binary(x, y, jnp.add)
        if not self.quant_relu_only:
            r = self.activation_quantizer(r)
        return r

    def mul(self, x, y):
        r = _elementwise_binary(x, y, jnp.multiply)
        if not self.quant_relu_only:
            r = self.activation_quantizer(r)
        return r

    def mul_scalar(self, x, y):
        if jnp.ndim(y) == 0 or jnp.size(y) == 1:
            r = _elementwise_scalar(x, y, jnp.multiply)
        else:
            r = _elementwise_binary(x, y, jnp.multiply)
        if not self.quant_relu_only:
            r = self.activation_quantizer(r)
        return r

    def cat(self, x, dim=0):
        r = _cat(x, dim=dim)
        if not self.quant_relu_only:
            r = self.activation_quantizer(r)
        return r

    def add_relu(self, x, y):
        r = _elementwise_binary(x, y, jnp.add, relu=True)
        r = self.activation_quantizer(r)
        return r


if __name__ == "__main__":
    key = jax.random.PRNGKey(0)
    k1, k2, k3, k4 = jax.random.split(key, 4)

    # small NCHW tensors (batch=2, channels=4, spatial=16) -> XLA fast path
    xs = jax.random.normal(k1, (2, 4, 16, 16), dtype=jnp.float32)
    ys = jax.random.normal(k2, (2, 4, 16, 16), dtype=jnp.float32)

    # larger tensors that exercise the Pallas kernels (2 MiB each, f32)
    x = jax.random.normal(k3, (8, 16, 32, 128), dtype=jnp.float32)
    y = jax.random.normal(k4, (8, 16, 32, 128), dtype=jnp.float32)
    yb = y.astype(jnp.bfloat16)
    bias = 0.1 * jnp.arange(16, dtype=jnp.float32).reshape(1, 16, 1, 1)
    scale = 0.05 * (jnp.arange(16, dtype=jnp.float32) + 1.0).reshape(16, 1, 1)

    # unaligned flat size (not a multiple of 128): aligned-bulk kernel + tail
    xu = jax.random.normal(k1, (100003,), dtype=jnp.float32)
    yu = jax.random.normal(k2, (100003,), dtype=jnp.float32)

    # last-axis concat (lane-folded 2-D cat path)
    ca = jax.random.normal(k3, (64, 64, 96), dtype=jnp.float32)
    cb = jax.random.normal(k4, (64, 64, 32), dtype=jnp.float32)

    f = FloatFunctional()

    checks = [
        # small / fast-path
        (f.add(xs, ys), xs + ys, 1e-5),
        (f.mul(xs, ys), xs * ys, 1e-5),
        (f.add_relu(xs, ys), jnp.maximum(xs + ys, 0.0), 1e-5),
        (f.add_scalar(xs, 2.5), xs + 2.5, 1e-5),
        (f.mul_scalar(xs, 0.5), xs * 0.5, 1e-5),
        (f.cat([xs, ys], dim=1), jnp.concatenate([xs, ys], axis=1), 1e-6),
        (f.add(jnp.asarray(3.0), jnp.asarray(4.0)), jnp.asarray(7.0), 1e-6),
        # Pallas element-wise paths
        (f.add(x, y), x + y, 1e-5),
        (f.mul(x, y), x * y, 1e-5),
        (f.add_relu(x, y), jnp.maximum(x + y, 0.0), 1e-5),
        (f.add_scalar(x, 2.5), x + 2.5, 1e-5),
        (f.mul_scalar(x, 0.5), x * 0.5, 1e-5),
        (f.mul(x, jnp.asarray(2.0, dtype=jnp.float32)), x * 2.0, 1e-5),
        # mixed dtypes: the cast happens inside the kernel
        (f.add(yb, x), yb.astype(jnp.float32) + x, 1e-5),
        (f.add(yb, x.astype(jnp.bfloat16)), yb + x.astype(jnp.bfloat16), 2e-2),
        # one-sided broadcasts handled in-kernel (no materialized copy)
        (f.add(x, bias), x + bias, 1e-5),
        (f.mul(x, scale), x * scale, 1e-5),
        # unaligned flat size
        (f.add(xu, yu), xu + yu, 1e-5),
        (f.mul_scalar(xu, 3.0), xu * 3.0, 1e-5),
        # Pallas cat paths (3-D, dim=0, mixed dtype, lane-folded last axis)
        (f.cat([x, y], dim=1), jnp.concatenate([x, y], axis=1), 1e-6),
        (f.cat([x, y], dim=0), jnp.concatenate([x, y], axis=0), 1e-6),
        (f.cat([x, yb], dim=1),
         jnp.concatenate([x, yb.astype(jnp.float32)], axis=1), 1e-6),
        (f.cat([ca, cb], dim=-1), jnp.concatenate([ca, cb], axis=-1), 1e-6),
    ]

    for i, (out, ref, tol) in enumerate(checks):
        out = jax.block_until_ready(out)
        assert out.shape == ref.shape, (i, out.shape, ref.shape)
        assert out.dtype == ref.dtype, (i, out.dtype, ref.dtype)
        assert jnp.allclose(out.astype(jnp.float32), ref.astype(jnp.float32),
                            atol=tol, rtol=tol), i

    print("KERNEL_OK")
</pallas_src>

<mosaic_0001>
module attributes {stable_mosaic.version = 11 : i64} {
  func.func @kernel(%arg0: i32, %arg1: memref<512x1024xf32, #tpu.memory_space<vmem>>, %arg2: memref<512x1024xf32, #tpu.memory_space<vmem>>, %arg3: memref<512x1024xf32, #tpu.memory_space<vmem>>) attributes {dimension_semantics = [#tpu.dimension_semantics<parallel>], iteration_bounds = array<i64: 1>, scalar_prefetch = 0 : i64, scratch_operands = 0 : i64, tpu.core_type = #tpu.core_type<tc>, window_params = [{transform_indices = @transform_0, window_bounds = array<i64: 512, 1024>}, {transform_indices = @transform_1, window_bounds = array<i64: 512, 1024>}, {transform_indices = @transform_2, window_bounds = array<i64: 512, 1024>}]} {
    %c0 = arith.constant 0 : index
    %c0_0 = arith.constant 0 : index
    %0 = vector.load %arg1[%c0, %c0_0] : memref<512x1024xf32, #tpu.memory_space<vmem>>, vector<512x1024xf32>
    %c0_1 = arith.constant 0 : index
    %c0_2 = arith.constant 0 : index
    %1 = vector.load %arg2[%c0_1, %c0_2] : memref<512x1024xf32, #tpu.memory_space<vmem>>, vector<512x1024xf32>
    %2 = arith.addf %0, %1 : vector<512x1024xf32>
    %c0_3 = arith.constant 0 : index
    %c0_4 = arith.constant 0 : index
    %3 = vector.load %arg3[%c0_3, %c0_4] : memref<512x1024xf32, #tpu.memory_space<vmem>>, vector<512x1024xf32>
    tpu.vector_store %arg3[%c0_3, %c0_4], %2 {strides = array<i32>} : memref<512x1024xf32, #tpu.memory_space<vmem>>, vector<512x1024xf32>,
    return
  }
  func.func @transform_0(%arg0: i32) -> (i32, i32) {
    %c0_i32 = arith.constant 0 : i32
    %c0_i32_0 = arith.constant 0 : i32
    return %arg0, %c0_i32 : i32, i32
  }
  func.func @transform_1(%arg0: i32) -> (i32, i32) {
    %c0_i32 = arith.constant 0 : i32
    %c0_i32_0 = arith.constant 0 : i32
    return %arg0, %c0_i32 : i32, i32
  }
  func.func @transform_2(%arg0: i32) -> (i32, i32) {
    %c0_i32 = arith.constant 0 : i32
    %c0_i32_0 = arith.constant 0 : i32
    return %arg0, %c0_i32 : i32, i32
  }
}

</mosaic_0001>

<bundles_post_ra>
// kernel: tpu_custom_call.1
= control target key start
LH: loop header
LB: loop body
LE: loop exit
PB: predicated region body
PF: predicated region fallthrough
CT: control target
= control target key end

     0   :  { %7 = vsyncpa [#allocation3], 0  ;;  %s2233_s0 = inlined_call_operand.hbm [shape: f32[512,1024], index: 0, kind: input, shape index: {}]   ;;  %s2234_s1 = inlined_call_operand.hbm [shape: f32[512,1024], index: 1, kind: input, shape index: {}]   ;;  %s2235_s2 = inlined_call_operand.hbm [shape: f32[512,1024], index: 2, kind: output, shape index: {}]  }
   0x1   :  { %8 = vsyncpa [#allocation6], 0 }
   0x2   :  { %9 = vsyncpa [#allocation4], 0  ;;  %s14_s11 = sshll.u32 %s2233_s0, 4  ;;  %s2195_s12 = smov [#allocation2]   ;;  %s15_s11 = int_to_ptr.hbm [resolvable:$true] %s14_s11 }
   0x3   :  { %s16_s13 = sshll.u32 %s2195_s12, 4  ;;  %s27_s16 = sshll.u32 %s2234_s1, 4  ;;  %s17_s13 = int_to_ptr.vmem [resolvable:$true] %s16_s13  ;;  %s28_s16 = int_to_ptr.hbm [resolvable:$true] %s27_s16 }
   0x4   :  { %s2196_s17 = smov 1024   ;;  %s2197_s18 = smov 64  }
   0x5   :  { %22 = dma.hbm_to_vmem [thread:$0]  %s15_s11, 65536, %s17_s13, [#allocation3], %s2196_s17, %s2196_s17, %s2197_s18  }
   0x6   :  { %s2198_s19 = smov [#allocation5]  }
   0x7   :  { %s29_s20 = sshll.u32 %s2198_s19, 4  ;;  %s30_s20 = int_to_ptr.vmem [resolvable:$true] %s29_s20 }
   0x8   :  { %35 = dma.hbm_to_vmem [thread:$0]  %s28_s16, 65536, %s30_s20, [#allocation6], %s2196_s17, %s2196_s17, %s2197_s18  }
   0x9   :  { %2189 = dma.done.wait [#allocation3], 65536  }
   0xa   :  { %2190 = vsyncadd [#allocation3], 4294901760 }
   0xb   :  { %2191 = dma.done.wait [#allocation6], 65536  }
   0xc   :  { %2192 = vsyncadd [#allocation6], 4294901760  ;;  %v44_v0 = vld [vmem:[#allocation2] sm:$0xff]  ;;  %v45_v2 = vld [vmem:[#allocation2 + $0x8] sm:$0xff]  ;;  %s2199_s0 = smov [#allocation7]   ;;  %s2098_s23 = sshll.u32 %s2235_s2, 4  ;;  %s2099_s23 = int_to_ptr.hbm [resolvable:$true] %s2098_s23 }
   0xd   :  { %v556_v1 = vld [vmem:[#allocation5] sm:$0xff]  ;;  %v557_v4 = vld [vmem:[#allocation5 + $0x8] sm:$0xff]  ;;  %v46_v5 = vld [vmem:[#allocation2 + $0x10] sm:$0xff]  ;;  %s2096_s1 = sshll.u32 %s2199_s0, 4  ;;  %s2097_s1 = int_to_ptr.vmem [resolvable:$true] %s2096_s1 }
   0xe   :  { %v1068_v3 = vadd.f32 %v556_v1, %v44_v0  ;;  %v558_v6 = vld [vmem:[#allocation5 + $0x10] sm:$0xff]  ;;  %v1069_v7 = vadd.f32 %v557_v4, %v45_v2  ;;  %v47_v9 = vld [vmem:[#allocation2 + $0x18] sm:$0xff]  ;;  %v48_v11 = vld [vmem:[#allocation2 + $0x20] sm:$0xff] }
   0xf   :  { %v1070_v8 = vadd.f32 %v558_v6, %v46_v5  ;;  %v559_v10 = vld [vmem:[#allocation5 + $0x18] sm:$0xff]  ;;  %v560_v13 = vld [vmem:[#allocation5 + $0x20] sm:$0xff]  ;;  %v49_v14 = vld [vmem:[#allocation2 + $0x28] sm:$0xff] }
  0x10   :  { %1580 = vst [vmem:[#allocation7] sm:$0xff] %v1068_v3  ;;  %v1071_v12 = vadd.f32 %v559_v10, %v47_v9  ;;  %v561_v15 = vld [vmem:[#allocation5 + $0x28] sm:$0xff]  ;;  %v1072_v16 = vadd.f32 %v560_v13, %v48_v11  ;;  %v50_v18 = vld [vmem:[#allocation2 + $0x30] sm:$0xff]  ;;  %v51_v20 = vld [vmem:[#allocation2 + $0x38] sm:$0xff] }
  0x11   :  { %1581 = vst [vmem:[#allocation7 + $0x8] sm:$0xff] %v1069_v7  ;;  %v1073_v17 = vadd.f32 %v561_v15, %v49_v14  ;;  %v562_v19 = vld [vmem:[#allocation5 + $0x30] sm:$0xff]  ;;  %v563_v22 = vld [vmem:[#allocation5 + $0x38] sm:$0xff]  ;;  %v52_v23 = vld [vmem:[#allocation2 + $0x40] sm:$0xff] }
  0x12   :  { %1582 = vst [vmem:[#allocation7 + $0x10] sm:$0xff] %v1070_v8  ;;  %v1074_v21 = vadd.f32 %v562_v19, %v50_v18  ;;  %v564_v24 = vld [vmem:[#allocation5 + $0x40] sm:$0xff]  ;;  %v1075_v25 = vadd.f32 %v563_v22, %v51_v20  ;;  %v53_v26 = vld [vmem:[#allocation2 + $0x48] sm:$0xff]  ;;  %v54_v28 = vld [vmem:[#allocation2 + $0x50] sm:$0xff] }
  0x13   :  { %1583 = vst [vmem:[#allocation7 + $0x18] sm:$0xff] %v1071_v12  ;;  %v565_v27 = vld [vmem:[#allocation5 + $0x48] sm:$0xff]  ;;  %v1076_v29 = vadd.f32 %v564_v24, %v52_v23  ;;  %v566_v30 = vld [vmem:[#allocation5 + $0x50] sm:$0xff]  ;;  %v55_v31 = vld [vmem:[#allocation2 + $0x58] sm:$0xff] }
  0x14   :  { %1584 = vst [vmem:[#allocation7 + $0x20] sm:$0xff] %v1072_v16  ;;  %v567_v32 = vld [vmem:[#allocation5 + $0x58] sm:$0xff]  ;;  %v1077_v33 = vadd.f32 %v565_v27, %v53_v26  ;;  %v56_v34 = vld [vmem:[#allocation2 + $0x60] sm:$0xff]  ;;  %v1078_v36 = vadd.f32 %v566_v30, %v54_v28  ;;  %v57_v37 = vld [vmem:[#allocation2 + $0x68] sm:$0xff] }
  0x15   :  { %1585 = vst [vmem:[#allocation7 + $0x28] sm:$0xff] %v1073_v17  ;;  %v568_v35 = vld [vmem:[#allocation5 + $0x60] sm:$0xff]  ;;  %v569_v38 = vld [vmem:[#allocation5 + $0x68] sm:$0xff]  ;;  %v1079_v39 = vadd.f32 %v567_v32, %v55_v31  ;;  %v58_v40 = vld [vmem:[#allocation2 + $0x70] sm:$0xff] }
  0x16   :  { %1586 = vst [vmem:[#allocation7 + $0x30] sm:$0xff] %v1074_v21  ;;  %v570_v41 = vld [vmem:[#allocation5 + $0x70] sm:$0xff]  ;;  %v1080_v42 = vadd.f32 %v568_v35, %v56_v34  ;;  %v59_v43 = vld [vmem:[#allocation2 + $0x78] sm:$0xff]  ;;  %v1081_v45 = vadd.f32 %v569_v38, %v57_v37  ;;  %v60_v46 = vld [vmem:[#allocation2 + $0x80] sm:$0xff] }
  0x17   :  { %1587 = vst [vmem:[#allocation7 + $0x38] sm:$0xff] %v1075_v25  ;;  %v571_v44 = vld [vmem:[#allocation5 + $0x78] sm:$0xff]  ;;  %v572_v47 = vld [vmem:[#allocation5 + $0x80] sm:$0xff]  ;;  %v1082_v48 = vadd.f32 %v570_v41, %v58_v40  ;;  %v61_v49 = vld [vmem:[#allocation2 + $0x88] sm:$0xff] }
  0x18   :  { %1588 = vst [vmem:[#allocation7 + $0x40] sm:$0xff] %v1076_v29  ;;  %v573_v50 = vld [vmem:[#allocation5 + $0x88] sm:$0xff]  ;;  %v1083_v51 = vadd.f32 %v571_v44, %v59_v43  ;;  %v62_v52 = vld [vmem:[#allocation2 + $0x90] sm:$0xff]  ;;  %v1084_v54 = vadd.f32 %v572_v47, %v60_v46  ;;  %v63_v55 = vld [vmem:[#allocation2 + $0x98] sm:$0xff] }
  0x19   :  { %1589 = vst [vmem:[#allocation7 + $0x48] sm:$0xff] %v1077_v33  ;;  %v574_v53 = vld [vmem:[#allocation5 + $0x90] sm:$0xff]  ;;  %v575_v56 = vld [vmem:[#allocation5 + $0x98] sm:$0xff]  ;;  %v1085_v57 = vadd.f32 %v573_v50, %v61_v49  ;;  %v64_v58 = vld [vmem:[#allocation2 + $0xa0] sm:$0xff] }
  0x1a   :  { %1590 = vst [vmem:[#allocation7 + $0x50] sm:$0xff] %v1078_v36  ;;  %v576_v59 = vld [vmem:[#allocation5 + $0xa0] sm:$0xff]  ;;  %v1086_v60 = vadd.f32 %v574_v53, %v62_v52  ;;  %v65_v61 = vld [vmem:[#allocation2 + $0xa8] sm:$0xff]  ;;  %v1087_v63 = vadd.f32 %v575_v56, %v63_v55  ;;  %v66_v0 = vld [vmem:[#allocation2 + $0xb0] sm:$0xff] }
  0x1b   :  { %1591 = vst [vmem:[#allocation7 + $0x58] sm:$0xff] %v1079_v39  ;;  %v577_v62 = vld [vmem:[#allocation5 + $0xa8] sm:$0xff]  ;;  %v578_v1 = vld [vmem:[#allocation5 + $0xb0] sm:$0xff]  ;;  %v1088_v2 = vadd.f32 %v576_v59, %v64_v58  ;;  %v67_v3 = vld [vmem:[#allocation2 + $0xb8] sm:$0xff] }
  0x1c   :  { %1592 = vst [vmem:[#allocation7 + $0x60] sm:$0xff] %v1080_v42  ;;  %v579_v4 = vld [vmem:[#allocation5 + $0xb8] sm:$0xff]  ;;  %v1089_v5 = vadd.f32 %v577_v62, %v65_v61  ;;  %v68_v6 = vld [vmem:[#allocation2 + $0xc0] sm:$0xff]  ;;  %v1090_v8 = vadd.f32 %v578_v1, %v66_v0  ;;  %v69_v9 = vld [vmem:[#allocation2 + $0xc8] sm:$0xff] }
  0x1d   :  { %1593 = vst [vmem:[#allocation7 + $0x68] sm:$0xff] %v1081_v45  ;;  %v580_v7 = vld [vmem:[#allocation5 + $0xc0] sm:$0xff]  ;;  %v581_v10 = vld [vmem:[#allocation5 + $0xc8] sm:$0xff]  ;;  %v1091_v11 = vadd.f32 %v579_v4, %v67_v3  ;;  %v70_v12 = vld [vmem:[#allocation2 + $0xd0] sm:$0xff] }
  0x1e   :  { %1594 = vst [vmem:[#allocation7 + $0x70] sm:$0xff] %v1082_v48  ;;  %v582_v13 = vld [vmem:[#allocation5 + $0xd0] sm:$0xff]  ;;  %v1092_v14 = vadd.f32 %v580_v7, %v68_v6  ;;  %v71_v15 = vld [vmem:[#allocation2 + $0xd8] sm:$0xff]  ;;  %v1093_v17 = vadd.f32 %v581_v10, %v69_v9  ;;  %v72_v18 = vld [vmem:[#allocation2 + $0xe0] sm:$0xff] }
  0x1f   :  { %1595 = vst [vmem:[#allocation7 + $0x78] sm:$0xff] %v1083_v51  ;;  %v583_v16 = vld [vmem:[#allocation5 + $0xd8] sm:$0xff]  ;;  %v584_v19 = vld [vmem:[#allocation5 + $0xe0] sm:$0xff]  ;;  %v1094_v20 = vadd.f32 %v582_v13, %v70_v12  ;;  %v73_v21 = vld [vmem:[#allocation2 + $0xe8] sm:$0xff] }
  0x20   :  { %1596 = vst [vmem:[#allocation7 + $0x80] sm:$0xff] %v1084_v54  ;;  %v585_v22 = vld [vmem:[#allocation5 + $0xe8] sm:$0xff]  ;;  %v1095_v23 = vadd.f32 %v583_v16, %v71_v15  ;;  %v74_v24 = vld [vmem:[#allocation2 + $0xf0] sm:$0xff]  ;;  %v1096_v26 = vadd.f32 %v584_v19, %v72_v18  ;;  %v75_v27 = vld [vmem:[#allocation2 + $0xf8] sm:$0xff] }
  0x21   :  { %1597 = vst [vmem:[#allocation7 + $0x88] sm:$0xff] %v1085_v57  ;;  %v586_v25 = vld [vmem:[#allocation5 + $0xf0] sm:$0xff]  ;;  %v587_v28 = vld [vmem:[#allocation5 + $0xf8] sm:$0xff]  ;;  %v1097_v29 = vadd.f32 %v585_v22, %v73_v21  ;;  %v76_v30 = vld [vmem:[#allocation2 + $0x100] sm:$0xff] }
  0x22   :  { %1598 = vst [vmem:[#allocation7 + $0x90] sm:$0xff] %v1086_v60  ;;  %v588_v31 = vld [vmem:[#allocation5 + $0x100] sm:$0xff]  ;;  %v1098_v32 = vadd.f32 %v586_v25, %v74_v24  ;;  %v77_v33 = vld [vmem:[#allocation2 + $0x108] sm:$0xff]  ;;  %v1099_v35 = vadd.f32 %v587_v28, %v75_v27  ;;  %v78_v36 = vld [vmem:[#allocation2 + $0x110] sm:$0xff] }
  0x23   :  { %1599 = vst [vmem:[#allocation7 + $0x98] sm:$0xff] %v1087_v63  ;;  %v589_v34 = vld [vmem:[#allocation5 + $0x108] sm:$0xff]  ;;  %v590_v37 = vld [vmem:[#allocation5 + $0x110] sm:$0xff]  ;;  %v1100_v38 = vadd.f32 %v588_v31, %v76_v30  ;;  %v79_v39 = vld [vmem:[#allocation2 + $0x118] sm:$0xff] }
  0x24   :  { %1600 = vst [vmem:[#allocation7 + $0xa0] sm:$0xff] %v1088_v2  ;;  %v591_v40 = vld [vmem:[#allocation5 + $0x118] sm:$0xff]  ;;  %v1101_v41 = vadd.f32 %v589_v34, %v77_v33  ;;  %v80_v42 = vld [vmem:[#allocation2 + $0x120] sm:$0xff]  ;;  %v1102_v44 = vadd.f32 %v590_v37, %v78_v36  ;;  %v81_v45 = vld [vmem:[#allocation2 + $0x128] sm:$0xff] }
  0x25   :  { %1601 = vst [vmem:[#allocation7 + $0xa8] sm:$0xff] %v1089_v5  ;;  %v592_v43 = vld [vmem:[#allocation5 + $0x120] sm:$0xff]  ;;  %v593_v46 = vld [vmem:[#allocation5 + $0x128] sm:$0xff]  ;;  %v1103_v47 = vadd.f32 %v591_v40, %v79_v39  ;;  %v82_v48 = vld [vmem:[#allocation2 + $0x130] sm:$0xff] }
  0x26   :  { %1602 = vst [vmem:[#allocation7 + $0xb0] sm:$0xff] %v1090_v8  ;;  %v594_v49 = vld [vmem:[#allocation5 + $0x130] sm:$0xff]  ;;  %v1104_v50 = vadd.f32 %v592_v43, %v80_v42  ;;  %v83_v51 = vld [vmem:[#allocation2 + $0x138] sm:$0xff]  ;;  %v1105_v53 = vadd.f32 %v593_v46, %v81_v45  ;;  %v84_v54 = vld [vmem:[#allocation2 + $0x140] sm:$0xff] }
  0x27   :  { %1603 = vst [vmem:[#allocation7 + $0xb8] sm:$0xff] %v1091_v11  ;;  %v595_v52 = vld [vmem:[#allocation5 + $0x138] sm:$0xff]  ;;  %v596_v55 = vld [vmem:[#allocation5 + $0x140] sm:$0xff]  ;;  %v1106_v56 = vadd.f32 %v594_v49, %v82_v48  ;;  %v85_v57 = vld [vmem:[#allocation2 + $0x148] sm:$0xff] }
  0x28   :  { %1604 = vst [vmem:[#allocation7 + $0xc0] sm:$0xff] %v1092_v14  ;;  %v597_v58 = vld [vmem:[#allocation5 + $0x148] sm:$0xff]  ;;  %v1107_v59 = vadd.f32 %v595_v52, %v83_v51  ;;  %v86_v60 = vld [vmem:[#allocation2 + $0x150] sm:$0xff]  ;;  %v1108_v62 = vadd.f32 %v596_v55, %v84_v54  ;;  %v87_v63 = vld [vmem:[#allocation2 + $0x158] sm:$0xff] }
  0x29   :  { %1605 = vst [vmem:[#allocation7 + $0xc8] sm:$0xff] %v1093_v17  ;;  %v598_v61 = vld [vmem:[#allocation5 + $0x150] sm:$0xff]  ;;  %v599_v0 = vld [vmem:[#allocation5 + $0x158] sm:$0xff]  ;;  %v1109_v1 = vadd.f32 %v597_v58, %v85_v57  ;;  %v88_v2 = vld [vmem:[#allocation2 + $0x160] sm:$0xff] }
  0x2a   :  { %1606 = vst [vmem:[#allocation7 + $0xd0] sm:$0xff] %v1094_v20  ;;  %v600_v3 = vld [vmem:[#allocation5 + $0x160] sm:$0xff]  ;;  %v1110_v4 = vadd.f32 %v598_v61, %v86_v60  ;;  %v89_v5 = vld [vmem:[#allocation2 + $0x168] sm:$0xff]  ;;  %v1111_v7 = vadd.f32 %v599_v0, %v87_v63  ;;  %v90_v8 = vld [vmem:[#allocation2 + $0x170] sm:$0xff] }
  0x2b   :  { %1607 = vst [vmem:[#allocation7 + $0xd8] sm:$0xff] %v1095_v23  ;;  %v601_v6 = vld [vmem:[#allocation5 + $0x168] sm:$0xff]  ;;  %v602_v9 = vld [vmem:[#allocation5 + $0x170] sm:$0xff]  ;;  %v1112_v10 = vadd.f32 %v600_v3, %v88_v2  ;;  %v91_v11 = vld [vmem:[#allocation2 + $0x178] sm:$0xff] }
  0x2c   :  { %1608 = vst [vmem:[#allocation7 + $0xe0] sm:$0xff] %v1096_v26  ;;  %v603_v12 = vld [vmem:[#allocation5 + $0x178] sm:$0xff]  ;;  %v1113_v13 = vadd.f32 %v601_v6, %v89_v5  ;;  %v92_v14 = vld [vmem:[#allocation2 + $0x180] sm:$0xff]  ;;  %v1114_v16 = vadd.f32 %v602_v9, %v90_v8  ;;  %v93_v17 = vld [vmem:[#allocation2 + $0x188] sm:$0xff] }
  0x2d   :  { %1609 = vst [vmem:[#allocation7 + $0xe8] sm:$0xff] %v1097_v29  ;;  %v604_v15 = vld [vmem:[#allocation5 + $0x180] sm:$0xff]  ;;  %v605_v18 = vld [vmem:[#allocation5 + $0x188] sm:$0xff]  ;;  %v1115_v19 = vadd.f32 %v603_v12, %v91_v11  ;;  %v94_v20 = vld [vmem:[#allocation2 + $0x190] sm:$0xff] }
  0x2e   :  { %1610 = vst [vmem:[#allocation7 + $0xf0] sm:$0xff] %v1098_v32  ;;  %v606_v21 = vld [vmem:[#allocation5 + $0x190] sm:$0xff]  ;;  %v1116_v22 = vadd.f32 %v604_v15, %v92_v14  ;;  %v95_v23 = vld [vmem:[#allocation2 + $0x198] sm:$0xff]  ;;  %v1117_v25 = vadd.f32 %v605_v18, %v93_v17  ;;  %v96_v26 = vld [vmem:[#allocation2 + $0x1a0] sm:$0xff] }
  0x2f   :  { %1611 = vst [vmem:[#allocation7 + $0xf8] sm:$0xff] %v1099_v35  ;;  %v607_v24 = vld [vmem:[#allocation5 + $0x198] sm:$0xff]  ;;  %v608_v27 = vld [vmem:[#allocation5 + $0x1a0] sm:$0xff]  ;;  %v1118_v28 = vadd.f32 %v606_v21, %v94_v20  ;;  %v97_v29 = vld [vmem:[#allocation2 + $0x1a8] sm:$0xff] }
  0x30   :  { %1612 = vst [vmem:[#allocation7 + $0x100] sm:$0xff] %v1100_v38  ;;  %v609_v30 = vld [vmem:[#allocation5 + $0x1a8] sm:$0xff]  ;;  %v1119_v31 = vadd.f32 %v607_v24, %v95_v23  ;;  %v98_v32 = vld [vmem:[#allocation2 + $0x1b0] sm:$0xff]  ;;  %v1120_v34 = vadd.f32 %v608_v27, %v96_v26  ;;  %v99_v35 = vld [vmem:[#allocation2 + $0x1b8] sm:$0xff] }
  0x31   :  { %1613 = vst [vmem:[#allocation7 + $0x108] sm:$0xff] %v1101_v41  ;;  %v610_v33 = vld [vmem:[#allocation5 + $0x1b0] sm:$0xff]  ;;  %v611_v36 = vld [vmem:[#allocation5 + $0x1b8] sm:$0xff]  ;;  %v1121_v37 = vadd.f32 %v609_v30, %v97_v29  ;;  %v100_v38 = vld [vmem:[#allocation2 + $0x1c0] sm:$0xff] }
  0x32   :  { %1614 = vst [vmem:[#allocation7 + $0x110] sm:$0xff] %v1102_v44  ;;  %v612_v39 = vld [vmem:[#allocation5 + $0x1c0] sm:$0xff]  ;;  %v1122_v40 = vadd.f32 %v610_v33, %v98_v32  ;;  %v101_v41 = vld [vmem:[#allocation2 + $0x1c8] sm:$0xff]  ;;  %v1123_v43 = vadd.f32 %v611_v36, %v99_v35  ;;  %v102_v44 = vld [vmem:[#allocation2 + $0x1d0] sm:$0xff] }
  0x33   :  { %1615 = vst [vmem:[#allocation7 + $0x118] sm:$0xff] %v1103_v47  ;;  %v613_v42 = vld [vmem:[#allocation5 + $0x1c8] sm:$0xff]  ;;  %v614_v45 = vld [vmem:[#allocation5 + $0x1d0] sm:$0xff]  ;;  %v1124_v46 = vadd.f32 %v612_v39, %v100_v38  ;;  %v103_v47 = vld [vmem:[#allocation2 + $0x1d8] sm:$0xff] }
  0x34   :  { %1616 = vst [vmem:[#allocation7 + $0x120] sm:$0xff] %v1104_v50  ;;  %v615_v48 = vld [vmem:[#allocation5 + $0x1d8] sm:$0xff]  ;;  %v1125_v49 = vadd.f32 %v613_v42, %v101_v41  ;;  %v104_v50 = vld [vmem:[#allocation2 + $0x1e0] sm:$0xff]  ;;  %v1126_v52 = vadd.f32 %v614_v45, %v102_v44  ;;  %v617_v54 = vld [vmem:[#allocation5 + $0x1e8] sm:$0xff] }
  0x35   :  { %1617 = vst [vmem:[#allocation7 + $0x128] sm:$0xff] %v1105_v53  ;;  %v616_v51 = vld [vmem:[#allocation5 + $0x1e0] sm:$0xff]  ;;  %v105_v53 = vld [vmem:[#allocation2 + $0x1e8] sm:$0xff]  ;;  %v1127_v55 = vadd.f32 %v615_v48, %v103_v47  ;;  %v618_v57 = vld [vmem:[#allocation5 + $0x1f0] sm:$0xff] }
  0x36   :  { %1618 = vst [vmem:[#allocation7 + $0x130] sm:$0xff] %v1106_v56  ;;  %v106_v56 = vld [vmem:[#allocation2 + $0x1f0] sm:$0xff]  ;;  %v1128_v58 = vadd.f32 %v616_v51, %v104_v50  ;;  %v619_v60 = vld [vmem:[#allocation5 + $0x1f8] sm:$0xff]  ;;  %v1129_v61 = vadd.f32 %v617_v54, %v105_v53  ;;  %v620_v63 = vld [vmem:[#allocation5 + $0x200] sm:$0xff] }
  0x37   :  { %1619 = vst [vmem:[#allocation7 + $0x138] sm:$0xff] %v1107_v59  ;;  %v107_v59 = vld [vmem:[#allocation2 + $0x1f8] sm:$0xff]  ;;  %v1130_v0 = vadd.f32 %v618_v57, %v106_v56  ;;  %v621_v2 = vld [vmem:[#allocation5 + $0x208] sm:$0xff]  ;;  %v622_v5 = vld [vmem:[#allocation5 + $0x210] sm:$0xff] }
  0x38   :  { %1620 = vst [vmem:[#allocation7 + $0x140] sm:$0xff] %v1108_v62  ;;  %v108_v62 = vld [vmem:[#allocation2 + $0x200] sm:$0xff]  ;;  %v1131_v3 = vadd.f32 %v619_v60, %v107_v59  ;;  %v623_v8 = vld [vmem:[#allocation5 + $0x218] sm:$0xff]  ;;  %v625_v14 = vld [vmem:[#allocation5 + $0x228] sm:$0xff] }
  0x39   :  { %1621 = vst [vmem:[#allocation7 + $0x148] sm:$0xff] %v1109_v1  ;;  %v109_v1 = vld [vmem:[#allocation2 + $0x208] sm:$0xff]  ;;  %v1132_v6 = vadd.f32 %v620_v63, %v108_v62  ;;  %v624_v11 = vld [vmem:[#allocation5 + $0x220] sm:$0xff]  ;;  %v626_v17 = vld [vmem:[#allocation5 + $0x230] sm:$0xff] }
  0x3a   :  { %1622 = vst [vmem:[#allocation7 + $0x150] sm:$0xff] %v1110_v4  ;;  %v110_v4 = vld [vmem:[#allocation2 + $0x210] sm:$0xff]  ;;  %v1133_v9 = vadd.f32 %v621_v2, %v109_v1  ;;  %v627_v20 = vld [vmem:[#allocation5 + $0x238] sm:$0xff]  ;;  %v628_v23 = vld [vmem:[#allocation5 + $0x240] sm:$0xff] }
  0x3b   :  { %1623 = vst [vmem:[#allocation7 + $0x158] sm:$0xff] %v1111_v7  ;;  %v111_v7 = vld [vmem:[#allocation2 + $0x218] sm:$0xff]  ;;  %v1134_v12 = vadd.f32 %v622_v5, %v110_v4  ;;  %v629_v26 = vld [vmem:[#allocation5 + $0x248] sm:$0xff]  ;;  %v630_v29 = vld [vmem:[#allocation5 + $0x250] sm:$0xff] }
  0x3c   :  { %1624 = vst [vmem:[#allocation7 + $0x160] sm:$0xff] %v1112_v10  ;;  %v112_v10 = vld [vmem:[#allocation2 + $0x220] sm:$0xff]  ;;  %v1135_v15 = vadd.f32 %v623_v8, %v111_v7  ;;  %v631_v32 = vld [vmem:[#allocation5 + $0x258] sm:$0xff]  ;;  %v633_v38 = vld [vmem:[#allocation5 + $0x268] sm:$0xff] }
  0x3d   :  { %1625 = vst [vmem:[#allocation7 + $0x168] sm:$0xff] %v1113_v13  ;;  %v113_v13 = vld [vmem:[#allocation2 + $0x228] sm:$0xff]  ;;  %v1136_v18 = vadd.f32 %v624_v11, %v112_v10  ;;  %v632_v35 = vld [vmem:[#allocation5 + $0x260] sm:$0xff]  ;;  %v634_v41 = vld [vmem:[#allocation5 + $0x270] sm:$0xff] }
  0x3e   :  { %1626 = vst [vmem:[#allocation7 + $0x170] sm:$0xff] %v1114_v16  ;;  %v114_v16 = vld [vmem:[#allocation2 + $0x230] sm:$0xff]  ;;  %v1137_v21 = vadd.f32 %v625_v14, %v113_v13  ;;  %v635_v44 = vld [vmem:[#allocation5 + $0x278] sm:$0xff]  ;;  %v636_v47 = vld [vmem:[#allocation5 + $0x280] sm:$0xff] }
  0x3f   :  { %1627 = vst [vmem:[#allocation7 + $0x178] sm:$0xff] %v1115_v19  ;;  %v115_v19 = vld [vmem:[#allocation2 + $0x238] sm:$0xff]  ;;  %v1138_v24 = vadd.f32 %v626_v17, %v114_v16  ;;  %v637_v50 = vld [vmem:[#allocation5 + $0x288] sm:$0xff]  ;;  %v638_v53 = vld [vmem:[#allocation5 + $0x290] sm:$0xff] }
  0x40   :  { %1628 = vst [vmem:[#allocation7 + $0x180] sm:$0xff] %v1116_v22  ;;  %v116_v22 = vld [vmem:[#allocation2 + $0x240] sm:$0xff]  ;;  %v1139_v27 = vadd.f32 %v627_v20, %v115_v19  ;;  %v639_v56 = vld [vmem:[#allocation5 + $0x298] sm:$0xff]  ;;  %v641_v62 = vld [vmem:[#allocation5 + $0x2a8] sm:$0xff] }
  0x41   :  { %1629 = vst [vmem:[#allocation7 + $0x188] sm:$0xff] %v1117_v25  ;;  %v117_v25 = vld [vmem:[#allocation2 + $0x248] sm:$0xff]  ;;  %v1140_v30 = vadd.f32 %v628_v23, %v116_v22  ;;  %v640_v59 = vld [vmem:[#allocation5 + $0x2a0] sm:$0xff]  ;;  %v642_v1 = vld [vmem:[#allocation5 + $0x2b0] sm:$0xff] }
  0x42   :  { %1630 = vst [vmem:[#allocation7 + $0x190] sm:$0xff] %v1118_v28  ;;  %v118_v28 = vld [vmem:[#allocation2 + $0x250] sm:$0xff]  ;;  %v1141_v33 = vadd.f32 %v629_v26, %v117_v25  ;;  %v643_v4 = vld [vmem:[#allocation5 + $0x2b8] sm:$0xff]  ;;  %v644_v7 = vld [vmem:[#allocation5 + $0x2c0] sm:$0xff] }
  0x43   :  { %1631 = vst [vmem:[#allocation7 + $0x198] sm:$0xff] %v1119_v31  ;;  %v119_v31 = vld [vmem:[#allocation2 + $0x258] sm:$0xff]  ;;  %v1142_v36 = vadd.f32 %v630_v29, %v118_v28  ;;  %v645_v10 = vld [vmem:[#allocation5 + $0x2c8] sm:$0xff]  ;;  %v646_v13 = vld [vmem:[#allocation5 + $0x2d0] sm:$0xff] }
  0x44   :  { %1632 = vst [vmem:[#allocation7 + $0x1a0] sm:$0xff] %v1120_v34  ;;  %v120_v34 = vld [vmem:[#allocation2 + $0x260] sm:$0xff]  ;;  %v1143_v39 = vadd.f32 %v631_v32, %v119_v31  ;;  %v647_v16 = vld [vmem:[#allocation5 + $0x2d8] sm:$0xff]  ;;  %v649_v22 = vld [vmem:[#allocation5 + $0x2e8] sm:$0xff] }
  0x45   :  { %1633 = vst [vmem:[#allocation7 + $0x1a8] sm:$0xff] %v1121_v37  ;;  %v121_v37 = vld [vmem:[#allocation2 + $0x268] sm:$0xff]  ;;  %v1144_v42 = vadd.f32 %v632_v35, %v120_v34  ;;  %v648_v19 = vld [vmem:[#allocation5 + $0x2e0] sm:$0xff]  ;;  %v650_v25 = vld [vmem:[#allocation5 + $0x2f0] sm:$0xff] }
  0x46   :  { %1634 = vst [vmem:[#allocation7 + $0x1b0] sm:$0xff] %v1122_v40  ;;  %v122_v40 = vld [vmem:[#allocation2 + $0x270] sm:$0xff]  ;;  %v1145_v45 = vadd.f32 %v633_v38, %v121_v37  ;;  %v651_v28 = vld [vmem:[#allocation5 + $0x2f8] sm:$0xff]  ;;  %v652_v31 = vld [vmem:[#allocation5 + $0x300] sm:$0xff] }
  0x47   :  { %1635 = vst [vmem:[#allocation7 + $0x1b8] sm:$0xff] %v1123_v43  ;;  %v123_v43 = vld [vmem:[#allocation2 + $0x278] sm:$0xff]  ;;  %v1146_v48 = vadd.f32 %v634_v41, %v122_v40  ;;  %v653_v34 = vld [vmem:[#allocation5 + $0x308] sm:$0xff]  ;;  %v654_v37 = vld [vmem:[#allocation5 + $0x310] sm:$0xff] }
  0x48   :  { %1636 = vst [vmem:[#allocation7 + $0x1c0] sm:$0xff] %v1124_v46  ;;  %v124_v46 = vld [vmem:[#allocation2 + $0x280] sm:$0xff]  ;;  %v1147_v51 = vadd.f32 %v635_v44, %v123_v43  ;;  %v655_v40 = vld [vmem:[#allocation5 + $0x318] sm:$0xff] }
  0x49   :  { %1637 = vst [vmem:[#allocation7 + $0x1c8] sm:$0xff] %v1125_v49  ;;  %v125_v49 = vld [vmem:[#allocation2 + $0x288] sm:$0xff]  ;;  %v1148_v54 = vadd.f32 %v636_v47, %v124_v46  ;;  %v656_v43 = vld [vmem:[#allocation5 + $0x320] sm:$0xff] }
  0x4a   :  { %1638 = vst [vmem:[#allocation7 + $0x1d0] sm:$0xff] %v1126_v52  ;;  %v126_v52 = vld [vmem:[#allocation2 + $0x290] sm:$0xff]  ;;  %v1149_v57 = vadd.f32 %v637_v50, %v125_v49  ;;  %v657_v46 = vld [vmem:[#allocation5 + $0x328] sm:$0xff] }
  0x4b   :  { %1639 = vst [vmem:[#allocation7 + $0x1d8] sm:$0xff] %v1127_v55  ;;  %v127_v55 = vld [vmem:[#allocation2 + $0x298] sm:$0xff]  ;;  %v1150_v60 = vadd.f32 %v638_v53, %v126_v52  ;;  %v658_v49 = vld [vmem:[#allocation5 + $0x330] sm:$0xff] }
  0x4c   :  { %1640 = vst [vmem:[#allocation7 + $0x1e0] sm:$0xff] %v1128_v58  ;;  %v128_v58 = vld [vmem:[#allocation2 + $0x2a0] sm:$0xff]  ;;  %v1151_v63 = vadd.f32 %v639_v56, %v127_v55  ;;  %v659_v52 = vld [vmem:[#allocation5 + $0x338] sm:$0xff] }
  0x4d   :  { %1641 = vst [vmem:[#allocation7 + $0x1e8] sm:$0xff] %v1129_v61  ;;  %v129_v61 = vld [vmem:[#allocation2 + $0x2a8] sm:$0xff]  ;;  %v1152_v2 = vadd.f32 %v640_v59, %v128_v58  ;;  %v660_v55 = vld [vmem:[#allocation5 + $0x340] sm:$0xff] }
  0x4e   :  { %1642 = vst [vmem:[#allocation7 + $0x1f0] sm:$0xff] %v1130_v0  ;;  %v130_v0 = vld [vmem:[#allocation2 + $0x2b0] sm:$0xff]  ;;  %v1153_v5 = vadd.f32 %v641_v62, %v129_v61  ;;  %v661_v58 = vld [vmem:[#allocation5 + $0x348] sm:$0xff] }
  0x4f   :  { %1643 = vst [vmem:[#allocation7 + $0x1f8] sm:$0xff] %v1131_v3  ;;  %v131_v3 = vld [vmem:[#allocation2 + $0x2b8] sm:$0xff]  ;;  %v1154_v8 = vadd.f32 %v642_v1, %v130_v0  ;;  %v662_v61 = vld [vmem:[#allocation5 + $0x350] sm:$0xff] }
  0x50   :  { %1644 = vst [vmem:[#allocation7 + $0x200] sm:$0xff] %v1132_v6  ;;  %v132_v6 = vld [vmem:[#allocation2 + $0x2c0] sm:$0xff]  ;;  %v1155_v11 = vadd.f32 %v643_v4, %v131_v3  ;;  %v663_v0 = vld [vmem:[#allocation5 + $0x358] sm:$0xff] }
  0x51   :  { %1645 = vst [vmem:[#allocation7 + $0x208] sm:$0xff] %v1133_v9  ;;  %v133_v9 = vld [vmem:[#allocation2 + $0x2c8] sm:$0xff]  ;;  %v1156_v14 = vadd.f32 %v644_v7, %v132_v6  ;;  %v664_v3 = vld [vmem:[#allocation5 + $0x360] sm:$0xff] }
  0x52   :  { %1646 = vst [vmem:[#allocation7 + $0x210] sm:$0xff] %v1134_v12  ;;  %v134_v12 = vld [vmem:[#allocation2 + $0x2d0] sm:$0xff]  ;;  %v1157_v17 = vadd.f32 %v645_v10, %v133_v9  ;;  %v665_v6 = vld [vmem:[#allocation5 + $0x368] sm:$0xff] }
  0x53   :  { %1647 = vst [vmem:[#allocation7 + $0x218] sm:$0xff] %v1135_v15  ;;  %v135_v15 = vld [vmem:[#allocation2 + $0x2d8] sm:$0xff]  ;;  %v1158_v20 = vadd.f32 %v646_v13, %v134_v12  ;;  %v666_v9 = vld [vmem:[#allocation5 + $0x370] sm:$0xff] }
  0x54   :  { %1648 = vst [vmem:[#allocation7 + $0x220] sm:$0xff] %v1136_v18  ;;  %v136_v18 = vld [vmem:[#allocation2 + $0x2e0] sm:$0xff]  ;;  %v1159_v23 = vadd.f32 %v647_v16, %v135_v15  ;;  %v667_v12 = vld [vmem:[#allocation5 + $0x378] sm:$0xff] }
  0x55   :  { %1649 = vst [vmem:[#allocation7 + $0x228] sm:$0xff] %v1137_v21  ;;  %v137_v21 = vld [vmem:[#allocation2 + $0x2e8] sm:$0xff]  ;;  %v1160_v26 = vadd.f32 %v648_v19, %v136_v18  ;;  %v668_v15 = vld [vmem:[#allocation5 + $0x380] sm:$0xff] }
  0x56   :  { %1650 = vst [vmem:[#allocation7 + $0x230] sm:$0xff] %v1138_v24  ;;  %v138_v24 = vld [vmem:[#allocation2 + $0x2f0] sm:$0xff]  ;;  %v1161_v29 = vadd.f32 %v649_v22, %v137_v21  ;;  %v669_v18 = vld [vmem:[#allocation5 + $0x388] sm:$0xff] }
  0x57   :  { %1651 = vst [vmem:[#allocation7 + $0x238] sm:$0xff] %v1139_v27  ;;  %v139_v27 = vld [vmem:[#allocation2 + $0x2f8] sm:$0xff]  ;;  %v1162_v32 = vadd.f32 %v650_v25, %v138_v24  ;;  %v670_v21 = vld [vmem:[#allocation5 + $0x390] sm:$0xff] }
  0x58   :  { %1652 = vst [vmem:[#allocation7 + $0x240] sm:$0xff] %v1140_v30  ;;  %v140_v30 = vld [vmem:[#allocation2 + $0x300] sm:$0xff]  ;;  %v1163_v35 = vadd.f32 %v651_v28, %v139_v27  ;;  %v671_v24 = vld [vmem:[#allocation5 + $0x398] sm:$0xff] }
  0x59   :  { %1653 = vst [vmem:[#allocation7 + $0x248] sm:$0xff] %v1141_v33  ;;  %v141_v33 = vld [vmem:[#allocation2 + $0x308] sm:$0xff]  ;;  %v1164_v38 = vadd.f32 %v652_v31, %v140_v30  ;;  %v672_v27 = vld [vmem:[#allocation5 + $0x3a0] sm:$0xff] }
  0x5a   :  { %1654 = vst [vmem:[#allocation7 + $0x250] sm:$0xff] %v1142_v36  ;;  %v142_v36 = vld [vmem:[#allocation2 + $0x310] sm:$0xff]  ;;  %v1165_v41 = vadd.f32 %v653_v34, %v141_v33  ;;  %v673_v30 = vld [vmem:[#allocation5 + $0x3a8] sm:$0xff] }
  0x5b   :  { %1655 = vst [vmem:[#allocation7 + $0x258] sm:$0xff] %v1143_v39  ;;  %v143_v39 = vld [vmem:[#allocation2 + $0x318] sm:$0xff]  ;;  %v1166_v44 = vadd.f32 %v654_v37, %v142_v36  ;;  %v674_v33 = vld [vmem:[#allocation5 + $0x3b0] sm:$0xff] }
  0x5c   :  { %1656 = vst [vmem:[#allocation7 + $0x260] sm:$0xff] %v1144_v42  ;;  %v144_v42 = vld [vmem:[#allocation2 + $0x320] sm:$0xff]  ;;  %v1167_v47 = vadd.f32 %v655_v40, %v143_v39  ;;  %v675_v36 = vld [vmem:[#allocation5 + $0x3b8] sm:$0xff] }
  0x5d   :  { %1657 = vst [vmem:[#allocation7 + $0x268] sm:$0xff] %v1145_v45  ;;  %v145_v45 = vld [vmem:[#allocation2 + $0x328] sm:$0xff]  ;;  %v1168_v50 = vadd.f32 %v656_v43, %v144_v42  ;;  %v676_v39 = vld [vmem:[#allocation5 + $0x3c0] sm:$0xff] }
  0x5e   :  { %1658 = vst [vmem:[#allocation7 + $0x270] sm:$0xff] %v1146_v48  ;;  %v146_v48 = vld [vmem:[#allocation2 + $0x330] sm:$0xff]  ;;  %v1169_v53 = vadd.f32 %v657_v46, %v145_v45  ;;  %v677_v42 = vld [vmem:[#allocation5 + $0x3c8] sm:$0xff] }
  0x5f   :  { %1659 = vst [vmem:[#allocation7 + $0x278] sm:$0xff] %v1147_v51  ;;  %v147_v51 = vld [vmem:[#allocation2 + $0x338] sm:$0xff]  ;;  %v1170_v56 = vadd.f32 %v658_v49, %v146_v48  ;;  %v678_v45 = vld [vmem:[#allocation5 + $0x3d0] sm:$0xff] }
  0x60   :  { %1660 = vst [vmem:[#allocation7 + $0x280] sm:$0xff] %v1148_v54  ;;  %v148_v54 = vld [vmem:[#allocation2 + $0x340] sm:$0xff]  ;;  %v1171_v59 = vadd.f32 %v659_v52, %v147_v51  ;;  %v679_v48 = vld [vmem:[#allocation5 + $0x3d8] sm:$0xff] }
  0x61   :  { %1661 = vst [vmem:[#allocation7 + $0x288] sm:$0xff] %v1149_v57  ;;  %v149_v57 = vld [vmem:[#allocation2 + $0x348] sm:$0xff]  ;;  %v1172_v62 = vadd.f32 %v660_v55, %v148_v54  ;;  %v680_v51 = vld [vmem:[#allocation5 + $0x3e0] sm:$0xff] }
  0x62   :  { %1662 = vst [vmem:[#allocation7 + $0x290] sm:$0xff] %v1150_v60  ;;  %v150_v60 = vld [vmem:[#allocation2 + $0x350] sm:$0xff]  ;;  %v1173_v1 = vadd.f32 %v661_v58, %v149_v57  ;;  %v681_v54 = vld [vmem:[#allocation5 + $0x3e8] sm:$0xff] }
  0x63   :  { %1663 = vst [vmem:[#allocation7 + $0x298] sm:$0xff] %v1151_v63  ;;  %v151_v63 = vld [vmem:[#allocation2 + $0x358] sm:$0xff]  ;;  %v1174_v4 = vadd.f32 %v662_v61, %v150_v60  ;;  %v682_v57 = vld [vmem:[#allocation5 + $0x3f0] sm:$0xff] }
  0x64   :  { %1664 = vst [vmem:[#allocation7 + $0x2a0] sm:$0xff] %v1152_v2  ;;  %v152_v2 = vld [vmem:[#allocation2 + $0x360] sm:$0xff]  ;;  %v1175_v7 = vadd.f32 %v663_v0, %v151_v63  ;;  %v683_v60 = vld [vmem:[#allocation5 + $0x3f8] sm:$0xff] }
  0x65   :  { %1665 = vst [vmem:[#allocation7 + $0x2a8] sm:$0xff] %v1153_v5  ;;  %v153_v5 = vld [vmem:[#allocation2 + $0x368] sm:$0xff]  ;;  %v1176_v10 = vadd.f32 %v664_v3, %v152_v2  ;;  %v684_v63 = vld [vmem:[#allocation5 + $0x400] sm:$0xff] }
  0x66   :  { %1666 = vst [vmem:[#allocation7 + $0x2b0] sm:$0xff] %v1154_v8  ;;  %v154_v8 = vld [vmem:[#allocation2 + $0x370] sm:$0xff]  ;;  %v1177_v13 = vadd.f32 %v665_v6, %v153_v5  ;;  %v685_v2 = vld [vmem:[#allocation5 + $0x408] sm:$0xff] }
  0x67   :  { %1667 = vst [vmem:[#allocation7 + $0x2b8] sm:$0xff] %v1155_v11  ;;  %v155_v11 = vld [vmem:[#allocation2 + $0x378] sm:$0xff]  ;;  %v1178_v16 = vadd.f32 %v666_v9, %v154_v8  ;;  %v686_v5 = vld [vmem:[#allocation5 + $0x410] sm:$0xff] }
  0x68   :  { %1668 = vst [vmem:[#allocation7 + $0x2c0] sm:$0xff] %v1156_v14  ;;  %v156_v14 = vld [vmem:[#allocation2 + $0x380] sm:$0xff]  ;;  %v1179_v19 = vadd.f32 %v667_v12, %v155_v11  ;;  %v687_v8 = vld [vmem:[#allocation5 + $0x418] sm:$0xff] }
  0x69   :  { %1669 = vst [vmem:[#allocation7 + $0x2c8] sm:$0xff] %v1157_v17  ;;  %v157_v17 = vld [vmem:[#allocation2 + $0x388] sm:$0xff]  ;;  %v1180_v22 = vadd.f32 %v668_v15, %v156_v14  ;;  %v688_v11 = vld [vmem:[#allocation5 + $0x420] sm:$0xff] }
  0x6a   :  { %1670 = vst [vmem:[#allocation7 + $0x2d0] sm:$0xff] %v1158_v20  ;;  %v158_v20 = vld [vmem:[#allocation2 + $0x390] sm:$0xff]  ;;  %v1181_v25 = vadd.f32 %v669_v18, %v157_v17  ;;  %v689_v14 = vld [vmem:[#allocation5 + $0x428] sm:$0xff] }
  0x6b   :  { %1671 = vst [vmem:[#allocation7 + $0x2d8] sm:$0xff] %v1159_v23  ;;  %v159_v23 = vld [vmem:[#allocation2 + $0x398] sm:$0xff]  ;;  %v1182_v28 = vadd.f32 %v670_v21, %v158_v20  ;;  %v690_v17 = vld [vmem:[#allocation5 + $0x430] sm:$0xff] }
  0x6c   :  { %1672 = vst [vmem:[#allocation7 + $0x2e0] sm:$0xff] %v1160_v26  ;;  %v160_v26 = vld [vmem:[#allocation2 + $0x3a0] sm:$0xff]  ;;  %v1183_v31 = vadd.f32 %v671_v24, %v159_v23  ;;  %v691_v20 = vld [vmem:[#allocation5 + $0x438] sm:$0xff] }
  0x6d   :  { %1673 = vst [vmem:[#allocation7 + $0x2e8] sm:$0xff] %v1161_v29  ;;  %v161_v29 = vld [vmem:[#allocation2 + $0x3a8] sm:$0xff]  ;;  %v1184_v34 = vadd.f32 %v672_v27, %v160_v26  ;;  %v692_v23 = vld [vmem:[#allocation5 + $0x440] sm:$0xff] }
  0x6e   :  { %1674 = vst [vmem:[#allocation7 + $0x2f0] sm:$0xff] %v1162_v32  ;;  %v162_v32 = vld [vmem:[#allocation2 + $0x3b0] sm:$0xff]  ;;  %v1185_v37 = vadd.f32 %v673_v30, %v161_v29  ;;  %v693_v26 = vld [vmem:[#allocation5 + $0x448] sm:$0xff] }
  0x6f   :  { %1675 = vst [vmem:[#allocation7 + $0x2f8] sm:$0xff] %v1163_v35  ;;  %v163_v35 = vld [vmem:[#allocation2 + $0x3b8] sm:$0xff]  ;;  %v1186_v40 = vadd.f32 %v674_v33, %v162_v32  ;;  %v694_v29 = vld [vmem:[#allocation5 + $0x450] sm:$0xff] }
  0x70   :  { %1676 = vst [vmem:[#allocation7 + $0x300] sm:$0xff] %v1164_v38  ;;  %v164_v38 = vld [vmem:[#allocation2 + $0x3c0] sm:$0xff]  ;;  %v1187_v43 = vadd.f32 %v675_v36, %v163_v35  ;;  %v695_v32 = vld [vmem:[#allocation5 + $0x458] sm:$0xff] }
  0x71   :  { %1677 = vst [vmem:[#allocation7 + $0x308] sm:$0xff] %v1165_v41  ;;  %v165_v41 = vld [vmem:[#allocation2 + $0x3c8] sm:$0xff]  ;;  %v1188_v46 = vadd.f32 %v676_v39, %v164_v38  ;;  %v696_v35 = vld [vmem:[#allocation5 + $0x460] sm:$0xff] }
  0x72   :  { %1678 = vst [vmem:[#allocation7 + $0x310] sm:$0xff] %v1166_v44  ;;  %v166_v44 = vld [vmem:[#allocation2 + $0x3d0] sm:$0xff]  ;;  %v1189_v49 = vadd.f32 %v677_v42, %v165_v41  ;;  %v697_v38 = vld [vmem:[#allocation5 + $0x468] sm:$0xff] }
  0x73   :  { %1679 = vst [vmem:[#allocation7 + $0x318] sm:$0xff] %v1167_v47  ;;  %v167_v47 = vld [vmem:[#allocation2 + $0x3d8] sm:$0xff]  ;;  %v1190_v52 = vadd.f32 %v678_v45, %v166_v44  ;;  %v698_v41 = vld [vmem:[#allocation5 + $0x470] sm:$0xff] }
  0x74   :  { %1680 = vst [vmem:[#allocation7 + $0x320] sm:$0xff] %v1168_v50  ;;  %v168_v50 = vld [vmem:[#allocation2 + $0x3e0] sm:$0xff]  ;;  %v1191_v55 = vadd.f32 %v679_v48, %v167_v47  ;;  %v699_v44 = vld [vmem:[#allocation5 + $0x478] sm:$0xff] }
  0x75   :  { %1681 = vst [vmem:[#allocation7 + $0x328] sm:$0xff] %v1169_v53  ;;  %v169_v53 = vld [vmem:[#allocation2 + $0x3e8] sm:$0xff]  ;;  %v1192_v58 = vadd.f32 %v680_v51, %v168_v50  ;;  %v700_v47 = vld [vmem:[#allocation5 + $0x480] sm:$0xff] }
  0x76   :  { %1682 = vst [vmem:[#allocation7 + $0x330] sm:$0xff] %v1170_v56  ;;  %v170_v56 = vld [vmem:[#allocation2 + $0x3f0] sm:$0xff]  ;;  %v1193_v61 = vadd.f32 %v681_v54, %v169_v53  ;;  %v701_v50 = vld [vmem:[#allocation5 + $0x488] sm:$0xff] }
  0x77   :  { %1683 = vst [vmem:[#allocation7 + $0x338] sm:$0xff] %v1171_v59  ;;  %v171_v59 = vld [vmem:[#allocation2 + $0x3f8] sm:$0xff]  ;;  %v1194_v0 = vadd.f32 %v682_v57, %v170_v56  ;;  %v702_v53 = vld [vmem:[#allocation5 + $0x490] sm:$0xff] }
  0x78   :  { %1684 = vst [vmem:[#allocation7 + $0x340] sm:$0xff] %v1172_v62  ;;  %v172_v62 = vld [vmem:[#allocation2 + $0x400] sm:$0xff]  ;;  %v1195_v3 = vadd.f32 %v683_v60, %v171_v59  ;;  %v703_v56 = vld [vmem:[#allocation5 + $0x498] sm:$0xff] }
  0x79   :  { %1685 = vst [vmem:[#allocation7 + $0x348] sm:$0xff] %v1173_v1  ;;  %v173_v1 = vld [vmem:[#allocation2 + $0x408] sm:$0xff]  ;;  %v1196_v6 = vadd.f32 %v684_v63, %v172_v62  ;;  %v704_v59 = vld [vmem:[#allocation5 + $0x4a0] sm:$0xff] }
  0x7a   :  { %1686 = vst [vmem:[#allocation7 + $0x350] sm:$0xff] %v1174_v4  ;;  %v174_v4 = vld [vmem:[#allocation2 + $0x410] sm:$0xff]  ;;  %v1197_v9 = vadd.f32 %v685_v2, %v173_v1  ;;  %v705_v62 = vld [vmem:[#allocation5 + $0x4a8] sm:$0xff] }
  0x7b   :  { %1687 = vst [vmem:[#allocation7 + $0x358] sm:$0xff] %v1175_v7  ;;  %v175_v7 = vld [vmem:[#allocation2 + $0x418] sm:$0xff]  ;;  %v1198_v12 = vadd.f32 %v686_v5, %v174_v4  ;;  %v706_v1 = vld [vmem:[#allocation5 + $0x4b0] sm:$0xff] }
  0x7c   :  { %1688 = vst [vmem:[#allocation7 + $0x360] sm:$0xff] %v1176_v10  ;;  %v176_v10 = vld [vmem:[#allocation2 + $0x420] sm:$0xff]  ;;  %v1199_v15 = vadd.f32 %v687_v8, %v175_v7  ;;  %v707_v4 = vld [vmem:[#allocation5 + $0x4b8] sm:$0xff] }
  0x7d   :  { %1689 = vst [vmem:[#allocation7 + $0x368] sm:$0xff] %v1177_v13  ;;  %v177_v13 = vld [vmem:[#allocation2 + $0x428] sm:$0xff]  ;;  %v1200_v18 = vadd.f32 %v688_v11, %v176_v10  ;;  %v708_v7 = vld [vmem:[#allocation5 + $0x4c0] sm:$0xff] }
  0x7e   :  { %1690 = vst [vmem:[#allocation7 + $0x370] sm:$0xff] %v1178_v16  ;;  %v178_v16 = vld [vmem:[#allocation2 + $0x430] sm:$0xff]  ;;  %v1201_v21 = vadd.f32 %v689_v14, %v177_v13  ;;  %v709_v10 = vld [vmem:[#allocation5 + $0x4c8] sm:$0xff] }
  0x7f   :  { %1691 = vst [vmem:[#allocation7 + $0x378] sm:$0xff] %v1179_v19  ;;  %v179_v19 = vld [vmem:[#allocation2 + $0x438] sm:$0xff]  ;;  %v1202_v24 = vadd.f32 %v690_v17, %v178_v16  ;;  %v710_v13 = vld [vmem:[#allocation5 + $0x4d0] sm:$0xff] }
  0x80   :  { %1692 = vst [vmem:[#allocation7 + $0x380] sm:$0xff] %v1180_v22  ;;  %v180_v22 = vld [vmem:[#allocation2 + $0x440] sm:$0xff]  ;;  %v1203_v27 = vadd.f32 %v691_v20, %v179_v19  ;;  %v711_v16 = vld [vmem:[#allocation5 + $0x4d8] sm:$0xff] }
  0x81   :  { %1693 = vst [vmem:[#allocation7 + $0x388] sm:$0xff] %v1181_v25  ;;  %v181_v25 = vld [vmem:[#allocation2 + $0x448] sm:$0xff]  ;;  %v1204_v30 = vadd.f32 %v692_v23, %v180_v22  ;;  %v712_v19 = vld [vmem:[#allocation5 + $0x4e0] sm:$0xff] }
  0x82   :  { %1694 = vst [vmem:[#allocation7 + $0x390] sm:$0xff] %v1182_v28  ;;  %v182_v28 = vld [vmem:[#allocation2 + $0x450] sm:$0xff]  ;;  %v1205_v33 = vadd.f32 %v693_v26, %v181_v25  ;;  %v713_v22 = vld [vmem:[#allocation5 + $0x4e8] sm:$0xff] }
  0x83   :  { %1695 = vst [vmem:[#allocation7 + $0x398] sm:$0xff] %v1183_v31  ;;  %v183_v31 = vld [vmem:[#allocation2 + $0x458] sm:$0xff]  ;;  %v1206_v36 = vadd.f32 %v694_v29, %v182_v28  ;;  %v714_v25 = vld [vmem:[#allocation5 + $0x4f0] sm:$0xff] }
  0x84   :  { %1696 = vst [vmem:[#allocation7 + $0x3a0] sm:$0xff] %v1184_v34  ;;  %v184_v34 = vld [vmem:[#allocation2 + $0x460] sm:$0xff]  ;;  %v1207_v39 = vadd.f32 %v695_v32, %v183_v31  ;;  %v715_v28 = vld [vmem:[#allocation5 + $0x4f8] sm:$0xff] }
  0x85   :  { %1697 = vst [vmem:[#allocation7 + $0x3a8] sm:$0xff] %v1185_v37  ;;  %v185_v37 = vld [vmem:[#allocation2 + $0x468] sm:$0xff]  ;;  %v1208_v42 = vadd.f32 %v696_v35, %v184_v34  ;;  %v716_v31 = vld [vmem:[#allocation5 + $0x500] sm:$0xff] }
  0x86   :  { %1698 = vst [vmem:[#allocation7 + $0x3b0] sm:$0xff] %v1186_v40  ;;  %v186_v40 = vld [vmem:[#allocation2 + $0x470] sm:$0xff]  ;;  %v1209_v45 = vadd.f32 %v697_v38, %v185_v37  ;;  %v717_v34 = vld [vmem:[#allocation5 + $0x508] sm:$0xff] }
  0x87   :  { %1699 = vst [vmem:[#allocation7 + $0x3b8] sm:$0xff] %v1187_v43  ;;  %v187_v43 = vld [vmem:[#allocation2 + $0x478] sm:$0xff]  ;;  %v1210_v48 = vadd.f32 %v698_v41, %v186_v40  ;;  %v718_v37 = vld [vmem:[#allocation5 + $0x510] sm:$0xff] }
  0x88   :  { %1700 = vst [vmem:[#allocation7 + $0x3c0] sm:$0xff] %v1188_v46  ;;  %v188_v46 = vld [vmem:[#allocation2 + $0x480] sm:$0xff]  ;;  %v1211_v51 = vadd.f32 %v699_v44, %v187_v43  ;;  %v719_v40 = vld [vmem:[#allocation5 + $0x518] sm:$0xff] }
  0x89   :  { %1701 = vst [vmem:[#allocation7 + $0x3c8] sm:$0xff] %v1189_v49  ;;  %v189_v49 = vld [vmem:[#allocation2 + $0x488] sm:$0xff]  ;;  %v1212_v54 = vadd.f32 %v700_v47, %v188_v46  ;;  %v720_v43 = vld [vmem:[#allocation5 + $0x520] sm:$0xff] }
  0x8a   :  { %1702 = vst [vmem:[#allocation7 + $0x3d0] sm:$0xff] %v1190_v52  ;;  %v190_v52 = vld [vmem:[#allocation2 + $0x490] sm:$0xff]  ;;  %v1213_v57 = vadd.f32 %v701_v50, %v189_v49  ;;  %v721_v46 = vld [vmem:[#allocation5 + $0x528] sm:$0xff] }
  0x8b   :  { %1703 = vst [vmem:[#allocation7 + $0x3d8] sm:$0xff] %v1191_v55  ;;  %v191_v55 = vld [vmem:[#allocation2 + $0x498] sm:$0xff]  ;;  %v1214_v60 = vadd.f32 %v702_v53, %v190_v52  ;;  %v722_v49 = vld [vmem:[#allocation5 + $0x530] sm:$0xff] }
  0x8c   :  { %1704 = vst [vmem:[#allocation7 + $0x3e0] sm:$0xff] %v1192_v58  ;;  %v192_v58 = vld [vmem:[#allocation2 + $0x4a0] sm:$0xff]  ;;  %v1215_v63 = vadd.f32 %v703_v56, %v191_v55  ;;  %v723_v52 = vld [vmem:[#allocation5 + $0x538] sm:$0xff] }
  0x8d   :  { %1705 = vst [vmem:[#allocation7 + $0x3e8] sm:$0xff] %v1193_v61  ;;  %v193_v61 = vld [vmem:[#allocation2 + $0x4a8] sm:$0xff]  ;;  %v1216_v2 = vadd.f32 %v704_v59, %v192_v58  ;;  %v724_v55 = vld [vmem:[#allocation5 + $0x540] sm:$0xff] }
  0x8e   :  { %1706 = vst [vmem:[#allocation7 + $0x3f0] sm:$0xff] %v1194_v0  ;;  %v194_v0 = vld [vmem:[#allocation2 + $0x4b0] sm:$0xff]  ;;  %v1217_v5 = vadd.f32 %v705_v62, %v193_v61  ;;  %v725_v58 = vld [vmem:[#allocation5 + $0x548] sm:$0xff] }
  0x8f   :  { %1707 = vst [vmem:[#allocation7 + $0x3f8] sm:$0xff] %v1195_v3  ;;  %v195_v3 = vld [vmem:[#allocation2 + $0x4b8] sm:$0xff]  ;;  %v1218_v8 = vadd.f32 %v706_v1, %v194_v0  ;;  %v726_v61 = vld [vmem:[#allocation5 + $0x550] sm:$0xff] }
  0x90   :  { %1708 = vst [vmem:[#allocation7 + $0x400] sm:$0xff] %v1196_v6  ;;  %v196_v6 = vld [vmem:[#allocation2 + $0x4c0] sm:$0xff]  ;;  %v1219_v11 = vadd.f32 %v707_v4, %v195_v3  ;;  %v727_v0 = vld [vmem:[#allocation5 + $0x558] sm:$0xff] }
  0x91   :  { %1709 = vst [vmem:[#allocation7 + $0x408] sm:$0xff] %v1197_v9  ;;  %v197_v9 = vld [vmem:[#allocation2 + $0x4c8] sm:$0xff]  ;;  %v1220_v14 = vadd.f32 %v708_v7, %v196_v6  ;;  %v728_v3 = vld [vmem:[#allocation5 + $0x560] sm:$0xff] }
  0x92   :  { %1710 = vst [vmem:[#allocation7 + $0x410] sm:$0xff] %v1198_v12  ;;  %v198_v12 = vld [vmem:[#allocation2 + $0x4d0] sm:$0xff]  ;;  %v1221_v17 = vadd.f32 %v709_v10, %v197_v9  ;;  %v729_v6 = vld [vmem:[#allocation5 + $0x568] sm:$0xff] }
  0x93   :  { %1711 = vst [vmem:[#allocation7 + $0x418] sm:$0xff] %v1199_v15  ;;  %v199_v15 = vld [vmem:[#allocation2 + $0x4d8] sm:$0xff]  ;;  %v1222_v20 = vadd.f32 %v710_v13, %v198_v12  ;;  %v730_v9 = vld [vmem:[#allocation5 + $0x570] sm:$0xff] }
  0x94   :  { %1712 = vst [vmem:[#allocation7 + $0x420] sm:$0xff] %v1200_v18  ;;  %v200_v18 = vld [vmem:[#allocation2 + $0x4e0] sm:$0xff]  ;;  %v1223_v23 = vadd.f32 %v711_v16, %v199_v15  ;;  %v731_v12 = vld [vmem:[#allocation5 + $0x578] sm:$0xff] }
  0x95   :  { %1713 = vst [vmem:[#allocation7 + $0x428] sm:$0xff] %v1201_v21  ;;  %v201_v21 = vld [vmem:[#allocation2 + $0x4e8] sm:$0xff]  ;;  %v1224_v26 = vadd.f32 %v712_v19, %v200_v18  ;;  %v732_v15 = vld [vmem:[#allocation5 + $0x580] sm:$0xff] }
  0x96   :  { %1714 = vst [vmem:[#allocation7 + $0x430] sm:$0xff] %v1202_v24  ;;  %v202_v24 = vld [vmem:[#allocation2 + $0x4f0] sm:$0xff]  ;;  %v1225_v29 = vadd.f32 %v713_v22, %v201_v21  ;;  %v733_v18 = vld [vmem:[#allocation5 + $0x588] sm:$0xff] }
  0x97   :  { %1715 = vst [vmem:[#allocation7 + $0x438] sm:$0xff] %v1203_v27  ;;  %v203_v27 = vld [vmem:[#allocation2 + $0x4f8] sm:$0xff]  ;;  %v1226_v32 = vadd.f32 %v714_v25, %v202_v24  ;;  %v734_v21 = vld [vmem:[#allocation5 + $0x590] sm:$0xff] }
  0x98   :  { %1716 = vst [vmem:[#allocation7 + $0x440] sm:$0xff] %v1204_v30  ;;  %v204_v30 = vld [vmem:[#allocation2 + $0x500] sm:$0xff]  ;;  %v1227_v35 = vadd.f32 %v715_v28, %v203_v27  ;;  %v735_v24 = vld [vmem:[#allocation5 + $0x598] sm:$0xff] }
  0x99   :  { %1717 = vst [vmem:[#allocation7 + $0x448] sm:$0xff] %v1205_v33  ;;  %v205_v33 = vld [vmem:[#allocation2 + $0x508] sm:$0xff]  ;;  %v1228_v38 = vadd.f32 %v716_v31, %v204_v30  ;;  %v736_v27 = vld [vmem:[#allocation5 + $0x5a0] sm:$0xff] }
  0x9a   :  { %1718 = vst [vmem:[#allocation7 + $0x450] sm:$0xff] %v1206_v36  ;;  %v206_v36 = vld [vmem:[#allocation2 + $0x510] sm:$0xff]  ;;  %v1229_v41 = vadd.f32 %v717_v34, %v205_v33  ;;  %v737_v30 = vld [vmem:[#allocation5 + $0x5a8] sm:$0xff] }
  0x9b   :  { %1719 = vst [vmem:[#allocation7 + $0x458] sm:$0xff] %v1207_v39  ;;  %v207_v39 = vld [vmem:[#allocation2 + $0x518] sm:$0xff]  ;;  %v1230_v44 = vadd.f32 %v718_v37, %v206_v36  ;;  %v738_v33 = vld [vmem:[#allocation5 + $0x5b0] sm:$0xff] }
  0x9c   :  { %1720 = vst [vmem:[#allocation7 + $0x460] sm:$0xff] %v1208_v42  ;;  %v208_v42 = vld [vmem:[#allocation2 + $0x520] sm:$0xff]  ;;  %v1231_v47 = vadd.f32 %v719_v40, %v207_v39  ;;  %v739_v36 = vld [vmem:[#allocation5 + $0x5b8] sm:$0xff] }
  0x9d   :  { %1721 = vst [vmem:[#allocation7 + $0x468] sm:$0xff] %v1209_v45  ;;  %v209_v45 = vld [vmem:[#allocation2 + $0x528] sm:$0xff]  ;;  %v1232_v50 = vadd.f32 %v720_v43, %v208_v42  ;;  %v740_v39 = vld [vmem:[#allocation5 + $0x5c0] sm:$0xff] }
  0x9e   :  { %1722 = vst [vmem:[#allocation7 + $0x470] sm:$0xff] %v1210_v48  ;;  %v210_v48 = vld [vmem:[#allocation2 + $0x530] sm:$0xff]  ;;  %v1233_v53 = vadd.f32 %v721_v46, %v209_v45  ;;  %v741_v42 = vld [vmem:[#allocation5 + $0x5c8] sm:$0xff] }
  0x9f   :  { %1723 = vst [vmem:[#allocation7 + $0x478] sm:$0xff] %v1211_v51  ;;  %v211_v51 = vld [vmem:[#allocation2 + $0x538] sm:$0xff]  ;;  %v1234_v56 = vadd.f32 %v722_v49, %v210_v48  ;;  %v742_v45 = vld [vmem:[#allocation5 + $0x5d0] sm:$0xff] }
  0xa0   :  { %1724 = vst [vmem:[#allocation7 + $0x480] sm:$0xff] %v1212_v54  ;;  %v212_v54 = vld [vmem:[#allocation2 + $0x540] sm:$0xff]  ;;  %v1235_v59 = vadd.f32 %v723_v52, %v211_v51  ;;  %v743_v48 = vld [vmem:[#allocation5 + $0x5d8] sm:$0xff] }
  0xa1   :  { %1725 = vst [vmem:[#allocation7 + $0x488] sm:$0xff] %v1213_v57  ;;  %v213_v57 = vld [vmem:[#allocation2 + $0x548] sm:$0xff]  ;;  %v1236_v62 = vadd.f32 %v724_v55, %v212_v54  ;;  %v744_v51 = vld [vmem:[#allocation5 + $0x5e0] sm:$0xff] }
  0xa2   :  { %1726 = vst [vmem:[#allocation7 + $0x490] sm:$0xff] %v1214_v60  ;;  %v214_v60 = vld [vmem:[#allocation2 + $0x550] sm:$0xff]  ;;  %v1237_v1 = vadd.f32 %v725_v58, %v213_v57  ;;  %v745_v54 = vld [vmem:[#allocation5 + $0x5e8] sm:$0xff] }
  0xa3   :  { %1727 = vst [vmem:[#allocation7 + $0x498] sm:$0xff] %v1215_v63  ;;  %v215_v63 = vld [vmem:[#allocation2 + $0x558] sm:$0xff]  ;;  %v1238_v4 = vadd.f32 %v726_v61, %v214_v60  ;;  %v746_v57 = vld [vmem:[#allocation5 + $0x5f0] sm:$0xff] }
  0xa4   :  { %1728 = vst [vmem:[#allocation7 + $0x4a0] sm:$0xff] %v1216_v2  ;;  %v216_v2 = vld [vmem:[#allocation2 + $0x560] sm:$0xff]  ;;  %v1239_v7 = vadd.f32 %v727_v0, %v215_v63  ;;  %v747_v60 = vld [vmem:[#allocation5 + $0x5f8] sm:$0xff] }
  0xa5   :  { %1729 = vst [vmem:[#allocation7 + $0x4a8] sm:$0xff] %v1217_v5  ;;  %v217_v5 = vld [vmem:[#allocation2 + $0x568] sm:$0xff]  ;;  %v1240_v10 = vadd.f32 %v728_v3, %v216_v2  ;;  %v748_v63 = vld [vmem:[#allocation5 + $0x600] sm:$0xff] }
  0xa6   :  { %1730 = vst [vmem:[#allocation7 + $0x4b0] sm:$0xff] %v1218_v8  ;;  %v218_v8 = vld [vmem:[#allocation2 + $0x570] sm:$0xff]  ;;  %v1241_v13 = vadd.f32 %v729_v6, %v217_v5  ;;  %v749_v2 = vld [vmem:[#allocation5 + $0x608] sm:$0xff] }
  0xa7   :  { %1731 = vst [vmem:[#allocation7 + $0x4b8] sm:$0xff] %v1219_v11  ;;  %v219_v11 = vld [vmem:[#allocation2 + $0x578] sm:$0xff]  ;;  %v1242_v16 = vadd.f32 %v730_v9, %v218_v8  ;;  %v750_v5 = vld [vmem:[#allocation5 + $0x610] sm:$0xff] }
  0xa8   :  { %1732 = vst [vmem:[#allocation7 + $0x4c0] sm:$0xff] %v1220_v14  ;;  %v220_v14 = vld [vmem:[#allocation2 + $0x580] sm:$0xff]  ;;  %v1243_v19 = vadd.f32 %v731_v12, %v219_v11  ;;  %v751_v8 = vld [vmem:[#allocation5 + $0x618] sm:$0xff] }
  0xa9   :  { %1733 = vst [vmem:[#allocation7 + $0x4c8] sm:$0xff] %v1221_v17  ;;  %v221_v17 = vld [vmem:[#allocation2 + $0x588] sm:$0xff]  ;;  %v1244_v22 = vadd.f32 %v732_v15, %v220_v14  ;;  %v752_v11 = vld [vmem:[#allocation5 + $0x620] sm:$0xff] }
  0xaa   :  { %1734 = vst [vmem:[#allocation7 + $0x4d0] sm:$0xff] %v1222_v20  ;;  %v222_v20 = vld [vmem:[#allocation2 + $0x590] sm:$0xff]  ;;  %v1245_v25 = vadd.f32 %v733_v18, %v221_v17  ;;  %v753_v14 = vld [vmem:[#allocation5 + $0x628] sm:$0xff] }
  0xab   :  { %1735 = vst [vmem:[#allocation7 + $0x4d8] sm:$0xff] %v1223_v23  ;;  %v223_v23 = vld [vmem:[#allocation2 + $0x598] sm:$0xff]  ;;  %v1246_v28 = vadd.f32 %v734_v21, %v222_v20  ;;  %v754_v17 = vld [vmem:[#allocation5 + $0x630] sm:$0xff] }
  0xac   :  { %1736 = vst [vmem:[#allocation7 + $0x4e0] sm:$0xff] %v1224_v26  ;;  %v224_v26 = vld [vmem:[#allocation2 + $0x5a0] sm:$0xff]  ;;  %v1247_v31 = vadd.f32 %v735_v24, %v223_v23  ;;  %v755_v20 = vld [vmem:[#allocation5 + $0x638] sm:$0xff] }
  0xad   :  { %1737 = vst [vmem:[#allocation7 + $0x4e8] sm:$0xff] %v1225_v29  ;;  %v225_v29 = vld [vmem:[#allocation2 + $0x5a8] sm:$0xff]  ;;  %v1248_v34 = vadd.f32 %v736_v27, %v224_v26  ;;  %v756_v23 = vld [vmem:[#allocation5 + $0x640] sm:$0xff] }
  0xae   :  { %1738 = vst [vmem:[#allocation7 + $0x4f0] sm:$0xff] %v1226_v32  ;;  %v226_v32 = vld [vmem:[#allocation2 + $0x5b0] sm:$0xff]  ;;  %v1249_v37 = vadd.f32 %v737_v30, %v225_v29  ;;  %v757_v26 = vld [vmem:[#allocation5 + $0x648] sm:$0xff] }
  0xaf   :  { %1739 = vst [vmem:[#allocation7 + $0x4f8] sm:$0xff] %v1227_v35  ;;  %v227_v35 = vld [vmem:[#allocation2 + $0x5b8] sm:$0xff]  ;;  %v1250_v40 = vadd.f32 %v738_v33, %v226_v32  ;;  %v758_v29 = vld [vmem:[#allocation5 + $0x650] sm:$0xff] }
  0xb0   :  { %1740 = vst [vmem:[#allocation7 + $0x500] sm:$0xff] %v1228_v38  ;;  %v228_v38 = vld [vmem:[#allocation2 + $0x5c0] sm:$0xff]  ;;  %v1251_v43 = vadd.f32 %v739_v36, %v227_v35  ;;  %v759_v32 = vld [vmem:[#allocation5 + $0x658] sm:$0xff] }
  0xb1   :  { %1741 = vst [vmem:[#allocation7 + $0x508] sm:$0xff] %v1229_v41  ;;  %v229_v41 = vld [vmem:[#allocation2 + $0x5c8] sm:$0xff]  ;;  %v1252_v46 = vadd.f32 %v740_v39, %v228_v38  ;;  %v760_v35 = vld [vmem:[#allocation5 + $0x660] sm:$0xff] }
  0xb2   :  { %1742 = vst [vmem:[#allocation7 + $0x510] sm:$0xff] %v1230_v44  ;;  %v230_v44 = vld [vmem:[#allocation2 + $0x5d0] sm:$0xff]  ;;  %v1253_v49 = vadd.f32 %v741_v42, %v229_v41  ;;  %v761_v38 = vld [vmem:[#allocation5 + $0x668] sm:$0xff] }
  0xb3   :  { %1743 = vst [vmem:[#allocation7 + $0x518] sm:$0xff] %v1231_v47  ;;  %v231_v47 = vld [vmem:[#allocation2 + $0x5d8] sm:$0xff]  ;;  %v1254_v52 = vadd.f32 %v742_v45, %v230_v44  ;;  %v762_v41 = vld [vmem:[#allocation5 + $0x670] sm:$0xff] }
  0xb4   :  { %1744 = vst [vmem:[#allocation7 + $0x520] sm:$0xff] %v1232_v50  ;;  %v232_v50 = vld [vmem:[#allocation2 + $0x5e0] sm:$0xff]  ;;  %v1255_v55 = vadd.f32 %v743_v48, %v231_v47  ;;  %v763_v44 = vld [vmem:[#allocation5 + $0x678] sm:$0xff] }
  0xb5   :  { %1745 = vst [vmem:[#allocation7 + $0x528] sm:$0xff] %v1233_v53  ;;  %v233_v53 = vld [vmem:[#allocation2 + $0x5e8] sm:$0xff]  ;;  %v1256_v58 = vadd.f32 %v744_v51, %v232_v50  ;;  %v764_v47 = vld [vmem:[#allocation5 + $0x680] sm:$0xff] }
  0xb6   :  { %1746 = vst [vmem:[#allocation7 + $0x530] sm:$0xff] %v1234_v56  ;;  %v234_v56 = vld [vmem:[#allocation2 + $0x5f0] sm:$0xff]  ;;  %v1257_v61 = vadd.f32 %v745_v54, %v233_v53  ;;  %v765_v50 = vld [vmem:[#allocation5 + $0x688] sm:$0xff] }
  0xb7   :  { %1747 = vst [vmem:[#allocation7 + $0x538] sm:$0xff] %v1235_v59  ;;  %v235_v59 = vld [vmem:[#allocation2 + $0x5f8] sm:$0xff]  ;;  %v1258_v0 = vadd.f32 %v746_v57, %v234_v56  ;;  %v766_v53 = vld [vmem:[#allocation5 + $0x690] sm:$0xff] }
  0xb8   :  { %1748 = vst [vmem:[#allocation7 + $0x540] sm:$0xff] %v1236_v62  ;;  %v236_v62 = vld [vmem:[#allocation2 + $0x600] sm:$0xff]  ;;  %v1259_v3 = vadd.f32 %v747_v60, %v235_v59  ;;  %v767_v56 = vld [vmem:[#allocation5 + $0x698] sm:$0xff] }
  0xb9   :  { %1749 = vst [vmem:[#allocation7 + $0x548] sm:$0xff] %v1237_v1  ;;  %v237_v1 = vld [vmem:[#allocation2 + $0x608] sm:$0xff]  ;;  %v1260_v6 = vadd.f32 %v748_v63, %v236_v62  ;;  %v768_v59 = vld [vmem:[#allocation5 + $0x6a0] sm:$0xff] }
  0xba   :  { %1750 = vst [vmem:[#allocation7 + $0x550] sm:$0xff] %v1238_v4  ;;  %v238_v4 = vld [vmem:[#allocation2 + $0x610] sm:$0xff]  ;;  %v1261_v9 = vadd.f32 %v749_v2, %v237_v1  ;;  %v769_v62 = vld [vmem:[#allocation5 + $0x6a8] sm:$0xff] }
  0xbb   :  { %1751 = vst [vmem:[#allocation7 + $0x558] sm:$0xff] %v1239_v7  ;;  %v239_v7 = vld [vmem:[#allocation2 + $0x618] sm:$0xff]  ;;  %v1262_v12 = vadd.f32 %v750_v5, %v238_v4  ;;  %v770_v1 = vld [vmem:[#allocation5 + $0x6b0] sm:$0xff] }
  0xbc   :  { %1752 = vst [vmem:[#allocation7 + $0x560] sm:$0xff] %v1240_v10  ;;  %v240_v10 = vld [vmem:[#allocation2 + $0x620] sm:$0xff]  ;;  %v1263_v15 = vadd.f32 %v751_v8, %v239_v7  ;;  %v771_v4 = vld [vmem:[#allocation5 + $0x6b8] sm:$0xff] }
  0xbd   :  { %1753 = vst [vmem:[#allocation7 + $0x568] sm:$0xff] %v1241_v13  ;;  %v241_v13 = vld [vmem:[#allocation2 + $0x628] sm:$0xff]  ;;  %v1264_v18 = vadd.f32 %v752_v11, %v240_v10  ;;  %v772_v7 = vld [vmem:[#allocation5 + $0x6c0] sm:$0xff] }
  0xbe   :  { %1754 = vst [vmem:[#allocation7 + $0x570] sm:$0xff] %v1242_v16  ;;  %v242_v16 = vld [vmem:[#allocation2 + $0x630] sm:$0xff]  ;;  %v1265_v21 = vadd.f32 %v753_v14, %v241_v13  ;;  %v773_v10 = vld [vmem:[#allocation5 + $0x6c8] sm:$0xff] }
  0xbf   :  { %1755 = vst [vmem:[#allocation7 + $0x578] sm:$0xff] %v1243_v19  ;;  %v243_v19 = vld [vmem:[#allocation2 + $0x638] sm:$0xff]  ;;  %v1266_v24 = vadd.f32 %v754_v17, %v242_v16  ;;  %v774_v13 = vld [vmem:[#allocation5 + $0x6d0] sm:$0xff] }
  0xc0   :  { %1756 = vst [vmem:[#allocation7 + $0x580] sm:$0xff] %v1244_v22  ;;  %v244_v22 = vld [vmem:[#allocation2 + $0x640] sm:$0xff]  ;;  %v1267_v27 = vadd.f32 %v755_v20, %v243_v19  ;;  %v775_v16 = vld [vmem:[#allocation5 + $0x6d8] sm:$0xff] }
  0xc1   :  { %1757 = vst [vmem:[#allocation7 + $0x588] sm:$0xff] %v1245_v25  ;;  %v245_v25 = vld [vmem:[#allocation2 + $0x648] sm:$0xff]  ;;  %v1268_v30 = vadd.f32 %v756_v23, %v244_v22  ;;  %v776_v19 = vld [vmem:[#allocation5 + $0x6e0] sm:$0xff] }
  0xc2   :  { %1758 = vst [vmem:[#allocation7 + $0x590] sm:$0xff] %v1246_v28  ;;  %v246_v28 = vld [vmem:[#allocation2 + $0x650] sm:$0xff]  ;;  %v1269_v33 = vadd.f32 %v757_v26, %v245_v25  ;;  %v777_v22 = vld [vmem:[#allocation5 + $0x6e8] sm:$0xff] }
  0xc3   :  { %1759 = vst [vmem:[#allocation7 + $0x598] sm:$0xff] %v1247_v31  ;;  %v247_v31 = vld [vmem:[#allocation2 + $0x658] sm:$0xff]  ;;  %v1270_v36 = vadd.f32 %v758_v29, %v246_v28  ;;  %v778_v25 = vld [vmem:[#allocation5 + $0x6f0] sm:$0xff] }
  0xc4   :  { %1760 = vst [vmem:[#allocation7 + $0x5a0] sm:$0xff] %v1248_v34  ;;  %v248_v34 = vld [vmem:[#allocation2 + $0x660] sm:$0xff]  ;;  %v1271_v39 = vadd.f32 %v759_v32, %v247_v31  ;;  %v779_v28 = vld [vmem:[#allocation5 + $0x6f8] sm:$0xff] }
  0xc5   :  { %1761 = vst [vmem:[#allocation7 + $0x5a8] sm:$0xff] %v1249_v37  ;;  %v249_v37 = vld [vmem:[#allocation2 + $0x668] sm:$0xff]  ;;  %v1272_v42 = vadd.f32 %v760_v35, %v248_v34  ;;  %v780_v31 = vld [vmem:[#allocation5 + $0x700] sm:$0xff] }
  0xc6   :  { %1762 = vst [vmem:[#allocation7 + $0x5b0] sm:$0xff] %v1250_v40  ;;  %v250_v40 = vld [vmem:[#allocation2 + $0x670] sm:$0xff]  ;;  %v1273_v45 = vadd.f32 %v761_v38, %v249_v37  ;;  %v781_v34 = vld [vmem:[#allocation5 + $0x708] sm:$0xff] }
  0xc7   :  { %1763 = vst [vmem:[#allocation7 + $0x5b8] sm:$0xff] %v1251_v43  ;;  %v251_v43 = vld [vmem:[#allocation2 + $0x678] sm:$0xff]  ;;  %v1274_v48 = vadd.f32 %v762_v41, %v250_v40  ;;  %v782_v37 = vld [vmem:[#allocation5 + $0x710] sm:$0xff] }
  0xc8   :  { %1764 = vst [vmem:[#allocation7 + $0x5c0] sm:$0xff] %v1252_v46  ;;  %v252_v46 = vld [vmem:[#allocation2 + $0x680] sm:$0xff]  ;;  %v1275_v51 = vadd.f32 %v763_v44, %v251_v43  ;;  %v783_v40 = vld [vmem:[#allocation5 + $0x718] sm:$0xff] }
  0xc9   :  { %1765 = vst [vmem:[#allocation7 + $0x5c8] sm:$0xff] %v1253_v49  ;;  %v253_v49 = vld [vmem:[#allocation2 + $0x688] sm:$0xff]  ;;  %v1276_v54 = vadd.f32 %v764_v47, %v252_v46  ;;  %v784_v43 = vld [vmem:[#allocation5 + $0x720] sm:$0xff] }
  0xca   :  { %1766 = vst [vmem:[#allocation7 + $0x5d0] sm:$0xff] %v1254_v52  ;;  %v254_v52 = vld [vmem:[#allocation2 + $0x690] sm:$0xff]  ;;  %v1277_v57 = vadd.f32 %v765_v50, %v253_v49  ;;  %v785_v46 = vld [vmem:[#allocation5 + $0x728] sm:$0xff] }
  0xcb   :  { %1767 = vst [vmem:[#allocation7 + $0x5d8] sm:$0xff] %v1255_v55  ;;  %v255_v55 = vld [vmem:[#allocation2 + $0x698] sm:$0xff]  ;;  %v1278_v60 = vadd.f32 %v766_v53, %v254_v52  ;;  %v786_v49 = vld [vmem:[#allocation5 + $0x730] sm:$0xff] }
  0xcc   :  { %1768 = vst [vmem:[#allocation7 + $0x5e0] sm:$0xff] %v1256_v58  ;;  %v256_v58 = vld [vmem:[#allocation2 + $0x6a0] sm:$0xff]  ;;  %v1279_v63 = vadd.f32 %v767_v56, %v255_v55  ;;  %v787_v52 = vld [vmem:[#allocation5 + $0x738] sm:$0xff] }
  0xcd   :  { %1769 = vst [vmem:[#allocation7 + $0x5e8] sm:$0xff] %v1257_v61  ;;  %v257_v61 = vld [vmem:[#allocation2 + $0x6a8] sm:$0xff]  ;;  %v1280_v2 = vadd.f32 %v768_v59, %v256_v58  ;;  %v788_v55 = vld [vmem:[#allocation5 + $0x740] sm:$0xff] }
  0xce   :  { %1770 = vst [vmem:[#allocation7 + $0x5f0] sm:$0xff] %v1258_v0  ;;  %v258_v0 = vld [vmem:[#allocation2 + $0x6b0] sm:$0xff]  ;;  %v1281_v5 = vadd.f32 %v769_v62, %v257_v61  ;;  %v789_v58 = vld [vmem:[#allocation5 + $0x748] sm:$0xff] }
  0xcf   :  { %1771 = vst [vmem:[#allocation7 + $0x5f8] sm:$0xff] %v1259_v3  ;;  %v259_v3 = vld [vmem:[#allocation2 + $0x6b8] sm:$0xff]  ;;  %v1282_v8 = vadd.f32 %v770_v1, %v258_v0  ;;  %v790_v61 = vld [vmem:[#allocation5 + $0x750] sm:$0xff] }
  0xd0   :  { %1772 = vst [vmem:[#allocation7 + $0x600] sm:$0xff] %v1260_v6  ;;  %v260_v6 = vld [vmem:[#allocation2 + $0x6c0] sm:$0xff]  ;;  %v1283_v11 = vadd.f32 %v771_v4, %v259_v3  ;;  %v791_v0 = vld [vmem:[#allocation5 + $0x758] sm:$0xff] }
  0xd1   :  { %1773 = vst [vmem:[#allocation7 + $0x608] sm:$0xff] %v1261_v9  ;;  %v261_v9 = vld [vmem:[#allocation2 + $0x6c8] sm:$0xff]  ;;  %v1284_v14 = vadd.f32 %v772_v7, %v260_v6  ;;  %v792_v3 = vld [vmem:[#allocation5 + $0x760] sm:$0xff] }
  0xd2   :  { %1774 = vst [vmem:[#allocation7 + $0x610] sm:$0xff] %v1262_v12  ;;  %v262_v12 = vld [vmem:[#allocation2 + $0x6d0] sm:$0xff]  ;;  %v1285_v17 = vadd.f32 %v773_v10, %v261_v9  ;;  %v793_v6 = vld [vmem:[#allocation5 + $0x768] sm:$0xff] }
  0xd3   :  { %1775 = vst [vmem:[#allocation7 + $0x618] sm:$0xff] %v1263_v15  ;;  %v263_v15 = vld [vmem:[#allocation2 + $0x6d8] sm:$0xff]  ;;  %v1286_v20 = vadd.f32 %v774_v13, %v262_v12  ;;  %v794_v9 = vld [vmem:[#allocation5 + $0x770] sm:$0xff] }
  0xd4   :  { %1776 = vst [vmem:[#allocation7 + $0x620] sm:$0xff] %v1264_v18  ;;  %v264_v18 = vld [vmem:[#allocation2 + $0x6e0] sm:$0xff]  ;;  %v1287_v23 = vadd.f32 %v775_v16, %v263_v15  ;;  %v795_v12 = vld [vmem:[#allocation5 + $0x778] sm:$0xff] }
  0xd5   :  { %1777 = vst [vmem:[#allocation7 + $0x628] sm:$0xff] %v1265_v21  ;;  %v265_v21 = vld [vmem:[#allocation2 + $0x6e8] sm:$0xff]  ;;  %v1288_v26 = vadd.f32 %v776_v19, %v264_v18  ;;  %v796_v15 = vld [vmem:[#allocation5 + $0x780] sm:$0xff] }
  0xd6   :  { %1778 = vst [vmem:[#allocation7 + $0x630] sm:$0xff] %v1266_v24  ;;  %v266_v24 = vld [vmem:[#allocation2 + $0x6f0] sm:$0xff]  ;;  %v1289_v29 = vadd.f32 %v777_v22, %v265_v21  ;;  %v797_v18 = vld [vmem:[#allocation5 + $0x788] sm:$0xff] }
  0xd7   :  { %1779 = vst [vmem:[#allocation7 + $0x638] sm:$0xff] %v1267_v27  ;;  %v267_v27 = vld [vmem:[#allocation2 + $0x6f8] sm:$0xff]  ;;  %v1290_v32 = vadd.f32 %v778_v25, %v266_v24  ;;  %v798_v21 = vld [vmem:[#allocation5 + $0x790] sm:$0xff] }
  0xd8   :  { %1780 = vst [vmem:[#allocation7 + $0x640] sm:$0xff] %v1268_v30  ;;  %v268_v30 = vld [vmem:[#allocation2 + $0x700] sm:$0xff]  ;;  %v1291_v35 = vadd.f32 %v779_v28, %v267_v27  ;;  %v799_v24 = vld [vmem:[#allocation5 + $0x798] sm:$0xff] }
  0xd9   :  { %1781 = vst [vmem:[#allocation7 + $0x648] sm:$0xff] %v1269_v33  ;;  %v269_v33 = vld [vmem:[#allocation2 + $0x708] sm:$0xff]  ;;  %v1292_v38 = vadd.f32 %v780_v31, %v268_v30  ;;  %v800_v27 = vld [vmem:[#allocation5 + $0x7a0] sm:$0xff] }
  0xda   :  { %1782 = vst [vmem:[#allocation7 + $0x650] sm:$0xff] %v1270_v36  ;;  %v270_v36 = vld [vmem:[#allocation2 + $0x710] sm:$0xff]  ;;  %v1293_v41 = vadd.f32 %v781_v34, %v269_v33  ;;  %v801_v30 = vld [vmem:[#allocation5 + $0x7a8] sm:$0xff] }
  0xdb   :  { %1783 = vst [vmem:[#allocation7 + $0x658] sm:$0xff] %v1271_v39  ;;  %v271_v39 = vld [vmem:[#allocation2 + $0x718] sm:$0xff]  ;;  %v1294_v44 = vadd.f32 %v782_v37, %v270_v36  ;;  %v802_v33 = vld [vmem:[#allocation5 + $0x7b0] sm:$0xff] }
  0xdc   :  { %1784 = vst [vmem:[#allocation7 + $0x660] sm:$0xff] %v1272_v42  ;;  %v272_v42 = vld [vmem:[#allocation2 + $0x720] sm:$0xff]  ;;  %v1295_v47 = vadd.f32 %v783_v40, %v271_v39  ;;  %v803_v36 = vld [vmem:[#allocation5 + $0x7b8] sm:$0xff] }
  0xdd   :  { %1785 = vst [vmem:[#allocation7 + $0x668] sm:$0xff] %v1273_v45  ;;  %v273_v45 = vld [vmem:[#allocation2 + $0x728] sm:$0xff]  ;;  %v1296_v50 = vadd.f32 %v784_v43, %v272_v42  ;;  %v804_v39 = vld [vmem:[#allocation5 + $0x7c0] sm:$0xff] }
  0xde   :  { %1786 = vst [vmem:[#allocation7 + $0x670] sm:$0xff] %v1274_v48  ;;  %v274_v48 = vld [vmem:[#allocation2 + $0x730] sm:$0xff]  ;;  %v1297_v53 = vadd.f32 %v785_v46, %v273_v45  ;;  %v805_v42 = vld [vmem:[#allocation5 + $0x7c8] sm:$0xff] }
  0xdf   :  { %1787 = vst [vmem:[#allocation7 + $0x678] sm:$0xff] %v1275_v51  ;;  %v275_v51 = vld [vmem:[#allocation2 + $0x738] sm:$0xff]  ;;  %v1298_v56 = vadd.f32 %v786_v49, %v274_v48  ;;  %v806_v45 = vld [vmem:[#allocation5 + $0x7d0] sm:$0xff] }
  0xe0   :  { %1788 = vst [vmem:[#allocation7 + $0x680] sm:$0xff] %v1276_v54  ;;  %v276_v54 = vld [vmem:[#allocation2 + $0x740] sm:$0xff]  ;;  %v1299_v59 = vadd.f32 %v787_v52, %v275_v51  ;;  %v807_v48 = vld [vmem:[#allocation5 + $0x7d8] sm:$0xff] }
  0xe1   :  { %1789 = vst [vmem:[#allocation7 + $0x688] sm:$0xff] %v1277_v57  ;;  %v277_v57 = vld [vmem:[#allocation2 + $0x748] sm:$0xff]  ;;  %v1300_v62 = vadd.f32 %v788_v55, %v276_v54  ;;  %v808_v51 = vld [vmem:[#allocation5 + $0x7e0] sm:$0xff] }
  0xe2   :  { %1790 = vst [vmem:[#allocation7 + $0x690] sm:$0xff] %v1278_v60  ;;  %v278_v60 = vld [vmem:[#allocation2 + $0x750] sm:$0xff]  ;;  %v1301_v1 = vadd.f32 %v789_v58, %v277_v57  ;;  %v809_v54 = vld [vmem:[#allocation5 + $0x7e8] sm:$0xff] }
  0xe3   :  { %1791 = vst [vmem:[#allocation7 + $0x698] sm:$0xff] %v1279_v63  ;;  %v279_v63 = vld [vmem:[#allocation2 + $0x758] sm:$0xff]  ;;  %v1302_v4 = vadd.f32 %v790_v61, %v278_v60  ;;  %v810_v57 = vld [vmem:[#allocation5 + $0x7f0] sm:$0xff] }
  0xe4   :  { %1792 = vst [vmem:[#allocation7 + $0x6a0] sm:$0xff] %v1280_v2  ;;  %v280_v2 = vld [vmem:[#allocation2 + $0x760] sm:$0xff]  ;;  %v1303_v7 = vadd.f32 %v791_v0, %v279_v63  ;;  %v811_v60 = vld [vmem:[#allocation5 + $0x7f8] sm:$0xff] }
  0xe5   :  { %1793 = vst [vmem:[#allocation7 + $0x6a8] sm:$0xff] %v1281_v5  ;;  %v281_v5 = vld [vmem:[#allocation2 + $0x768] sm:$0xff]  ;;  %v1304_v10 = vadd.f32 %v792_v3, %v280_v2  ;;  %v812_v63 = vld [vmem:[#allocation5 + $0x800] sm:$0xff] }
  0xe6   :  { %1794 = vst [vmem:[#allocation7 + $0x6b0] sm:$0xff] %v1282_v8  ;;  %v282_v8 = vld [vmem:[#allocation2 + $0x770] sm:$0xff]  ;;  %v1305_v13 = vadd.f32 %v793_v6, %v281_v5  ;;  %v813_v2 = vld [vmem:[#allocation5 + $0x808] sm:$0xff] }
  0xe7   :  { %1795 = vst [vmem:[#allocation7 + $0x6b8] sm:$0xff] %v1283_v11  ;;  %v283_v11 = vld [vmem:[#allocation2 + $0x778] sm:$0xff]  ;;  %v1306_v16 = vadd.f32 %v794_v9, %v282_v8  ;;  %v814_v5 = vld [vmem:[#allocation5 + $0x810] sm:$0xff] }
  0xe8   :  { %1796 = vst [vmem:[#allocation7 + $0x6c0] sm:$0xff] %v1284_v14  ;;  %v284_v14 = vld [vmem:[#allocation2 + $0x780] sm:$0xff]  ;;  %v1307_v19 = vadd.f32 %v795_v12, %v283_v11  ;;  %v815_v8 = vld [vmem:[#allocation5 + $0x818] sm:$0xff] }
  0xe9   :  { %1797 = vst [vmem:[#allocation7 + $0x6c8] sm:$0xff] %v1285_v17  ;;  %v285_v17 = vld [vmem:[#allocation2 + $0x788] sm:$0xff]  ;;  %v1308_v22 = vadd.f32 %v796_v15, %v284_v14  ;;  %v816_v11 = vld [vmem:[#allocation5 + $0x820] sm:$0xff] }
  0xea   :  { %1798 = vst [vmem:[#allocation7 + $0x6d0] sm:$0xff] %v1286_v20  ;;  %v286_v20 = vld [vmem:[#allocation2 + $0x790] sm:$0xff]  ;;  %v1309_v25 = vadd.f32 %v797_v18, %v285_v17  ;;  %v817_v14 = vld [vmem:[#allocation5 + $0x828] sm:$0xff] }
  0xeb   :  { %1799 = vst [vmem:[#allocation7 + $0x6d8] sm:$0xff] %v1287_v23  ;;  %v287_v23 = vld [vmem:[#allocation2 + $0x798] sm:$0xff]  ;;  %v1310_v28 = vadd.f32 %v798_v21, %v286_v20  ;;  %v818_v17 = vld [vmem:[#allocation5 + $0x830] sm:$0xff] }
  0xec   :  { %1800 = vst [vmem:[#allocation7 + $0x6e0] sm:$0xff] %v1288_v26  ;;  %v288_v26 = vld [vmem:[#allocation2 + $0x7a0] sm:$0xff]  ;;  %v1311_v31 = vadd.f32 %v799_v24, %v287_v23  ;;  %v819_v20 = vld [vmem:[#allocation5 + $0x838] sm:$0xff] }
  0xed   :  { %1801 = vst [vmem:[#allocation7 + $0x6e8] sm:$0xff] %v1289_v29  ;;  %v289_v29 = vld [vmem:[#allocation2 + $0x7a8] sm:$0xff]  ;;  %v1312_v34 = vadd.f32 %v800_v27, %v288_v26  ;;  %v820_v23 = vld [vmem:[#allocation5 + $0x840] sm:$0xff] }
  0xee   :  { %1802 = vst [vmem:[#allocation7 + $0x6f0] sm:$0xff] %v1290_v32  ;;  %v290_v32 = vld [vmem:[#allocation2 + $0x7b0] sm:$0xff]  ;;  %v1313_v37 = vadd.f32 %v801_v30, %v289_v29  ;;  %v821_v26 = vld [vmem:[#allocation5 + $0x848] sm:$0xff] }
  0xef   :  { %1803 = vst [vmem:[#allocation7 + $0x6f8] sm:$0xff] %v1291_v35  ;;  %v291_v35 = vld [vmem:[#allocation2 + $0x7b8] sm:$0xff]  ;;  %v1314_v40 = vadd.f32 %v802_v33, %v290_v32  ;;  %v822_v29 = vld [vmem:[#allocation5 + $0x850] sm:$0xff] }
  0xf0   :  { %1804 = vst [vmem:[#allocation7 + $0x700] sm:$0xff] %v1292_v38  ;;  %v292_v38 = vld [vmem:[#allocation2 + $0x7c0] sm:$0xff]  ;;  %v1315_v43 = vadd.f32 %v803_v36, %v291_v35  ;;  %v823_v32 = vld [vmem:[#allocation5 + $0x858] sm:$0xff] }
  0xf1   :  { %1805 = vst [vmem:[#allocation7 + $0x708] sm:$0xff] %v1293_v41  ;;  %v293_v41 = vld [vmem:[#allocation2 + $0x7c8] sm:$0xff]  ;;  %v1316_v46 = vadd.f32 %v804_v39, %v292_v38  ;;  %v824_v35 = vld [vmem:[#allocation5 + $0x860] sm:$0xff] }
  0xf2   :  { %1806 = vst [vmem:[#allocation7 + $0x710] sm:$0xff] %v1294_v44  ;;  %v294_v44 = vld [vmem:[#allocation2 + $0x7d0] sm:$0xff]  ;;  %v1317_v49 = vadd.f32 %v805_v42, %v293_v41  ;;  %v825_v38 = vld [vmem:[#allocation5 + $0x868] sm:$0xff] }
  0xf3   :  { %1807 = vst [vmem:[#allocation7 + $0x718] sm:$0xff] %v1295_v47  ;;  %v295_v47 = vld [vmem:[#allocation2 + $0x7d8] sm:$0xff]  ;;  %v1318_v52 = vadd.f32 %v806_v45, %v294_v44  ;;  %v826_v41 = vld [vmem:[#allocation5 + $0x870] sm:$0xff] }
  0xf4   :  { %1808 = vst [vmem:[#allocation7 + $0x720] sm:$0xff] %v1296_v50  ;;  %v296_v50 = vld [vmem:[#allocation2 + $0x7e0] sm:$0xff]  ;;  %v1319_v55 = vadd.f32 %v807_v48, %v295_v47  ;;  %v827_v44 = vld [vmem:[#allocation5 + $0x878] sm:$0xff] }
  0xf5   :  { %1809 = vst [vmem:[#allocation7 + $0x728] sm:$0xff] %v1297_v53  ;;  %v297_v53 = vld [vmem:[#allocation2 + $0x7e8] sm:$0xff]  ;;  %v1320_v58 = vadd.f32 %v808_v51, %v296_v50  ;;  %v828_v47 = vld [vmem:[#allocation5 + $0x880] sm:$0xff] }
  0xf6   :  { %1810 = vst [vmem:[#allocation7 + $0x730] sm:$0xff] %v1298_v56  ;;  %v298_v56 = vld [vmem:[#allocation2 + $0x7f0] sm:$0xff]  ;;  %v1321_v61 = vadd.f32 %v809_v54, %v297_v53  ;;  %v829_v50 = vld [vmem:[#allocation5 + $0x888] sm:$0xff] }
  0xf7   :  { %1811 = vst [vmem:[#allocation7 + $0x738] sm:$0xff] %v1299_v59  ;;  %v299_v59 = vld [vmem:[#allocation2 + $0x7f8] sm:$0xff]  ;;  %v1322_v0 = vadd.f32 %v810_v57, %v298_v56  ;;  %v830_v53 = vld [vmem:[#allocation5 + $0x890] sm:$0xff] }
  0xf8   :  { %1812 = vst [vmem:[#allocation7 + $0x740] sm:$0xff] %v1300_v62  ;;  %v300_v62 = vld [vmem:[#allocation2 + $0x800] sm:$0xff]  ;;  %v1323_v3 = vadd.f32 %v811_v60, %v299_v59  ;;  %v831_v56 = vld [vmem:[#allocation5 + $0x898] sm:$0xff] }
  0xf9   :  { %1813 = vst [vmem:[#allocation7 + $0x748] sm:$0xff] %v1301_v1  ;;  %v301_v1 = vld [vmem:[#allocation2 + $0x808] sm:$0xff]  ;;  %v1324_v6 = vadd.f32 %v812_v63, %v300_v62  ;;  %v832_v59 = vld [vmem:[#allocation5 + $0x8a0] sm:$0xff] }
  0xfa   :  { %1814 = vst [vmem:[#allocation7 + $0x750] sm:$0xff] %v1302_v4  ;;  %v302_v4 = vld [vmem:[#allocation2 + $0x810] sm:$0xff]  ;;  %v1325_v9 = vadd.f32 %v813_v2, %v301_v1  ;;  %v833_v62 = vld [vmem:[#allocation5 + $0x8a8] sm:$0xff] }
  0xfb   :  { %1815 = vst [vmem:[#allocation7 + $0x758] sm:$0xff] %v1303_v7  ;;  %v303_v7 = vld [vmem:[#allocation2 + $0x818] sm:$0xff]  ;;  %v1326_v12 = vadd.f32 %v814_v5, %v302_v4  ;;  %v834_v1 = vld [vmem:[#allocation5 + $0x8b0] sm:$0xff] }
  0xfc   :  { %1816 = vst [vmem:[#allocation7 + $0x760] sm:$0xff] %v1304_v10  ;;  %v304_v10 = vld [vmem:[#allocation2 + $0x820] sm:$0xff]  ;;  %v1327_v15 = vadd.f32 %v815_v8, %v303_v7  ;;  %v835_v4 = vld [vmem:[#allocation5 + $0x8b8] sm:$0xff] }
  0xfd   :  { %1817 = vst [vmem:[#allocation7 + $0x768] sm:$0xff] %v1305_v13  ;;  %v305_v13 = vld [vmem:[#allocation2 + $0x828] sm:$0xff]  ;;  %v1328_v18 = vadd.f32 %v816_v11, %v304_v10  ;;  %v836_v7 = vld [vmem:[#allocation5 + $0x8c0] sm:$0xff] }
  0xfe   :  { %1818 = vst [vmem:[#allocation7 + $0x770] sm:$0xff] %v1306_v16  ;;  %v306_v16 = vld [vmem:[#allocation2 + $0x830] sm:$0xff]  ;;  %v1329_v21 = vadd.f32 %v817_v14, %v305_v13  ;;  %v837_v10 = vld [vmem:[#allocation5 + $0x8c8] sm:$0xff] }
  0xff   :  { %1819 = vst [vmem:[#allocation7 + $0x778] sm:$0xff] %v1307_v19  ;;  %v307_v19 = vld [vmem:[#allocation2 + $0x838] sm:$0xff]  ;;  %v1330_v24 = vadd.f32 %v818_v17, %v306_v16  ;;  %v838_v13 = vld [vmem:[#allocation5 + $0x8d0] sm:$0xff] }
 0x100   :  { %1820 = vst [vmem:[#allocation7 + $0x780] sm:$0xff] %v1308_v22  ;;  %v308_v22 = vld [vmem:[#allocation2 + $0x840] sm:$0xff]  ;;  %v1331_v27 = vadd.f32 %v819_v20, %v307_v19  ;;  %v839_v16 = vld [vmem:[#allocation5 + $0x8d8] sm:$0xff] }
 0x101   :  { %1821 = vst [vmem:[#allocation7 + $0x788] sm:$0xff] %v1309_v25  ;;  %v309_v25 = vld [vmem:[#allocation2 + $0x848] sm:$0xff]  ;;  %v1332_v30 = vadd.f32 %v820_v23, %v308_v22  ;;  %v840_v19 = vld [vmem:[#allocation5 + $0x8e0] sm:$0xff] }
 0x102   :  { %1822 = vst [vmem:[#allocation7 + $0x790] sm:$0xff] %v1310_v28  ;;  %v310_v28 = vld [vmem:[#allocation2 + $0x850] sm:$0xff]  ;;  %v1333_v33 = vadd.f32 %v821_v26, %v309_v25  ;;  %v841_v22 = vld [vmem:[#allocation5 + $0x8e8] sm:$0xff] }
 0x103   :  { %1823 = vst [vmem:[#allocation7 + $0x798] sm:$0xff] %v1311_v31  ;;  %v311_v31 = vld [vmem:[#allocation2 + $0x858] sm:$0xff]  ;;  %v1334_v36 = vadd.f32 %v822_v29, %v310_v28  ;;  %v842_v25 = vld [vmem:[#allocation5 + $0x8f0] sm:$0xff] }
 0x104   :  { %1824 = vst [vmem:[#allocation7 + $0x7a0] sm:$0xff] %v1312_v34  ;;  %v312_v34 = vld [vmem:[#allocation2 + $0x860] sm:$0xff]  ;;  %v1335_v39 = vadd.f32 %v823_v32, %v311_v31  ;;  %v843_v28 = vld [vmem:[#allocation5 + $0x8f8] sm:$0xff] }
 0x105   :  { %1825 = vst [vmem:[#allocation7 + $0x7a8] sm:$0xff] %v1313_v37  ;;  %v313_v37 = vld [vmem:[#allocation2 + $0x868] sm:$0xff]  ;;  %v1336_v42 = vadd.f32 %v824_v35, %v312_v34  ;;  %v844_v31 = vld [vmem:[#allocation5 + $0x900] sm:$0xff] }
 0x106   :  { %1826 = vst [vmem:[#allocation7 + $0x7b0] sm:$0xff] %v1314_v40  ;;  %v314_v40 = vld [vmem:[#allocation2 + $0x870] sm:$0xff]  ;;  %v1337_v45 = vadd.f32 %v825_v38, %v313_v37  ;;  %v845_v34 = vld [vmem:[#allocation5 + $0x908] sm:$0xff] }
 0x107   :  { %1827 = vst [vmem:[#allocation7 + $0x7b8] sm:$0xff] %v1315_v43  ;;  %v315_v43 = vld [vmem:[#allocation2 + $0x878] sm:$0xff]  ;;  %v1338_v48 = vadd.f32 %v826_v41, %v314_v40  ;;  %v846_v37 = vld [vmem:[#allocation5 + $0x910] sm:$0xff] }
 0x108   :  { %1828 = vst [vmem:[#allocation7 + $0x7c0] sm:$0xff] %v1316_v46  ;;  %v316_v46 = vld [vmem:[#allocation2 + $0x880] sm:$0xff]  ;;  %v1339_v51 = vadd.f32 %v827_v44, %v315_v43  ;;  %v847_v40 = vld [vmem:[#allocation5 + $0x918] sm:$0xff] }
 0x109   :  { %1829 = vst [vmem:[#allocation7 + $0x7c8] sm:$0xff] %v1317_v49  ;;  %v317_v49 = vld [vmem:[#allocation2 + $0x888] sm:$0xff]  ;;  %v1340_v54 = vadd.f32 %v828_v47, %v316_v46  ;;  %v848_v43 = vld [vmem:[#allocation5 + $0x920] sm:$0xff] }
 0x10a   :  { %1830 = vst [vmem:[#allocation7 + $0x7d0] sm:$0xff] %v1318_v52  ;;  %v318_v52 = vld [vmem:[#allocation2 + $0x890] sm:$0xff]  ;;  %v1341_v57 = vadd.f32 %v829_v50, %v317_v49  ;;  %v849_v46 = vld [vmem:[#allocation5 + $0x928] sm:$0xff] }
 0x10b   :  { %1831 = vst [vmem:[#allocation7 + $0x7d8] sm:$0xff] %v1319_v55  ;;  %v319_v55 = vld [vmem:[#allocation2 + $0x898] sm:$0xff]  ;;  %v1342_v60 = vadd.f32 %v830_v53, %v318_v52  ;;  %v850_v49 = vld [vmem:[#allocation5 + $0x930] sm:$0xff] }
 0x10c   :  { %1832 = vst [vmem:[#allocation7 + $0x7e0] sm:$0xff] %v1320_v58  ;;  %v320_v58 = vld [vmem:[#allocation2 + $0x8a0] sm:$0xff]  ;;  %v1343_v63 = vadd.f32 %v831_v56, %v319_v55  ;;  %v851_v52 = vld [vmem:[#allocation5 + $0x938] sm:$0xff] }
 0x10d   :  { %1833 = vst [vmem:[#allocation7 + $0x7e8] sm:$0xff] %v1321_v61  ;;  %v321_v61 = vld [vmem:[#allocation2 + $0x8a8] sm:$0xff]  ;;  %v1344_v2 = vadd.f32 %v832_v59, %v320_v58  ;;  %v852_v55 = vld [vmem:[#allocation5 + $0x940] sm:$0xff] }
 0x10e   :  { %1834 = vst [vmem:[#allocation7 + $0x7f0] sm:$0xff] %v1322_v0  ;;  %v322_v0 = vld [vmem:[#allocation2 + $0x8b0] sm:$0xff]  ;;  %v1345_v5 = vadd.f32 %v833_v62, %v321_v61  ;;  %v853_v58 = vld [vmem:[#allocation5 + $0x948] sm:$0xff] }
 0x10f   :  { %1835 = vst [vmem:[#allocation7 + $0x7f8] sm:$0xff] %v1323_v3  ;;  %v323_v3 = vld [vmem:[#allocation2 + $0x8b8] sm:$0xff]  ;;  %v1346_v8 = vadd.f32 %v834_v1, %v322_v0  ;;  %v854_v61 = vld [vmem:[#allocation5 + $0x950] sm:$0xff] }
 0x110   :  { %1836 = vst [vmem:[#allocation7 + $0x800] sm:$0xff] %v1324_v6  ;;  %v324_v6 = vld [vmem:[#allocation2 + $0x8c0] sm:$0xff]  ;;  %v1347_v11 = vadd.f32 %v835_v4, %v323_v3  ;;  %v855_v0 = vld [vmem:[#allocation5 + $0x958] sm:$0xff] }
 0x111   :  { %1837 = vst [vmem:[#allocation7 + $0x808] sm:$0xff] %v1325_v9  ;;  %v325_v9 = vld [vmem:[#allocation2 + $0x8c8] sm:$0xff]  ;;  %v1348_v14 = vadd.f32 %v836_v7, %v324_v6  ;;  %v856_v3 = vld [vmem:[#allocation5 + $0x960] sm:$0xff] }
 0x112   :  { %1838 = vst [vmem:[#allocation7 + $0x810] sm:$0xff] %v1326_v12  ;;  %v326_v12 = vld [vmem:[#allocation2 + $0x8d0] sm:$0xff]  ;;  %v1349_v17 = vadd.f32 %v837_v10, %v325_v9  ;;  %v857_v6 = vld [vmem:[#allocation5 + $0x968] sm:$0xff] }
 0x113   :  { %1839 = vst [vmem:[#allocation7 + $0x818] sm:$0xff] %v1327_v15  ;;  %v327_v15 = vld [vmem:[#allocation2 + $0x8d8] sm:$0xff]  ;;  %v1350_v20 = vadd.f32 %v838_v13, %v326_v12  ;;  %v858_v9 = vld [vmem:[#allocation5 + $0x970] sm:$0xff] }
 0x114   :  { %1840 = vst [vmem:[#allocation7 + $0x820] sm:$0xff] %v1328_v18  ;;  %v328_v18 = vld [vmem:[#allocation2 + $0x8e0] sm:$0xff]  ;;  %v1351_v23 = vadd.f32 %v839_v16, %v327_v15  ;;  %v859_v12 = vld [vmem:[#allocation5 + $0x978] sm:$0xff] }
 0x115   :  { %1841 = vst [vmem:[#allocation7 + $0x828] sm:$0xff] %v1329_v21  ;;  %v329_v21 = vld [vmem:[#allocation2 + $0x8e8] sm:$0xff]  ;;  %v1352_v26 = vadd.f32 %v840_v19, %v328_v18  ;;  %v860_v15 = vld [vmem:[#allocation5 + $0x980] sm:$0xff] }
 0x116   :  { %1842 = vst [vmem:[#allocation7 + $0x830] sm:$0xff] %v1330_v24  ;;  %v330_v24 = vld [vmem:[#allocation2 + $0x8f0] sm:$0xff]  ;;  %v1353_v29 = vadd.f32 %v841_v22, %v329_v21  ;;  %v861_v18 = vld [vmem:[#allocation5 + $0x988] sm:$0xff] }
 0x117   :  { %1843 = vst [vmem:[#allocation7 + $0x838] sm:$0xff] %v1331_v27  ;;  %v331_v27 = vld [vmem:[#allocation2 + $0x8f8] sm:$0xff]  ;;  %v1354_v32 = vadd.f32 %v842_v25, %v330_v24  ;;  %v862_v21 = vld [vmem:[#allocation5 + $0x990] sm:$0xff] }
 0x118   :  { %1844 = vst [vmem:[#allocation7 + $0x840] sm:$0xff] %v1332_v30  ;;  %v332_v30 = vld [vmem:[#allocation2 + $0x900] sm:$0xff]  ;;  %v1355_v35 = vadd.f32 %v843_v28, %v331_v27  ;;  %v863_v24 = vld [vmem:[#allocation5 + $0x998] sm:$0xff] }
 0x119   :  { %1845 = vst [vmem:[#allocation7 + $0x848] sm:$0xff] %v1333_v33  ;;  %v333_v33 = vld [vmem:[#allocation2 + $0x908] sm:$0xff]  ;;  %v1356_v38 = vadd.f32 %v844_v31, %v332_v30  ;;  %v864_v27 = vld [vmem:[#allocation5 + $0x9a0] sm:$0xff] }
 0x11a   :  { %1846 = vst [vmem:[#allocation7 + $0x850] sm:$0xff] %v1334_v36  ;;  %v334_v36 = vld [vmem:[#allocation2 + $0x910] sm:$0xff]  ;;  %v1357_v41 = vadd.f32 %v845_v34, %v333_v33  ;;  %v865_v30 = vld [vmem:[#allocation5 + $0x9a8] sm:$0xff] }
 0x11b   :  { %1847 = vst [vmem:[#allocation7 + $0x858] sm:$0xff] %v1335_v39  ;;  %v335_v39 = vld [vmem:[#allocation2 + $0x918] sm:$0xff]  ;;  %v1358_v44 = vadd.f32 %v846_v37, %v334_v36  ;;  %v866_v33 = vld [vmem:[#allocation5 + $0x9b0] sm:$0xff] }
 0x11c   :  { %1848 = vst [vmem:[#allocation7 + $0x860] sm:$0xff] %v1336_v42  ;;  %v336_v42 = vld [vmem:[#allocation2 + $0x920] sm:$0xff]  ;;  %v1359_v47 = vadd.f32 %v847_v40, %v335_v39  ;;  %v867_v36 = vld [vmem:[#allocation5 + $0x9b8] sm:$0xff] }
 0x11d   :  { %1849 = vst [vmem:[#allocation7 + $0x868] sm:$0xff] %v1337_v45  ;;  %v337_v45 = vld [vmem:[#allocation2 + $0x928] sm:$0xff]  ;;  %v1360_v50 = vadd.f32 %v848_v43, %v336_v42  ;;  %v868_v39 = vld [vmem:[#allocation5 + $0x9c0] sm:$0xff] }
 0x11e   :  { %1850 = vst [vmem:[#allocation7 + $0x870] sm:$0xff] %v1338_v48  ;;  %v338_v48 = vld [vmem:[#allocation2 + $0x930] sm:$0xff]  ;;  %v1361_v53 = vadd.f32 %v849_v46, %v337_v45  ;;  %v869_v42 = vld [vmem:[#allocation5 + $0x9c8] sm:$0xff] }
 0x11f   :  { %1851 = vst [vmem:[#allocation7 + $0x878] sm:$0xff] %v1339_v51  ;;  %v339_v51 = vld [vmem:[#allocation2 + $0x938] sm:$0xff]  ;;  %v1362_v56 = vadd.f32 %v850_v49, %v338_v48  ;;  %v870_v45 = vld [vmem:[#allocation5 + $0x9d0] sm:$0xff] }
 0x120   :  { %1852 = vst [vmem:[#allocation7 + $0x880] sm:$0xff] %v1340_v54  ;;  %v340_v54 = vld [vmem:[#allocation2 + $0x940] sm:$0xff]  ;;  %v1363_v59 = vadd.f32 %v851_v52, %v339_v51  ;;  %v871_v48 = vld [vmem:[#allocation5 + $0x9d8] sm:$0xff] }
 0x121   :  { %1853 = vst [vmem:[#allocation7 + $0x888] sm:$0xff] %v1341_v57  ;;  %v341_v57 = vld [vmem:[#allocation2 + $0x948] sm:$0xff]  ;;  %v1364_v62 = vadd.f32 %v852_v55, %v340_v54  ;;  %v872_v51 = vld [vmem:[#allocation5 + $0x9e0] sm:$0xff] }
 0x122   :  { %1854 = vst [vmem:[#allocation7 + $0x890] sm:$0xff] %v1342_v60  ;;  %v342_v60 = vld [vmem:[#allocation2 + $0x950] sm:$0xff]  ;;  %v1365_v1 = vadd.f32 %v853_v58, %v341_v57  ;;  %v873_v54 = vld [vmem:[#allocation5 + $0x9e8] sm:$0xff] }
 0x123   :  { %1855 = vst [vmem:[#allocation7 + $0x898] sm:$0xff] %v1343_v63  ;;  %v343_v63 = vld [vmem:[#allocation2 + $0x958] sm:$0xff]  ;;  %v1366_v4 = vadd.f32 %v854_v61, %v342_v60  ;;  %v874_v57 = vld [vmem:[#allocation5 + $0x9f0] sm:$0xff] }
 0x124   :  { %1856 = vst [vmem:[#allocation7 + $0x8a0] sm:$0xff] %v1344_v2  ;;  %v344_v2 = vld [vmem:[#allocation2 + $0x960] sm:$0xff]  ;;  %v1367_v7 = vadd.f32 %v855_v0, %v343_v63  ;;  %v875_v60 = vld [vmem:[#allocation5 + $0x9f8] sm:$0xff] }
 0x125   :  { %1857 = vst [vmem:[#allocation7 + $0x8a8] sm:$0xff] %v1345_v5  ;;  %v345_v5 = vld [vmem:[#allocation2 + $0x968] sm:$0xff]  ;;  %v1368_v10 = vadd.f32 %v856_v3, %v344_v2  ;;  %v876_v63 = vld [vmem:[#allocation5 + $0xa00] sm:$0xff] }
 0x126   :  { %1858 = vst [vmem:[#allocation7 + $0x8b0] sm:$0xff] %v1346_v8  ;;  %v346_v8 = vld [vmem:[#allocation2 + $0x970] sm:$0xff]  ;;  %v1369_v13 = vadd.f32 %v857_v6, %v345_v5  ;;  %v877_v2 = vld [vmem:[#allocation5 + $0xa08] sm:$0xff] }
 0x127   :  { %1859 = vst [vmem:[#allocation7 + $0x8b8] sm:$0xff] %v1347_v11  ;;  %v347_v11 = vld [vmem:[#allocation2 + $0x978] sm:$0xff]  ;;  %v1370_v16 = vadd.f32 %v858_v9, %v346_v8  ;;  %v878_v5 = vld [vmem:[#allocation5 + $0xa10] sm:$0xff] }
 0x128   :  { %1860 = vst [vmem:[#allocation7 + $0x8c0] sm:$0xff] %v1348_v14  ;;  %v348_v14 = vld [vmem:[#allocation2 + $0x980] sm:$0xff]  ;;  %v1371_v19 = vadd.f32 %v859_v12, %v347_v11  ;;  %v879_v8 = vld [vmem:[#allocation5 + $0xa18] sm:$0xff] }
 0x129   :  { %1861 = vst [vmem:[#allocation7 + $0x8c8] sm:$0xff] %v1349_v17  ;;  %v349_v17 = vld [vmem:[#allocation2 + $0x988] sm:$0xff]  ;;  %v1372_v22 = vadd.f32 %v860_v15, %v348_v14  ;;  %v880_v11 = vld [vmem:[#allocation5 + $0xa20] sm:$0xff] }
 0x12a   :  { %1862 = vst [vmem:[#allocation7 + $0x8d0] sm:$0xff] %v1350_v20  ;;  %v350_v20 = vld [vmem:[#allocation2 + $0x990] sm:$0xff]  ;;  %v1373_v25 = vadd.f32 %v861_v18, %v349_v17  ;;  %v881_v14 = vld [vmem:[#allocation5 + $0xa28] sm:$0xff] }
 0x12b   :  { %1863 = vst [vmem:[#allocation7 + $0x8d8] sm:$0xff] %v1351_v23  ;;  %v351_v23 = vld [vmem:[#allocation2 + $0x998] sm:$0xff]  ;;  %v1374_v28 = vadd.f32 %v862_v21, %v350_v20  ;;  %v882_v17 = vld [vmem:[#allocation5 + $0xa30] sm:$0xff] }
 0x12c   :  { %1864 = vst [vmem:[#allocation7 + $0x8e0] sm:$0xff] %v1352_v26  ;;  %v352_v26 = vld [vmem:[#allocation2 + $0x9a0] sm:$0xff]  ;;  %v1375_v31 = vadd.f32 %v863_v24, %v351_v23  ;;  %v883_v20 = vld [vmem:[#allocation5 + $0xa38] sm:$0xff] }
 0x12d   :  { %1865 = vst [vmem:[#allocation7 + $0x8e8] sm:$0xff] %v1353_v29  ;;  %v353_v29 = vld [vmem:[#allocation2 + $0x9a8] sm:$0xff]  ;;  %v1376_v34 = vadd.f32 %v864_v27, %v352_v26  ;;  %v884_v23 = vld [vmem:[#allocation5 + $0xa40] sm:$0xff] }
 0x12e   :  { %1866 = vst [vmem:[#allocation7 + $0x8f0] sm:$0xff] %v1354_v32  ;;  %v354_v32 = vld [vmem:[#allocation2 + $0x9b0] sm:$0xff]  ;;  %v1377_v37 = vadd.f32 %v865_v30, %v353_v29  ;;  %v885_v26 = vld [vmem:[#allocation5 + $0xa48] sm:$0xff] }
 0x12f   :  { %1867 = vst [vmem:[#allocation7 + $0x8f8] sm:$0xff] %v1355_v35  ;;  %v355_v35 = vld [vmem:[#allocation2 + $0x9b8] sm:$0xff]  ;;  %v1378_v40 = vadd.f32 %v866_v33, %v354_v32  ;;  %v886_v29 = vld [vmem:[#allocation5 + $0xa50] sm:$0xff] }
 0x130   :  { %1868 = vst [vmem:[#allocation7 + $0x900] sm:$0xff] %v1356_v38  ;;  %v356_v38 = vld [vmem:[#allocation2 + $0x9c0] sm:$0xff]  ;;  %v1379_v43 = vadd.f32 %v867_v36, %v355_v35  ;;  %v887_v32 = vld [vmem:[#allocation5 + $0xa58] sm:$0xff] }
 0x131   :  { %1869 = vst [vmem:[#allocation7 + $0x908] sm:$0xff] %v1357_v41  ;;  %v357_v41 = vld [vmem:[#allocation2 + $0x9c8] sm:$0xff]  ;;  %v1380_v46 = vadd.f32 %v868_v39, %v356_v38  ;;  %v888_v35 = vld [vmem:[#allocation5 + $0xa60] sm:$0xff] }
 0x132   :  { %1870 = vst [vmem:[#allocation7 + $0x910] sm:$0xff] %v1358_v44  ;;  %v358_v44 = vld [vmem:[#allocation2 + $0x9d0] sm:$0xff]  ;;  %v1381_v49 = vadd.f32 %v869_v42, %v357_v41  ;;  %v889_v38 = vld [vmem:[#allocation5 + $0xa68] sm:$0xff] }
 0x133   :  { %1871 = vst [vmem:[#allocation7 + $0x918] sm:$0xff] %v1359_v47  ;;  %v359_v47 = vld [vmem:[#allocation2 + $0x9d8] sm:$0xff]  ;;  %v1382_v52 = vadd.f32 %v870_v45, %v358_v44  ;;  %v890_v41 = vld [vmem:[#allocation5 + $0xa70] sm:$0xff] }
 0x134   :  { %1872 = vst [vmem:[#allocation7 + $0x920] sm:$0xff] %v1360_v50  ;;  %v360_v50 = vld [vmem:[#allocation2 + $0x9e0] sm:$0xff]  ;;  %v1383_v55 = vadd.f32 %v871_v48, %v359_v47  ;;  %v891_v44 = vld [vmem:[#allocation5 + $0xa78] sm:$0xff] }
 0x135   :  { %1873 = vst [vmem:[#allocation7 + $0x928] sm:$0xff] %v1361_v53  ;;  %v361_v53 = vld [vmem:[#allocation2 + $0x9e8] sm:$0xff]  ;;  %v1384_v58 = vadd.f32 %v872_v51, %v360_v50  ;;  %v892_v47 = vld [vmem:[#allocation5 + $0xa80] sm:$0xff] }
 0x136   :  { %1874 = vst [vmem:[#allocation7 + $0x930] sm:$0xff] %v1362_v56  ;;  %v362_v56 = vld [vmem:[#allocation2 + $0x9f0] sm:$0xff]  ;;  %v1385_v61 = vadd.f32 %v873_v54, %v361_v53  ;;  %v893_v50 = vld [vmem:[#allocation5 + $0xa88] sm:$0xff] }
 0x137   :  { %1875 = vst [vmem:[#allocation7 + $0x938] sm:$0xff] %v1363_v59  ;;  %v363_v59 = vld [vmem:[#allocation2 + $0x9f8] sm:$0xff]  ;;  %v1386_v0 = vadd.f32 %v874_v57, %v362_v56  ;;  %v894_v53 = vld [vmem:[#allocation5 + $0xa90] sm:$0xff] }
 0x138   :  { %1876 = vst [vmem:[#allocation7 + $0x940] sm:$0xff] %v1364_v62  ;;  %v364_v62 = vld [vmem:[#allocation2 + $0xa00] sm:$0xff]  ;;  %v1387_v3 = vadd.f32 %v875_v60, %v363_v59  ;;  %v895_v56 = vld [vmem:[#allocation5 + $0xa98] sm:$0xff] }
 0x139   :  { %1877 = vst [vmem:[#allocation7 + $0x948] sm:$0xff] %v1365_v1  ;;  %v365_v1 = vld [vmem:[#allocation2 + $0xa08] sm:$0xff]  ;;  %v1388_v6 = vadd.f32 %v876_v63, %v364_v62  ;;  %v896_v59 = vld [vmem:[#allocation5 + $0xaa0] sm:$0xff] }
 0x13a   :  { %1878 = vst [vmem:[#allocation7 + $0x950] sm:$0xff] %v1366_v4  ;;  %v366_v4 = vld [vmem:[#allocation2 + $0xa10] sm:$0xff]  ;;  %v1389_v9 = vadd.f32 %v877_v2, %v365_v1  ;;  %v897_v62 = vld [vmem:[#allocation5 + $0xaa8] sm:$0xff] }
 0x13b   :  { %1879 = vst [vmem:[#allocation7 + $0x958] sm:$0xff] %v1367_v7  ;;  %v367_v7 = vld [vmem:[#allocation2 + $0xa18] sm:$0xff]  ;;  %v1390_v12 = vadd.f32 %v878_v5, %v366_v4  ;;  %v898_v1 = vld [vmem:[#allocation5 + $0xab0] sm:$0xff] }
 0x13c   :  { %1880 = vst [vmem:[#allocation7 + $0x960] sm:$0xff] %v1368_v10  ;;  %v368_v10 = vld [vmem:[#allocation2 + $0xa20] sm:$0xff]  ;;  %v1391_v15 = vadd.f32 %v879_v8, %v367_v7  ;;  %v899_v4 = vld [vmem:[#allocation5 + $0xab8] sm:$0xff] }
 0x13d   :  { %1881 = vst [vmem:[#allocation7 + $0x968] sm:$0xff] %v1369_v13  ;;  %v369_v13 = vld [vmem:[#allocation2 + $0xa28] sm:$0xff]  ;;  %v1392_v18 = vadd.f32 %v880_v11, %v368_v10  ;;  %v900_v7 = vld [vmem:[#allocation5 + $0xac0] sm:$0xff] }
 0x13e   :  { %1882 = vst [vmem:[#allocation7 + $0x970] sm:$0xff] %v1370_v16  ;;  %v370_v16 = vld [vmem:[#allocation2 + $0xa30] sm:$0xff]  ;;  %v1393_v21 = vadd.f32 %v881_v14, %v369_v13  ;;  %v901_v10 = vld [vmem:[#allocation5 + $0xac8] sm:$0xff] }
 0x13f   :  { %1883 = vst [vmem:[#allocation7 + $0x978] sm:$0xff] %v1371_v19  ;;  %v371_v19 = vld [vmem:[#allocation2 + $0xa38] sm:$0xff]  ;;  %v1394_v24 = vadd.f32 %v882_v17, %v370_v16  ;;  %v902_v13 = vld [vmem:[#allocation5 + $0xad0] sm:$0xff] }
 0x140   :  { %1884 = vst [vmem:[#allocation7 + $0x980] sm:$0xff] %v1372_v22  ;;  %v372_v22 = vld [vmem:[#allocation2 + $0xa40] sm:$0xff]  ;;  %v1395_v27 = vadd.f32 %v883_v20, %v371_v19  ;;  %v903_v16 = vld [vmem:[#allocation5 + $0xad8] sm:$0xff] }
 0x141   :  { %1885 = vst [vmem:[#allocation7 + $0x988] sm:$0xff] %v1373_v25  ;;  %v373_v25 = vld [vmem:[#allocation2 + $0xa48] sm:$0xff]  ;;  %v1396_v30 = vadd.f32 %v884_v23, %v372_v22  ;;  %v904_v19 = vld [vmem:[#allocation5 + $0xae0] sm:$0xff] }
 0x142   :  { %1886 = vst [vmem:[#allocation7 + $0x990] sm:$0xff] %v1374_v28  ;;  %v374_v28 = vld [vmem:[#allocation2 + $0xa50] sm:$0xff]  ;;  %v1397_v33 = vadd.f32 %v885_v26, %v373_v25  ;;  %v905_v22 = vld [vmem:[#allocation5 + $0xae8] sm:$0xff] }
 0x143   :  { %1887 = vst [vmem:[#allocation7 + $0x998] sm:$0xff] %v1375_v31  ;;  %v375_v31 = vld [vmem:[#allocation2 + $0xa58] sm:$0xff]  ;;  %v1398_v36 = vadd.f32 %v886_v29, %v374_v28  ;;  %v906_v25 = vld [vmem:[#allocation5 + $0xaf0] sm:$0xff] }
 0x144   :  { %1888 = vst [vmem:[#allocation7 + $0x9a0] sm:$0xff] %v1376_v34  ;;  %v376_v34 = vld [vmem:[#allocation2 + $0xa60] sm:$0xff]  ;;  %v1399_v39 = vadd.f32 %v887_v32, %v375_v31  ;;  %v907_v28 = vld [vmem:[#allocation5 + $0xaf8] sm:$0xff] }
 0x145   :  { %1889 = vst [vmem:[#allocation7 + $0x9a8] sm:$0xff] %v1377_v37  ;;  %v377_v37 = vld [vmem:[#allocation2 + $0xa68] sm:$0xff]  ;;  %v1400_v42 = vadd.f32 %v888_v35, %v376_v34  ;;  %v908_v31 = vld [vmem:[#allocation5 + $0xb00] sm:$0xff] }
 0x146   :  { %1890 = vst [vmem:[#allocation7 + $0x9b0] sm:$0xff] %v1378_v40  ;;  %v378_v40 = vld [vmem:[#allocation2 + $0xa70] sm:$0xff]  ;;  %v1401_v45 = vadd.f32 %v889_v38, %v377_v37  ;;  %v909_v34 = vld [vmem:[#allocation5 + $0xb08] sm:$0xff] }
 0x147   :  { %1891 = vst [vmem:[#allocation7 + $0x9b8] sm:$0xff] %v1379_v43  ;;  %v379_v43 = vld [vmem:[#allocation2 + $0xa78] sm:$0xff]  ;;  %v1402_v48 = vadd.f32 %v890_v41, %v378_v40  ;;  %v910_v37 = vld [vmem:[#allocation5 + $0xb10] sm:$0xff] }
 0x148   :  { %1892 = vst [vmem:[#allocation7 + $0x9c0] sm:$0xff] %v1380_v46  ;;  %v380_v46 = vld [vmem:[#allocation2 + $0xa80] sm:$0xff]  ;;  %v1403_v51 = vadd.f32 %v891_v44, %v379_v43  ;;  %v911_v40 = vld [vmem:[#allocation5 + $0xb18] sm:$0xff] }
 0x149   :  { %1893 = vst [vmem:[#allocation7 + $0x9c8] sm:$0xff] %v1381_v49  ;;  %v381_v49 = vld [vmem:[#allocation2 + $0xa88] sm:$0xff]  ;;  %v1404_v54 = vadd.f32 %v892_v47, %v380_v46  ;;  %v912_v43 = vld [vmem:[#allocation5 + $0xb20] sm:$0xff] }
 0x14a   :  { %1894 = vst [vmem:[#allocation7 + $0x9d0] sm:$0xff] %v1382_v52  ;;  %v382_v52 = vld [vmem:[#allocation2 + $0xa90] sm:$0xff]  ;;  %v1405_v57 = vadd.f32 %v893_v50, %v381_v49  ;;  %v913_v46 = vld [vmem:[#allocation5 + $0xb28] sm:$0xff] }
 0x14b   :  { %1895 = vst [vmem:[#allocation7 + $0x9d8] sm:$0xff] %v1383_v55  ;;  %v383_v55 = vld [vmem:[#allocation2 + $0xa98] sm:$0xff]  ;;  %v1406_v60 = vadd.f32 %v894_v53, %v382_v52  ;;  %v914_v49 = vld [vmem:[#allocation5 + $0xb30] sm:$0xff] }
 0x14c   :  { %1896 = vst [vmem:[#allocation7 + $0x9e0] sm:$0xff] %v1384_v58  ;;  %v384_v58 = vld [vmem:[#allocation2 + $0xaa0] sm:$0xff]  ;;  %v1407_v63 = vadd.f32 %v895_v56, %v383_v55  ;;  %v915_v52 = vld [vmem:[#allocation5 + $0xb38] sm:$0xff] }
 0x14d   :  { %1897 = vst [vmem:[#allocation7 + $0x9e8] sm:$0xff] %v1385_v61  ;;  %v385_v61 = vld [vmem:[#allocation2 + $0xaa8] sm:$0xff]  ;;  %v1408_v2 = vadd.f32 %v896_v59, %v384_v58  ;;  %v916_v55 = vld [vmem:[#allocation5 + $0xb40] sm:$0xff] }
 0x14e   :  { %1898 = vst [vmem:[#allocation7 + $0x9f0] sm:$0xff] %v1386_v0  ;;  %v386_v0 = vld [vmem:[#allocation2 + $0xab0] sm:$0xff]  ;;  %v1409_v5 = vadd.f32 %v897_v62, %v385_v61  ;;  %v917_v58 = vld [vmem:[#allocation5 + $0xb48] sm:$0xff] }
 0x14f   :  { %1899 = vst [vmem:[#allocation7 + $0x9f8] sm:$0xff] %v1387_v3  ;;  %v387_v3 = vld [vmem:[#allocation2 + $0xab8] sm:$0xff]  ;;  %v1410_v8 = vadd.f32 %v898_v1, %v386_v0  ;;  %v918_v61 = vld [vmem:[#allocation5 + $0xb50] sm:$0xff] }
 0x150   :  { %1900 = vst [vmem:[#allocation7 + $0xa00] sm:$0xff] %v1388_v6  ;;  %v388_v6 = vld [vmem:[#allocation2 + $0xac0] sm:$0xff]  ;;  %v1411_v11 = vadd.f32 %v899_v4, %v387_v3  ;;  %v919_v0 = vld [vmem:[#allocation5 + $0xb58] sm:$0xff] }
 0x151   :  { %1901 = vst [vmem:[#allocation7 + $0xa08] sm:$0xff] %v1389_v9  ;;  %v389_v9 = vld [vmem:[#allocation2 + $0xac8] sm:$0xff]  ;;  %v1412_v14 = vadd.f32 %v900_v7, %v388_v6  ;;  %v920_v3 = vld [vmem:[#allocation5 + $0xb60] sm:$0xff] }
 0x152   :  { %1902 = vst [vmem:[#allocation7 + $0xa10] sm:$0xff] %v1390_v12  ;;  %v390_v12 = vld [vmem:[#allocation2 + $0xad0] sm:$0xff]  ;;  %v1413_v17 = vadd.f32 %v901_v10, %v389_v9  ;;  %v921_v6 = vld [vmem:[#allocation5 + $0xb68] sm:$0xff] }
 0x153   :  { %1903 = vst [vmem:[#allocation7 + $0xa18] sm:$0xff] %v1391_v15  ;;  %v391_v15 = vld [vmem:[#allocation2 + $0xad8] sm:$0xff]  ;;  %v1414_v20 = vadd.f32 %v902_v13, %v390_v12  ;;  %v922_v9 = vld [vmem:[#allocation5 + $0xb70] sm:$0xff] }
 0x154   :  { %1904 = vst [vmem:[#allocation7 + $0xa20] sm:$0xff] %v1392_v18  ;;  %v392_v18 = vld [vmem:[#allocation2 + $0xae0] sm:$0xff]  ;;  %v1415_v23 = vadd.f32 %v903_v16, %v391_v15  ;;  %v923_v12 = vld [vmem:[#allocation5 + $0xb78] sm:$0xff] }
 0x155   :  { %1905 = vst [vmem:[#allocation7 + $0xa28] sm:$0xff] %v1393_v21  ;;  %v393_v21 = vld [vmem:[#allocation2 + $0xae8] sm:$0xff]  ;;  %v1416_v26 = vadd.f32 %v904_v19, %v392_v18  ;;  %v924_v15 = vld [vmem:[#allocation5 + $0xb80] sm:$0xff] }
 0x156   :  { %1906 = vst [vmem:[#allocation7 + $0xa30] sm:$0xff] %v1394_v24  ;;  %v394_v24 = vld [vmem:[#allocation2 + $0xaf0] sm:$0xff]  ;;  %v1417_v29 = vadd.f32 %v905_v22, %v393_v21  ;;  %v925_v18 = vld [vmem:[#allocation5 + $0xb88] sm:$0xff] }
 0x157   :  { %1907 = vst [vmem:[#allocation7 + $0xa38] sm:$0xff] %v1395_v27  ;;  %v395_v27 = vld [vmem:[#allocation2 + $0xaf8] sm:$0xff]  ;;  %v1418_v32 = vadd.f32 %v906_v25, %v394_v24  ;;  %v926_v21 = vld [vmem:[#allocation5 + $0xb90] sm:$0xff] }
 0x158   :  { %1908 = vst [vmem:[#allocation7 + $0xa40] sm:$0xff] %v1396_v30  ;;  %v396_v30 = vld [vmem:[#allocation2 + $0xb00] sm:$0xff]  ;;  %v1419_v35 = vadd.f32 %v907_v28, %v395_v27  ;;  %v927_v24 = vld [vmem:[#allocation5 + $0xb98] sm:$0xff] }
 0x159   :  { %1909 = vst [vmem:[#allocation7 + $0xa48] sm:$0xff] %v1397_v33  ;;  %v397_v33 = vld [vmem:[#allocation2 + $0xb08] sm:$0xff]  ;;  %v1420_v38 = vadd.f32 %v908_v31, %v396_v30  ;;  %v928_v27 = vld [vmem:[#allocation5 + $0xba0] sm:$0xff] }
 0x15a   :  { %1910 = vst [vmem:[#allocation7 + $0xa50] sm:$0xff] %v1398_v36  ;;  %v398_v36 = vld [vmem:[#allocation2 + $0xb10] sm:$0xff]  ;;  %v1421_v41 = vadd.f32 %v909_v34, %v397_v33  ;;  %v929_v30 = vld [vmem:[#allocation5 + $0xba8] sm:$0xff] }
 0x15b   :  { %1911 = vst [vmem:[#allocation7 + $0xa58] sm:$0xff] %v1399_v39  ;;  %v399_v39 = vld [vmem:[#allocation2 + $0xb18] sm:$0xff]  ;;  %v1422_v44 = vadd.f32 %v910_v37, %v398_v36  ;;  %v930_v33 = vld [vmem:[#allocation5 + $0xbb0] sm:$0xff] }
 0x15c   :  { %1912 = vst [vmem:[#allocation7 + $0xa60] sm:$0xff] %v1400_v42  ;;  %v400_v42 = vld [vmem:[#allocation2 + $0xb20] sm:$0xff]  ;;  %v1423_v47 = vadd.f32 %v911_v40, %v399_v39  ;;  %v931_v36 = vld [vmem:[#allocation5 + $0xbb8] sm:$0xff] }
 0x15d   :  { %1913 = vst [vmem:[#allocation7 + $0xa68] sm:$0xff] %v1401_v45  ;;  %v401_v45 = vld [vmem:[#allocation2 + $0xb28] sm:$0xff]  ;;  %v1424_v50 = vadd.f32 %v912_v43, %v400_v42  ;;  %v932_v39 = vld [vmem:[#allocation5 + $0xbc0] sm:$0xff] }
 0x15e   :  { %1914 = vst [vmem:[#allocation7 + $0xa70] sm:$0xff] %v1402_v48  ;;  %v402_v48 = vld [vmem:[#allocation2 + $0xb30] sm:$0xff]  ;;  %v1425_v53 = vadd.f32 %v913_v46, %v401_v45  ;;  %v933_v42 = vld [vmem:[#allocation5 + $0xbc8] sm:$0xff] }
 0x15f   :  { %1915 = vst [vmem:[#allocation7 + $0xa78] sm:$0xff] %v1403_v51  ;;  %v403_v51 = vld [vmem:[#allocation2 + $0xb38] sm:$0xff]  ;;  %v1426_v56 = vadd.f32 %v914_v49, %v402_v48  ;;  %v934_v45 = vld [vmem:[#allocation5 + $0xbd0] sm:$0xff] }
 0x160   :  { %1916 = vst [vmem:[#allocation7 + $0xa80] sm:$0xff] %v1404_v54  ;;  %v404_v54 = vld [vmem:[#allocation2 + $0xb40] sm:$0xff]  ;;  %v1427_v59 = vadd.f32 %v915_v52, %v403_v51  ;;  %v935_v48 = vld [vmem:[#allocation5 + $0xbd8] sm:$0xff] }
 0x161   :  { %1917 = vst [vmem:[#allocation7 + $0xa88] sm:$0xff] %v1405_v57  ;;  %v405_v57 = vld [vmem:[#allocation2 + $0xb48] sm:$0xff]  ;;  %v1428_v62 = vadd.f32 %v916_v55, %v404_v54  ;;  %v936_v51 = vld [vmem:[#allocation5 + $0xbe0] sm:$0xff] }
 0x162   :  { %1918 = vst [vmem:[#allocation7 + $0xa90] sm:$0xff] %v1406_v60  ;;  %v406_v60 = vld [vmem:[#allocation2 + $0xb50] sm:$0xff]  ;;  %v1429_v1 = vadd.f32 %v917_v58, %v405_v57  ;;  %v937_v54 = vld [vmem:[#allocation5 + $0xbe8] sm:$0xff] }
 0x163   :  { %1919 = vst [vmem:[#allocation7 + $0xa98] sm:$0xff] %v1407_v63  ;;  %v407_v63 = vld [vmem:[#allocation2 + $0xb58] sm:$0xff]  ;;  %v1430_v4 = vadd.f32 %v918_v61, %v406_v60  ;;  %v938_v57 = vld [vmem:[#allocation5 + $0xbf0] sm:$0xff] }
 0x164   :  { %1920 = vst [vmem:[#allocation7 + $0xaa0] sm:$0xff] %v1408_v2  ;;  %v408_v2 = vld [vmem:[#allocation2 + $0xb60] sm:$0xff]  ;;  %v1431_v7 = vadd.f32 %v919_v0, %v407_v63  ;;  %v939_v60 = vld [vmem:[#allocation5 + $0xbf8] sm:$0xff] }
 0x165   :  { %1921 = vst [vmem:[#allocation7 + $0xaa8] sm:$0xff] %v1409_v5  ;;  %v409_v5 = vld [vmem:[#allocation2 + $0xb68] sm:$0xff]  ;;  %v1432_v10 = vadd.f32 %v920_v3, %v408_v2  ;;  %v940_v63 = vld [vmem:[#allocation5 + $0xc00] sm:$0xff] }
 0x166   :  { %1922 = vst [vmem:[#allocation7 + $0xab0] sm:$0xff] %v1410_v8  ;;  %v410_v8 = vld [vmem:[#allocation2 + $0xb70] sm:$0xff]  ;;  %v1433_v13 = vadd.f32 %v921_v6, %v409_v5  ;;  %v941_v2 = vld [vmem:[#allocation5 + $0xc08] sm:$0xff] }
 0x167   :  { %1923 = vst [vmem:[#allocation7 + $0xab8] sm:$0xff] %v1411_v11  ;;  %v411_v11 = vld [vmem:[#allocation2 + $0xb78] sm:$0xff]  ;;  %v1434_v16 = vadd.f32 %v922_v9, %v410_v8  ;;  %v942_v5 = vld [vmem:[#allocation5 + $0xc10] sm:$0xff] }
 0x168   :  { %1924 = vst [vmem:[#allocation7 + $0xac0] sm:$0xff] %v1412_v14  ;;  %v412_v14 = vld [vmem:[#allocation2 + $0xb80] sm:$0xff]  ;;  %v1435_v19 = vadd.f32 %v923_v12, %v411_v11  ;;  %v943_v8 = vld [vmem:[#allocation5 + $0xc18] sm:$0xff] }
 0x169   :  { %1925 = vst [vmem:[#allocation7 + $0xac8] sm:$0xff] %v1413_v17  ;;  %v413_v17 = vld [vmem:[#allocation2 + $0xb88] sm:$0xff]  ;;  %v1436_v22 = vadd.f32 %v924_v15, %v412_v14  ;;  %v944_v11 = vld [vmem:[#allocation5 + $0xc20] sm:$0xff] }
 0x16a   :  { %1926 = vst [vmem:[#allocation7 + $0xad0] sm:$0xff] %v1414_v20  ;;  %v414_v20 = vld [vmem:[#allocation2 + $0xb90] sm:$0xff]  ;;  %v1437_v25 = vadd.f32 %v925_v18, %v413_v17  ;;  %v945_v14 = vld [vmem:[#allocation5 + $0xc28] sm:$0xff] }
 0x16b   :  { %1927 = vst [vmem:[#allocation7 + $0xad8] sm:$0xff] %v1415_v23  ;;  %v415_v23 = vld [vmem:[#allocation2 + $0xb98] sm:$0xff]  ;;  %v1438_v28 = vadd.f32 %v926_v21, %v414_v20  ;;  %v946_v17 = vld [vmem:[#allocation5 + $0xc30] sm:$0xff] }
 0x16c   :  { %1928 = vst [vmem:[#allocation7 + $0xae0] sm:$0xff] %v1416_v26  ;;  %v416_v26 = vld [vmem:[#allocation2 + $0xba0] sm:$0xff]  ;;  %v1439_v31 = vadd.f32 %v927_v24, %v415_v23  ;;  %v947_v20 = vld [vmem:[#allocation5 + $0xc38] sm:$0xff] }
 0x16d   :  { %1929 = vst [vmem:[#allocation7 + $0xae8] sm:$0xff] %v1417_v29  ;;  %v417_v29 = vld [vmem:[#allocation2 + $0xba8] sm:$0xff]  ;;  %v1440_v34 = vadd.f32 %v928_v27, %v416_v26  ;;  %v948_v23 = vld [vmem:[#allocation5 + $0xc40] sm:$0xff] }
 0x16e   :  { %1930 = vst [vmem:[#allocation7 + $0xaf0] sm:$0xff] %v1418_v32  ;;  %v418_v32 = vld [vmem:[#allocation2 + $0xbb0] sm:$0xff]  ;;  %v1441_v37 = vadd.f32 %v929_v30, %v417_v29  ;;  %v949_v26 = vld [vmem:[#allocation5 + $0xc48] sm:$0xff] }
 0x16f   :  { %1931 = vst [vmem:[#allocation7 + $0xaf8] sm:$0xff] %v1419_v35  ;;  %v419_v35 = vld [vmem:[#allocation2 + $0xbb8] sm:$0xff]  ;;  %v1442_v40 = vadd.f32 %v930_v33, %v418_v32  ;;  %v950_v29 = vld [vmem:[#allocation5 + $0xc50] sm:$0xff] }
 0x170   :  { %1932 = vst [vmem:[#allocation7 + $0xb00] sm:$0xff] %v1420_v38  ;;  %v420_v38 = vld [vmem:[#allocation2 + $0xbc0] sm:$0xff]  ;;  %v1443_v43 = vadd.f32 %v931_v36, %v419_v35  ;;  %v951_v32 = vld [vmem:[#allocation5 + $0xc58] sm:$0xff] }
 0x171   :  { %1933 = vst [vmem:[#allocation7 + $0xb08] sm:$0xff] %v1421_v41  ;;  %v421_v41 = vld [vmem:[#allocation2 + $0xbc8] sm:$0xff]  ;;  %v1444_v46 = vadd.f32 %v932_v39, %v420_v38  ;;  %v952_v35 = vld [vmem:[#allocation5 + $0xc60] sm:$0xff] }
 0x172   :  { %1934 = vst [vmem:[#allocation7 + $0xb10] sm:$0xff] %v1422_v44  ;;  %v422_v44 = vld [vmem:[#allocation2 + $0xbd0] sm:$0xff]  ;;  %v1445_v49 = vadd.f32 %v933_v42, %v421_v41  ;;  %v953_v38 = vld [vmem:[#allocation5 + $0xc68] sm:$0xff] }
 0x173   :  { %1935 = vst [vmem:[#allocation7 + $0xb18] sm:$0xff] %v1423_v47  ;;  %v423_v47 = vld [vmem:[#allocation2 + $0xbd8] sm:$0xff]  ;;  %v1446_v52 = vadd.f32 %v934_v45, %v422_v44  ;;  %v954_v41 = vld [vmem:[#allocation5 + $0xc70] sm:$0xff] }
 0x174   :  { %1936 = vst [vmem:[#allocation7 + $0xb20] sm:$0xff] %v1424_v50  ;;  %v424_v50 = vld [vmem:[#allocation2 + $0xbe0] sm:$0xff]  ;;  %v1447_v55 = vadd.f32 %v935_v48, %v423_v47  ;;  %v955_v44 = vld [vmem:[#allocation5 + $0xc78] sm:$0xff] }
 0x175   :  { %1937 = vst [vmem:[#allocation7 + $0xb28] sm:$0xff] %v1425_v53  ;;  %v425_v53 = vld [vmem:[#allocation2 + $0xbe8] sm:$0xff]  ;;  %v1448_v58 = vadd.f32 %v936_v51, %v424_v50  ;;  %v956_v47 = vld [vmem:[#allocation5 + $0xc80] sm:$0xff] }
 0x176   :  { %1938 = vst [vmem:[#allocation7 + $0xb30] sm:$0xff] %v1426_v56  ;;  %v426_v56 = vld [vmem:[#allocation2 + $0xbf0] sm:$0xff]  ;;  %v1449_v61 = vadd.f32 %v937_v54, %v425_v53  ;;  %v957_v50 = vld [vmem:[#allocation5 + $0xc88] sm:$0xff] }
 0x177   :  { %1939 = vst [vmem:[#allocation7 + $0xb38] sm:$0xff] %v1427_v59  ;;  %v427_v59 = vld [vmem:[#allocation2 + $0xbf8] sm:$0xff]  ;;  %v1450_v0 = vadd.f32 %v938_v57, %v426_v56  ;;  %v958_v53 = vld [vmem:[#allocation5 + $0xc90] sm:$0xff] }
 0x178   :  { %1940 = vst [vmem:[#allocation7 + $0xb40] sm:$0xff] %v1428_v62  ;;  %v428_v62 = vld [vmem:[#allocation2 + $0xc00] sm:$0xff]  ;;  %v1451_v3 = vadd.f32 %v939_v60, %v427_v59  ;;  %v959_v56 = vld [vmem:[#allocation5 + $0xc98] sm:$0xff] }
 0x179   :  { %1941 = vst [vmem:[#allocation7 + $0xb48] sm:$0xff] %v1429_v1  ;;  %v429_v1 = vld [vmem:[#allocation2 + $0xc08] sm:$0xff]  ;;  %v1452_v6 = vadd.f32 %v940_v63, %v428_v62  ;;  %v960_v59 = vld [vmem:[#allocation5 + $0xca0] sm:$0xff] }
 0x17a   :  { %1942 = vst [vmem:[#allocation7 + $0xb50] sm:$0xff] %v1430_v4  ;;  %v430_v4 = vld [vmem:[#allocation2 + $0xc10] sm:$0xff]  ;;  %v1453_v9 = vadd.f32 %v941_v2, %v429_v1  ;;  %v961_v62 = vld [vmem:[#allocation5 + $0xca8] sm:$0xff] }
 0x17b   :  { %1943 = vst [vmem:[#allocation7 + $0xb58] sm:$0xff] %v1431_v7  ;;  %v431_v7 = vld [vmem:[#allocation2 + $0xc18] sm:$0xff]  ;;  %v1454_v12 = vadd.f32 %v942_v5, %v430_v4  ;;  %v962_v1 = vld [vmem:[#allocation5 + $0xcb0] sm:$0xff] }
 0x17c   :  { %1944 = vst [vmem:[#allocation7 + $0xb60] sm:$0xff] %v1432_v10  ;;  %v432_v10 = vld [vmem:[#allocation2 + $0xc20] sm:$0xff]  ;;  %v1455_v15 = vadd.f32 %v943_v8, %v431_v7  ;;  %v963_v4 = vld [vmem:[#allocation5 + $0xcb8] sm:$0xff] }
 0x17d   :  { %1945 = vst [vmem:[#allocation7 + $0xb68] sm:$0xff] %v1433_v13  ;;  %v433_v13 = vld [vmem:[#allocation2 + $0xc28] sm:$0xff]  ;;  %v1456_v18 = vadd.f32 %v944_v11, %v432_v10  ;;  %v964_v7 = vld [vmem:[#allocation5 + $0xcc0] sm:$0xff] }
 0x17e   :  { %1946 = vst [vmem:[#allocation7 + $0xb70] sm:$0xff] %v1434_v16  ;;  %v434_v16 = vld [vmem:[#allocation2 + $0xc30] sm:$0xff]  ;;  %v1457_v21 = vadd.f32 %v945_v14, %v433_v13  ;;  %v965_v10 = vld [vmem:[#allocation5 + $0xcc8] sm:$0xff] }
 0x17f   :  { %1947 = vst [vmem:[#allocation7 + $0xb78] sm:$0xff] %v1435_v19  ;;  %v435_v19 = vld [vmem:[#allocation2 + $0xc38] sm:$0xff]  ;;  %v1458_v24 = vadd.f32 %v946_v17, %v434_v16  ;;  %v966_v13 = vld [vmem:[#allocation5 + $0xcd0] sm:$0xff] }
 0x180   :  { %1948 = vst [vmem:[#allocation7 + $0xb80] sm:$0xff] %v1436_v22  ;;  %v436_v22 = vld [vmem:[#allocation2 + $0xc40] sm:$0xff]  ;;  %v1459_v27 = vadd.f32 %v947_v20, %v435_v19  ;;  %v967_v16 = vld [vmem:[#allocation5 + $0xcd8] sm:$0xff] }
 0x181   :  { %1949 = vst [vmem:[#allocation7 + $0xb88] sm:$0xff] %v1437_v25  ;;  %v437_v25 = vld [vmem:[#allocation2 + $0xc48] sm:$0xff]  ;;  %v1460_v30 = vadd.f32 %v948_v23, %v436_v22  ;;  %v968_v19 = vld [vmem:[#allocation5 + $0xce0] sm:$0xff] }
 0x182   :  { %1950 = vst [vmem:[#allocation7 + $0xb90] sm:$0xff] %v1438_v28  ;;  %v438_v28 = vld [vmem:[#allocation2 + $0xc50] sm:$0xff]  ;;  %v1461_v33 = vadd.f32 %v949_v26, %v437_v25  ;;  %v969_v22 = vld [vmem:[#allocation5 + $0xce8] sm:$0xff] }
 0x183   :  { %1951 = vst [vmem:[#allocation7 + $0xb98] sm:$0xff] %v1439_v31  ;;  %v439_v31 = vld [vmem:[#allocation2 + $0xc58] sm:$0xff]  ;;  %v1462_v36 = vadd.f32 %v950_v29, %v438_v28  ;;  %v970_v25 = vld [vmem:[#allocation5 + $0xcf0] sm:$0xff] }
 0x184   :  { %1952 = vst [vmem:[#allocation7 + $0xba0] sm:$0xff] %v1440_v34  ;;  %v440_v34 = vld [vmem:[#allocation2 + $0xc60] sm:$0xff]  ;;  %v1463_v39 = vadd.f32 %v951_v32, %v439_v31  ;;  %v971_v28 = vld [vmem:[#allocation5 + $0xcf8] sm:$0xff] }
 0x185   :  { %1953 = vst [vmem:[#allocation7 + $0xba8] sm:$0xff] %v1441_v37  ;;  %v441_v37 = vld [vmem:[#allocation2 + $0xc68] sm:$0xff]  ;;  %v1464_v42 = vadd.f32 %v952_v35, %v440_v34  ;;  %v972_v31 = vld [vmem:[#allocation5 + $0xd00] sm:$0xff] }
 0x186   :  { %1954 = vst [vmem:[#allocation7 + $0xbb0] sm:$0xff] %v1442_v40  ;;  %v442_v40 = vld [vmem:[#allocation2 + $0xc70] sm:$0xff]  ;;  %v1465_v45 = vadd.f32 %v953_v38, %v441_v37  ;;  %v973_v34 = vld [vmem:[#allocation5 + $0xd08] sm:$0xff] }
 0x187   :  { %1955 = vst [vmem:[#allocation7 + $0xbb8] sm:$0xff] %v1443_v43  ;;  %v443_v43 = vld [vmem:[#allocation2 + $0xc78] sm:$0xff]  ;;  %v1466_v48 = vadd.f32 %v954_v41, %v442_v40  ;;  %v974_v37 = vld [vmem:[#allocation5 + $0xd10] sm:$0xff] }
 0x188   :  { %1956 = vst [vmem:[#allocation7 + $0xbc0] sm:$0xff] %v1444_v46  ;;  %v444_v46 = vld [vmem:[#allocation2 + $0xc80] sm:$0xff]  ;;  %v1467_v51 = vadd.f32 %v955_v44, %v443_v43  ;;  %v975_v40 = vld [vmem:[#allocation5 + $0xd18] sm:$0xff] }
 0x189   :  { %1957 = vst [vmem:[#allocation7 + $0xbc8] sm:$0xff] %v1445_v49  ;;  %v445_v49 = vld [vmem:[#allocation2 + $0xc88] sm:$0xff]  ;;  %v1468_v54 = vadd.f32 %v956_v47, %v444_v46  ;;  %v976_v43 = vld [vmem:[#allocation5 + $0xd20] sm:$0xff] }
 0x18a   :  { %1958 = vst [vmem:[#allocation7 + $0xbd0] sm:$0xff] %v1446_v52  ;;  %v446_v52 = vld [vmem:[#allocation2 + $0xc90] sm:$0xff]  ;;  %v1469_v57 = vadd.f32 %v957_v50, %v445_v49  ;;  %v977_v46 = vld [vmem:[#allocation5 + $0xd28] sm:$0xff] }
 0x18b   :  { %1959 = vst [vmem:[#allocation7 + $0xbd8] sm:$0xff] %v1447_v55  ;;  %v447_v55 = vld [vmem:[#allocation2 + $0xc98] sm:$0xff]  ;;  %v1470_v60 = vadd.f32 %v958_v53, %v446_v52  ;;  %v978_v49 = vld [vmem:[#allocation5 + $0xd30] sm:$0xff] }
 0x18c   :  { %1960 = vst [vmem:[#allocation7 + $0xbe0] sm:$0xff] %v1448_v58  ;;  %v448_v58 = vld [vmem:[#allocation2 + $0xca0] sm:$0xff]  ;;  %v1471_v63 = vadd.f32 %v959_v56, %v447_v55  ;;  %v979_v52 = vld [vmem:[#allocation5 + $0xd38] sm:$0xff] }
 0x18d   :  { %1961 = vst [vmem:[#allocation7 + $0xbe8] sm:$0xff] %v1449_v61  ;;  %v449_v61 = vld [vmem:[#allocation2 + $0xca8] sm:$0xff]  ;;  %v1472_v2 = vadd.f32 %v960_v59, %v448_v58  ;;  %v980_v55 = vld [vmem:[#allocation5 + $0xd40] sm:$0xff] }
 0x18e   :  { %1962 = vst [vmem:[#allocation7 + $0xbf0] sm:$0xff] %v1450_v0  ;;  %v450_v0 = vld [vmem:[#allocation2 + $0xcb0] sm:$0xff]  ;;  %v1473_v5 = vadd.f32 %v961_v62, %v449_v61  ;;  %v981_v58 = vld [vmem:[#allocation5 + $0xd48] sm:$0xff] }
 0x18f   :  { %1963 = vst [vmem:[#allocation7 + $0xbf8] sm:$0xff] %v1451_v3  ;;  %v451_v3 = vld [vmem:[#allocation2 + $0xcb8] sm:$0xff]  ;;  %v1474_v8 = vadd.f32 %v962_v1, %v450_v0  ;;  %v982_v61 = vld [vmem:[#allocation5 + $0xd50] sm:$0xff] }
 0x190   :  { %1964 = vst [vmem:[#allocation7 + $0xc00] sm:$0xff] %v1452_v6  ;;  %v452_v6 = vld [vmem:[#allocation2 + $0xcc0] sm:$0xff]  ;;  %v1475_v11 = vadd.f32 %v963_v4, %v451_v3  ;;  %v983_v0 = vld [vmem:[#allocation5 + $0xd58] sm:$0xff] }
 0x191   :  { %1965 = vst [vmem:[#allocation7 + $0xc08] sm:$0xff] %v1453_v9  ;;  %v453_v9 = vld [vmem:[#allocation2 + $0xcc8] sm:$0xff]  ;;  %v1476_v14 = vadd.f32 %v964_v7, %v452_v6  ;;  %v984_v3 = vld [vmem:[#allocation5 + $0xd60] sm:$0xff] }
 0x192   :  { %1966 = vst [vmem:[#allocation7 + $0xc10] sm:$0xff] %v1454_v12  ;;  %v454_v12 = vld [vmem:[#allocation2 + $0xcd0] sm:$0xff]  ;;  %v1477_v17 = vadd.f32 %v965_v10, %v453_v9  ;;  %v985_v6 = vld [vmem:[#allocation5 + $0xd68] sm:$0xff] }
 0x193   :  { %1967 = vst [vmem:[#allocation7 + $0xc18] sm:$0xff] %v1455_v15  ;;  %v455_v15 = vld [vmem:[#allocation2 + $0xcd8] sm:$0xff]  ;;  %v1478_v20 = vadd.f32 %v966_v13, %v454_v12  ;;  %v986_v9 = vld [vmem:[#allocation5 + $0xd70] sm:$0xff] }
 0x194   :  { %1968 = vst [vmem:[#allocation7 + $0xc20] sm:$0xff] %v1456_v18  ;;  %v456_v18 = vld [vmem:[#allocation2 + $0xce0] sm:$0xff]  ;;  %v1479_v23 = vadd.f32 %v967_v16, %v455_v15  ;;  %v987_v12 = vld [vmem:[#allocation5 + $0xd78] sm:$0xff] }
 0x195   :  { %1969 = vst [vmem:[#allocation7 + $0xc28] sm:$0xff] %v1457_v21  ;;  %v457_v21 = vld [vmem:[#allocation2 + $0xce8] sm:$0xff]  ;;  %v1480_v26 = vadd.f32 %v968_v19, %v456_v18  ;;  %v988_v15 = vld [vmem:[#allocation5 + $0xd80] sm:$0xff] }
 0x196   :  { %1970 = vst [vmem:[#allocation7 + $0xc30] sm:$0xff] %v1458_v24  ;;  %v458_v24 = vld [vmem:[#allocation2 + $0xcf0] sm:$0xff]  ;;  %v1481_v29 = vadd.f32 %v969_v22, %v457_v21  ;;  %v989_v18 = vld [vmem:[#allocation5 + $0xd88] sm:$0xff] }
 0x197   :  { %1971 = vst [vmem:[#allocation7 + $0xc38] sm:$0xff] %v1459_v27  ;;  %v459_v27 = vld [vmem:[#allocation2 + $0xcf8] sm:$0xff]  ;;  %v1482_v32 = vadd.f32 %v970_v25, %v458_v24  ;;  %v990_v21 = vld [vmem:[#allocation5 + $0xd90] sm:$0xff] }
 0x198   :  { %1972 = vst [vmem:[#allocation7 + $0xc40] sm:$0xff] %v1460_v30  ;;  %v460_v30 = vld [vmem:[#allocation2 + $0xd00] sm:$0xff]  ;;  %v1483_v35 = vadd.f32 %v971_v28, %v459_v27  ;;  %v991_v24 = vld [vmem:[#allocation5 + $0xd98] sm:$0xff] }
 0x199   :  { %1973 = vst [vmem:[#allocation7 + $0xc48] sm:$0xff] %v1461_v33  ;;  %v461_v33 = vld [vmem:[#allocation2 + $0xd08] sm:$0xff]  ;;  %v1484_v38 = vadd.f32 %v972_v31, %v460_v30  ;;  %v992_v27 = vld [vmem:[#allocation5 + $0xda0] sm:$0xff] }
 0x19a   :  { %1974 = vst [vmem:[#allocation7 + $0xc50] sm:$0xff] %v1462_v36  ;;  %v462_v36 = vld [vmem:[#allocation2 + $0xd10] sm:$0xff]  ;;  %v1485_v41 = vadd.f32 %v973_v34, %v461_v33  ;;  %v993_v30 = vld [vmem:[#allocation5 + $0xda8] sm:$0xff] }
 0x19b   :  { %1975 = vst [vmem:[#allocation7 + $0xc58] sm:$0xff] %v1463_v39  ;;  %v463_v39 = vld [vmem:[#allocation2 + $0xd18] sm:$0xff]  ;;  %v1486_v44 = vadd.f32 %v974_v37, %v462_v36  ;;  %v994_v33 = vld [vmem:[#allocation5 + $0xdb0] sm:$0xff] }
 0x19c   :  { %1976 = vst [vmem:[#allocation7 + $0xc60] sm:$0xff] %v1464_v42  ;;  %v464_v42 = vld [vmem:[#allocation2 + $0xd20] sm:$0xff]  ;;  %v1487_v47 = vadd.f32 %v975_v40, %v463_v39  ;;  %v995_v36 = vld [vmem:[#allocation5 + $0xdb8] sm:$0xff] }
 0x19d   :  { %1977 = vst [vmem:[#allocation7 + $0xc68] sm:$0xff] %v1465_v45  ;;  %v465_v45 = vld [vmem:[#allocation2 + $0xd28] sm:$0xff]  ;;  %v1488_v50 = vadd.f32 %v976_v43, %v464_v42  ;;  %v996_v39 = vld [vmem:[#allocation5 + $0xdc0] sm:$0xff] }
 0x19e   :  { %1978 = vst [vmem:[#allocation7 + $0xc70] sm:$0xff] %v1466_v48  ;;  %v466_v48 = vld [vmem:[#allocation2 + $0xd30] sm:$0xff]  ;;  %v1489_v53 = vadd.f32 %v977_v46, %v465_v45  ;;  %v997_v42 = vld [vmem:[#allocation5 + $0xdc8] sm:$0xff] }
 0x19f   :  { %1979 = vst [vmem:[#allocation7 + $0xc78] sm:$0xff] %v1467_v51  ;;  %v467_v51 = vld [vmem:[#allocation2 + $0xd38] sm:$0xff]  ;;  %v1490_v56 = vadd.f32 %v978_v49, %v466_v48  ;;  %v998_v45 = vld [vmem:[#allocation5 + $0xdd0] sm:$0xff] }
 0x1a0   :  { %1980 = vst [vmem:[#allocation7 + $0xc80] sm:$0xff] %v1468_v54  ;;  %v468_v54 = vld [vmem:[#allocation2 + $0xd40] sm:$0xff]  ;;  %v1491_v59 = vadd.f32 %v979_v52, %v467_v51  ;;  %v999_v48 = vld [vmem:[#allocation5 + $0xdd8] sm:$0xff] }
 0x1a1   :  { %1981 = vst [vmem:[#allocation7 + $0xc88] sm:$0xff] %v1469_v57  ;;  %v469_v57 = vld [vmem:[#allocation2 + $0xd48] sm:$0xff]  ;;  %v1492_v62 = vadd.f32 %v980_v55, %v468_v54  ;;  %v1000_v51 = vld [vmem:[#allocation5 + $0xde0] sm:$0xff] }
 0x1a2   :  { %1982 = vst [vmem:[#allocation7 + $0xc90] sm:$0xff] %v1470_v60  ;;  %v470_v60 = vld [vmem:[#allocation2 + $0xd50] sm:$0xff]  ;;  %v1493_v1 = vadd.f32 %v981_v58, %v469_v57  ;;  %v1001_v54 = vld [vmem:[#allocation5 + $0xde8] sm:$0xff] }
 0x1a3   :  { %1983 = vst [vmem:[#allocation7 + $0xc98] sm:$0xff] %v1471_v63  ;;  %v471_v63 = vld [vmem:[#allocation2 + $0xd58] sm:$0xff]  ;;  %v1494_v4 = vadd.f32 %v982_v61, %v470_v60  ;;  %v1002_v57 = vld [vmem:[#allocation5 + $0xdf0] sm:$0xff] }
 0x1a4   :  { %1984 = vst [vmem:[#allocation7 + $0xca0] sm:$0xff] %v1472_v2  ;;  %v472_v2 = vld [vmem:[#allocation2 + $0xd60] sm:$0xff]  ;;  %v1495_v7 = vadd.f32 %v983_v0, %v471_v63  ;;  %v1003_v60 = vld [vmem:[#allocation5 + $0xdf8] sm:$0xff] }
 0x1a5   :  { %1985 = vst [vmem:[#allocation7 + $0xca8] sm:$0xff] %v1473_v5  ;;  %v473_v5 = vld [vmem:[#allocation2 + $0xd68] sm:$0xff]  ;;  %v1496_v10 = vadd.f32 %v984_v3, %v472_v2  ;;  %v1004_v63 = vld [vmem:[#allocation5 + $0xe00] sm:$0xff] }
 0x1a6   :  { %1986 = vst [vmem:[#allocation7 + $0xcb0] sm:$0xff] %v1474_v8  ;;  %v474_v8 = vld [vmem:[#allocation2 + $0xd70] sm:$0xff]  ;;  %v1497_v13 = vadd.f32 %v985_v6, %v473_v5  ;;  %v1005_v2 = vld [vmem:[#allocation5 + $0xe08] sm:$0xff] }
 0x1a7   :  { %1987 = vst [vmem:[#allocation7 + $0xcb8] sm:$0xff] %v1475_v11  ;;  %v475_v11 = vld [vmem:[#allocation2 + $0xd78] sm:$0xff]  ;;  %v1498_v16 = vadd.f32 %v986_v9, %v474_v8  ;;  %v1006_v5 = vld [vmem:[#allocation5 + $0xe10] sm:$0xff] }
 0x1a8   :  { %1988 = vst [vmem:[#allocation7 + $0xcc0] sm:$0xff] %v1476_v14  ;;  %v476_v14 = vld [vmem:[#allocation2 + $0xd80] sm:$0xff]  ;;  %v1499_v19 = vadd.f32 %v987_v12, %v475_v11  ;;  %v1007_v8 = vld [vmem:[#allocation5 + $0xe18] sm:$0xff] }
 0x1a9   :  { %1989 = vst [vmem:[#allocation7 + $0xcc8] sm:$0xff] %v1477_v17  ;;  %v477_v17 = vld [vmem:[#allocation2 + $0xd88] sm:$0xff]  ;;  %v1500_v22 = vadd.f32 %v988_v15, %v476_v14  ;;  %v1008_v11 = vld [vmem:[#allocation5 + $0xe20] sm:$0xff] }
 0x1aa   :  { %1990 = vst [vmem:[#allocation7 + $0xcd0] sm:$0xff] %v1478_v20  ;;  %v478_v20 = vld [vmem:[#allocation2 + $0xd90] sm:$0xff]  ;;  %v1501_v25 = vadd.f32 %v989_v18, %v477_v17  ;;  %v1009_v14 = vld [vmem:[#allocation5 + $0xe28] sm:$0xff] }
 0x1ab   :  { %1991 = vst [vmem:[#allocation7 + $0xcd8] sm:$0xff] %v1479_v23  ;;  %v479_v23 = vld [vmem:[#allocation2 + $0xd98] sm:$0xff]  ;;  %v1502_v28 = vadd.f32 %v990_v21, %v478_v20  ;;  %v1010_v17 = vld [vmem:[#allocation5 + $0xe30] sm:$0xff] }
 0x1ac   :  { %1992 = vst [vmem:[#allocation7 + $0xce0] sm:$0xff] %v1480_v26  ;;  %v480_v26 = vld [vmem:[#allocation2 + $0xda0] sm:$0xff]  ;;  %v1503_v31 = vadd.f32 %v991_v24, %v479_v23  ;;  %v1011_v20 = vld [vmem:[#allocation5 + $0xe38] sm:$0xff] }
 0x1ad   :  { %1993 = vst [vmem:[#allocation7 + $0xce8] sm:$0xff] %v1481_v29  ;;  %v481_v29 = vld [vmem:[#allocation2 + $0xda8] sm:$0xff]  ;;  %v1504_v34 = vadd.f32 %v992_v27, %v480_v26  ;;  %v1012_v23 = vld [vmem:[#allocation5 + $0xe40] sm:$0xff] }
 0x1ae   :  { %1994 = vst [vmem:[#allocation7 + $0xcf0] sm:$0xff] %v1482_v32  ;;  %v482_v32 = vld [vmem:[#allocation2 + $0xdb0] sm:$0xff]  ;;  %v1505_v37 = vadd.f32 %v993_v30, %v481_v29  ;;  %v1013_v26 = vld [vmem:[#allocation5 + $0xe48] sm:$0xff] }
 0x1af   :  { %1995 = vst [vmem:[#allocation7 + $0xcf8] sm:$0xff] %v1483_v35  ;;  %v483_v35 = vld [vmem:[#allocation2 + $0xdb8] sm:$0xff]  ;;  %v1506_v40 = vadd.f32 %v994_v33, %v482_v32  ;;  %v1014_v29 = vld [vmem:[#allocation5 + $0xe50] sm:$0xff] }
 0x1b0   :  { %1996 = vst [vmem:[#allocation7 + $0xd00] sm:$0xff] %v1484_v38  ;;  %v484_v38 = vld [vmem:[#allocation2 + $0xdc0] sm:$0xff]  ;;  %v1507_v43 = vadd.f32 %v995_v36, %v483_v35  ;;  %v1015_v32 = vld [vmem:[#allocation5 + $0xe58] sm:$0xff] }
 0x1b1   :  { %1997 = vst [vmem:[#allocation7 + $0xd08] sm:$0xff] %v1485_v41  ;;  %v485_v41 = vld [vmem:[#allocation2 + $0xdc8] sm:$0xff]  ;;  %v1508_v46 = vadd.f32 %v996_v39, %v484_v38  ;;  %v1016_v35 = vld [vmem:[#allocation5 + $0xe60] sm:$0xff] }
 0x1b2   :  { %1998 = vst [vmem:[#allocation7 + $0xd10] sm:$0xff] %v1486_v44  ;;  %v486_v44 = vld [vmem:[#allocation2 + $0xdd0] sm:$0xff]  ;;  %v1509_v49 = vadd.f32 %v997_v42, %v485_v41  ;;  %v1017_v38 = vld [vmem:[#allocation5 + $0xe68] sm:$0xff] }
 0x1b3   :  { %1999 = vst [vmem:[#allocation7 + $0xd18] sm:$0xff] %v1487_v47  ;;  %v487_v47 = vld [vmem:[#allocation2 + $0xdd8] sm:$0xff]  ;;  %v1510_v52 = vadd.f32 %v998_v45, %v486_v44  ;;  %v1018_v41 = vld [vmem:[#allocation5 + $0xe70] sm:$0xff] }
 0x1b4   :  { %2000 = vst [vmem:[#allocation7 + $0xd20] sm:$0xff] %v1488_v50  ;;  %v488_v50 = vld [vmem:[#allocation2 + $0xde0] sm:$0xff]  ;;  %v1511_v55 = vadd.f32 %v999_v48, %v487_v47  ;;  %v1019_v44 = vld [vmem:[#allocation5 + $0xe78] sm:$0xff] }
 0x1b5   :  { %2001 = vst [vmem:[#allocation7 + $0xd28] sm:$0xff] %v1489_v53  ;;  %v489_v53 = vld [vmem:[#allocation2 + $0xde8] sm:$0xff]  ;;  %v1512_v58 = vadd.f32 %v1000_v51, %v488_v50  ;;  %v1020_v47 = vld [vmem:[#allocation5 + $0xe80] sm:$0xff] }
 0x1b6   :  { %2002 = vst [vmem:[#allocation7 + $0xd30] sm:$0xff] %v1490_v56  ;;  %v490_v56 = vld [vmem:[#allocation2 + $0xdf0] sm:$0xff]  ;;  %v1513_v61 = vadd.f32 %v1001_v54, %v489_v53  ;;  %v1021_v50 = vld [vmem:[#allocation5 + $0xe88] sm:$0xff] }
 0x1b7   :  { %2003 = vst [vmem:[#allocation7 + $0xd38] sm:$0xff] %v1491_v59  ;;  %v491_v59 = vld [vmem:[#allocation2 + $0xdf8] sm:$0xff]  ;;  %v1514_v0 = vadd.f32 %v1002_v57, %v490_v56  ;;  %v1022_v53 = vld [vmem:[#allocation5 + $0xe90] sm:$0xff] }
 0x1b8   :  { %2004 = vst [vmem:[#allocation7 + $0xd40] sm:$0xff] %v1492_v62  ;;  %v492_v62 = vld [vmem:[#allocation2 + $0xe00] sm:$0xff]  ;;  %v1515_v3 = vadd.f32 %v1003_v60, %v491_v59  ;;  %v1023_v56 = vld [vmem:[#allocation5 + $0xe98] sm:$0xff] }
 0x1b9   :  { %2005 = vst [vmem:[#allocation7 + $0xd48] sm:$0xff] %v1493_v1  ;;  %v493_v1 = vld [vmem:[#allocation2 + $0xe08] sm:$0xff]  ;;  %v1516_v6 = vadd.f32 %v1004_v63, %v492_v62  ;;  %v1024_v59 = vld [vmem:[#allocation5 + $0xea0] sm:$0xff] }
 0x1ba   :  { %2006 = vst [vmem:[#allocation7 + $0xd50] sm:$0xff] %v1494_v4  ;;  %v494_v4 = vld [vmem:[#allocation2 + $0xe10] sm:$0xff]  ;;  %v1517_v9 = vadd.f32 %v1005_v2, %v493_v1  ;;  %v1025_v62 = vld [vmem:[#allocation5 + $0xea8] sm:$0xff] }
 0x1bb   :  { %2007 = vst [vmem:[#allocation7 + $0xd58] sm:$0xff] %v1495_v7  ;;  %v495_v7 = vld [vmem:[#allocation2 + $0xe18] sm:$0xff]  ;;  %v1518_v12 = vadd.f32 %v1006_v5, %v494_v4  ;;  %v1026_v1 = vld [vmem:[#allocation5 + $0xeb0] sm:$0xff] }
 0x1bc   :  { %2008 = vst [vmem:[#allocation7 + $0xd60] sm:$0xff] %v1496_v10  ;;  %v496_v10 = vld [vmem:[#allocation2 + $0xe20] sm:$0xff]  ;;  %v1519_v15 = vadd.f32 %v1007_v8, %v495_v7  ;;  %v1027_v4 = vld [vmem:[#allocation5 + $0xeb8] sm:$0xff] }
 0x1bd   :  { %2009 = vst [vmem:[#allocation7 + $0xd68] sm:$0xff] %v1497_v13  ;;  %v497_v13 = vld [vmem:[#allocation2 + $0xe28] sm:$0xff]  ;;  %v1520_v18 = vadd.f32 %v1008_v11, %v496_v10  ;;  %v1028_v7 = vld [vmem:[#allocation5 + $0xec0] sm:$0xff] }
 0x1be   :  { %2010 = vst [vmem:[#allocation7 + $0xd70] sm:$0xff] %v1498_v16  ;;  %v498_v16 = vld [vmem:[#allocation2 + $0xe30] sm:$0xff]  ;;  %v1521_v21 = vadd.f32 %v1009_v14, %v497_v13  ;;  %v1029_v10 = vld [vmem:[#allocation5 + $0xec8] sm:$0xff] }
 0x1bf   :  { %2011 = vst [vmem:[#allocation7 + $0xd78] sm:$0xff] %v1499_v19  ;;  %v499_v19 = vld [vmem:[#allocation2 + $0xe38] sm:$0xff]  ;;  %v1522_v24 = vadd.f32 %v1010_v17, %v498_v16  ;;  %v1030_v13 = vld [vmem:[#allocation5 + $0xed0] sm:$0xff] }
 0x1c0   :  { %2012 = vst [vmem:[#allocation7 + $0xd80] sm:$0xff] %v1500_v22  ;;  %v500_v22 = vld [vmem:[#allocation2 + $0xe40] sm:$0xff]  ;;  %v1523_v27 = vadd.f32 %v1011_v20, %v499_v19  ;;  %v1031_v16 = vld [vmem:[#allocation5 + $0xed8] sm:$0xff] }
 0x1c1   :  { %2013 = vst [vmem:[#allocation7 + $0xd88] sm:$0xff] %v1501_v25  ;;  %v501_v25 = vld [vmem:[#allocation2 + $0xe48] sm:$0xff]  ;;  %v1524_v30 = vadd.f32 %v1012_v23, %v500_v22  ;;  %v1032_v19 = vld [vmem:[#allocation5 + $0xee0] sm:$0xff] }
 0x1c2   :  { %2014 = vst [vmem:[#allocation7 + $0xd90] sm:$0xff] %v1502_v28  ;;  %v502_v28 = vld [vmem:[#allocation2 + $0xe50] sm:$0xff]  ;;  %v1525_v33 = vadd.f32 %v1013_v26, %v501_v25  ;;  %v1033_v22 = vld [vmem:[#allocation5 + $0xee8] sm:$0xff] }
 0x1c3   :  { %2015 = vst [vmem:[#allocation7 + $0xd98] sm:$0xff] %v1503_v31  ;;  %v503_v31 = vld [vmem:[#allocation2 + $0xe58] sm:$0xff]  ;;  %v1526_v36 = vadd.f32 %v1014_v29, %v502_v28  ;;  %v1034_v25 = vld [vmem:[#allocation5 + $0xef0] sm:$0xff] }
 0x1c4   :  { %2016 = vst [vmem:[#allocation7 + $0xda0] sm:$0xff] %v1504_v34  ;;  %v504_v34 = vld [vmem:[#allocation2 + $0xe60] sm:$0xff]  ;;  %v1527_v39 = vadd.f32 %v1015_v32, %v503_v31  ;;  %v1035_v28 = vld [vmem:[#allocation5 + $0xef8] sm:$0xff] }
 0x1c5   :  { %2017 = vst [vmem:[#allocation7 + $0xda8] sm:$0xff] %v1505_v37  ;;  %v505_v37 = vld [vmem:[#allocation2 + $0xe68] sm:$0xff]  ;;  %v1528_v42 = vadd.f32 %v1016_v35, %v504_v34  ;;  %v1036_v31 = vld [vmem:[#allocation5 + $0xf00] sm:$0xff] }
 0x1c6   :  { %2018 = vst [vmem:[#allocation7 + $0xdb0] sm:$0xff] %v1506_v40  ;;  %v506_v40 = vld [vmem:[#allocation2 + $0xe70] sm:$0xff]  ;;  %v1529_v45 = vadd.f32 %v1017_v38, %v505_v37  ;;  %v1037_v34 = vld [vmem:[#allocation5 + $0xf08] sm:$0xff] }
 0x1c7   :  { %2019 = vst [vmem:[#allocation7 + $0xdb8] sm:$0xff] %v1507_v43  ;;  %v507_v43 = vld [vmem:[#allocation2 + $0xe78] sm:$0xff]  ;;  %v1530_v48 = vadd.f32 %v1018_v41, %v506_v40  ;;  %v1038_v37 = vld [vmem:[#allocation5 + $0xf10] sm:$0xff] }
 0x1c8   :  { %2020 = vst [vmem:[#allocation7 + $0xdc0] sm:$0xff] %v1508_v46  ;;  %v508_v46 = vld [vmem:[#allocation2 + $0xe80] sm:$0xff]  ;;  %v1531_v51 = vadd.f32 %v1019_v44, %v507_v43  ;;  %v1039_v40 = vld [vmem:[#allocation5 + $0xf18] sm:$0xff] }
 0x1c9   :  { %2021 = vst [vmem:[#allocation7 + $0xdc8] sm:$0xff] %v1509_v49  ;;  %v509_v49 = vld [vmem:[#allocation2 + $0xe88] sm:$0xff]  ;;  %v1532_v54 = vadd.f32 %v1020_v47, %v508_v46  ;;  %v1040_v43 = vld [vmem:[#allocation5 + $0xf20] sm:$0xff] }
 0x1ca   :  { %2022 = vst [vmem:[#allocation7 + $0xdd0] sm:$0xff] %v1510_v52  ;;  %v510_v52 = vld [vmem:[#allocation2 + $0xe90] sm:$0xff]  ;;  %v1533_v57 = vadd.f32 %v1021_v50, %v509_v49  ;;  %v1041_v46 = vld [vmem:[#allocation5 + $0xf28] sm:$0xff] }
 0x1cb   :  { %2023 = vst [vmem:[#allocation7 + $0xdd8] sm:$0xff] %v1511_v55  ;;  %v511_v55 = vld [vmem:[#allocation2 + $0xe98] sm:$0xff]  ;;  %v1534_v60 = vadd.f32 %v1022_v53, %v510_v52  ;;  %v1042_v49 = vld [vmem:[#allocation5 + $0xf30] sm:$0xff] }
 0x1cc   :  { %2024 = vst [vmem:[#allocation7 + $0xde0] sm:$0xff] %v1512_v58  ;;  %v512_v58 = vld [vmem:[#allocation2 + $0xea0] sm:$0xff]  ;;  %v1535_v63 = vadd.f32 %v1023_v56, %v511_v55  ;;  %v1043_v52 = vld [vmem:[#allocation5 + $0xf38] sm:$0xff] }
 0x1cd   :  { %2025 = vst [vmem:[#allocation7 + $0xde8] sm:$0xff] %v1513_v61  ;;  %v513_v61 = vld [vmem:[#allocation2 + $0xea8] sm:$0xff]  ;;  %v1536_v2 = vadd.f32 %v1024_v59, %v512_v58  ;;  %v1044_v55 = vld [vmem:[#allocation5 + $0xf40] sm:$0xff] }
 0x1ce   :  { %2026 = vst [vmem:[#allocation7 + $0xdf0] sm:$0xff] %v1514_v0  ;;  %v514_v0 = vld [vmem:[#allocation2 + $0xeb0] sm:$0xff]  ;;  %v1537_v5 = vadd.f32 %v1025_v62, %v513_v61  ;;  %v1045_v58 = vld [vmem:[#allocation5 + $0xf48] sm:$0xff] }
 0x1cf   :  { %2027 = vst [vmem:[#allocation7 + $0xdf8] sm:$0xff] %v1515_v3  ;;  %v515_v3 = vld [vmem:[#allocation2 + $0xeb8] sm:$0xff]  ;;  %v1538_v8 = vadd.f32 %v1026_v1, %v514_v0  ;;  %v1046_v61 = vld [vmem:[#allocation5 + $0xf50] sm:$0xff] }
 0x1d0   :  { %2028 = vst [vmem:[#allocation7 + $0xe00] sm:$0xff] %v1516_v6  ;;  %v516_v6 = vld [vmem:[#allocation2 + $0xec0] sm:$0xff]  ;;  %v1539_v11 = vadd.f32 %v1027_v4, %v515_v3  ;;  %v1047_v0 = vld [vmem:[#allocation5 + $0xf58] sm:$0xff] }
 0x1d1   :  { %2029 = vst [vmem:[#allocation7 + $0xe08] sm:$0xff] %v1517_v9  ;;  %v517_v9 = vld [vmem:[#allocation2 + $0xec8] sm:$0xff]  ;;  %v1540_v14 = vadd.f32 %v1028_v7, %v516_v6  ;;  %v1048_v3 = vld [vmem:[#allocation5 + $0xf60] sm:$0xff] }
 0x1d2   :  { %2030 = vst [vmem:[#allocation7 + $0xe10] sm:$0xff] %v1518_v12  ;;  %v518_v12 = vld [vmem:[#allocation2 + $0xed0] sm:$0xff]  ;;  %v1541_v17 = vadd.f32 %v1029_v10, %v517_v9  ;;  %v1049_v6 = vld [vmem:[#allocation5 + $0xf68] sm:$0xff] }
 0x1d3   :  { %2031 = vst [vmem:[#allocation7 + $0xe18] sm:$0xff] %v1519_v15  ;;  %v519_v15 = vld [vmem:[#allocation2 + $0xed8] sm:$0xff]  ;;  %v1542_v20 = vadd.f32 %v1030_v13, %v518_v12  ;;  %v1050_v9 = vld [vmem:[#allocation5 + $0xf70] sm:$0xff] }
 0x1d4   :  { %2032 = vst [vmem:[#allocation7 + $0xe20] sm:$0xff] %v1520_v18  ;;  %v520_v18 = vld [vmem:[#allocation2 + $0xee0] sm:$0xff]  ;;  %v1543_v23 = vadd.f32 %v1031_v16, %v519_v15  ;;  %v1051_v12 = vld [vmem:[#allocation5 + $0xf78] sm:$0xff] }
 0x1d5   :  { %2033 = vst [vmem:[#allocation7 + $0xe28] sm:$0xff] %v1521_v21  ;;  %v521_v21 = vld [vmem:[#allocation2 + $0xee8] sm:$0xff]  ;;  %v1544_v26 = vadd.f32 %v1032_v19, %v520_v18  ;;  %v1052_v15 = vld [vmem:[#allocation5 + $0xf80] sm:$0xff] }
 0x1d6   :  { %2034 = vst [vmem:[#allocation7 + $0xe30] sm:$0xff] %v1522_v24  ;;  %v522_v24 = vld [vmem:[#allocation2 + $0xef0] sm:$0xff]  ;;  %v1545_v29 = vadd.f32 %v1033_v22, %v521_v21  ;;  %v1053_v18 = vld [vmem:[#allocation5 + $0xf88] sm:$0xff] }
 0x1d7   :  { %2035 = vst [vmem:[#allocation7 + $0xe38] sm:$0xff] %v1523_v27  ;;  %v523_v27 = vld [vmem:[#allocation2 + $0xef8] sm:$0xff]  ;;  %v1546_v32 = vadd.f32 %v1034_v25, %v522_v24  ;;  %v1054_v21 = vld [vmem:[#allocation5 + $0xf90] sm:$0xff] }
 0x1d8   :  { %2036 = vst [vmem:[#allocation7 + $0xe40] sm:$0xff] %v1524_v30  ;;  %v524_v30 = vld [vmem:[#allocation2 + $0xf00] sm:$0xff]  ;;  %v1547_v35 = vadd.f32 %v1035_v28, %v523_v27  ;;  %v1055_v24 = vld [vmem:[#allocation5 + $0xf98] sm:$0xff] }
 0x1d9   :  { %2037 = vst [vmem:[#allocation7 + $0xe48] sm:$0xff] %v1525_v33  ;;  %v525_v33 = vld [vmem:[#allocation2 + $0xf08] sm:$0xff]  ;;  %v1548_v38 = vadd.f32 %v1036_v31, %v524_v30  ;;  %v1056_v27 = vld [vmem:[#allocation5 + $0xfa0] sm:$0xff] }
 0x1da   :  { %2038 = vst [vmem:[#allocation7 + $0xe50] sm:$0xff] %v1526_v36  ;;  %v526_v36 = vld [vmem:[#allocation2 + $0xf10] sm:$0xff]  ;;  %v1549_v41 = vadd.f32 %v1037_v34, %v525_v33  ;;  %v1057_v30 = vld [vmem:[#allocation5 + $0xfa8] sm:$0xff] }
 0x1db   :  { %2039 = vst [vmem:[#allocation7 + $0xe58] sm:$0xff] %v1527_v39  ;;  %v527_v39 = vld [vmem:[#allocation2 + $0xf18] sm:$0xff]  ;;  %v1550_v44 = vadd.f32 %v1038_v37, %v526_v36  ;;  %v1058_v33 = vld [vmem:[#allocation5 + $0xfb0] sm:$0xff] }
 0x1dc   :  { %2040 = vst [vmem:[#allocation7 + $0xe60] sm:$0xff] %v1528_v42  ;;  %v528_v42 = vld [vmem:[#allocation2 + $0xf20] sm:$0xff]  ;;  %v1551_v47 = vadd.f32 %v1039_v40, %v527_v39  ;;  %v1059_v36 = vld [vmem:[#allocation5 + $0xfb8] sm:$0xff] }
 0x1dd   :  { %2041 = vst [vmem:[#allocation7 + $0xe68] sm:$0xff] %v1529_v45  ;;  %v529_v45 = vld [vmem:[#allocation2 + $0xf28] sm:$0xff]  ;;  %v1552_v50 = vadd.f32 %v1040_v43, %v528_v42  ;;  %v1060_v39 = vld [vmem:[#allocation5 + $0xfc0] sm:$0xff] }
 0x1de   :  { %2042 = vst [vmem:[#allocation7 + $0xe70] sm:$0xff] %v1530_v48  ;;  %v530_v48 = vld [vmem:[#allocation2 + $0xf30] sm:$0xff]  ;;  %v1553_v53 = vadd.f32 %v1041_v46, %v529_v45  ;;  %v1061_v42 = vld [vmem:[#allocation5 + $0xfc8] sm:$0xff] }
 0x1df   :  { %2043 = vst [vmem:[#allocation7 + $0xe78] sm:$0xff] %v1531_v51  ;;  %v531_v51 = vld [vmem:[#allocation2 + $0xf38] sm:$0xff]  ;;  %v1554_v56 = vadd.f32 %v1042_v49, %v530_v48  ;;  %v1062_v45 = vld [vmem:[#allocation5 + $0xfd0] sm:$0xff] }
 0x1e0   :  { %2044 = vst [vmem:[#allocation7 + $0xe80] sm:$0xff] %v1532_v54  ;;  %v532_v54 = vld [vmem:[#allocation2 + $0xf40] sm:$0xff]  ;;  %v1555_v59 = vadd.f32 %v1043_v52, %v531_v51  ;;  %v1063_v48 = vld [vmem:[#allocation5 + $0xfd8] sm:$0xff] }
 0x1e1   :  { %2045 = vst [vmem:[#allocation7 + $0xe88] sm:$0xff] %v1533_v57  ;;  %v533_v57 = vld [vmem:[#allocation2 + $0xf48] sm:$0xff]  ;;  %v1556_v62 = vadd.f32 %v1044_v55, %v532_v54  ;;  %v1064_v51 = vld [vmem:[#allocation5 + $0xfe0] sm:$0xff] }
 0x1e2   :  { %2046 = vst [vmem:[#allocation7 + $0xe90] sm:$0xff] %v1534_v60  ;;  %v534_v60 = vld [vmem:[#allocation2 + $0xf50] sm:$0xff]  ;;  %v1557_v1 = vadd.f32 %v1045_v58, %v533_v57  ;;  %v1065_v54 = vld [vmem:[#allocation5 + $0xfe8] sm:$0xff] }
 0x1e3   :  { %2047 = vst [vmem:[#allocation7 + $0xe98] sm:$0xff] %v1535_v63  ;;  %v535_v63 = vld [vmem:[#allocation2 + $0xf58] sm:$0xff]  ;;  %v1558_v4 = vadd.f32 %v1046_v61, %v534_v60  ;;  %v1066_v57 = vld [vmem:[#allocation5 + $0xff0] sm:$0xff] }
 0x1e4   :  { %2048 = vst [vmem:[#allocation7 + $0xea0] sm:$0xff] %v1536_v2  ;;  %v536_v2 = vld [vmem:[#allocation2 + $0xf60] sm:$0xff]  ;;  %v1559_v7 = vadd.f32 %v1047_v0, %v535_v63  ;;  %v1067_v60 = vld [vmem:[#allocation5 + $0xff8] sm:$0xff] }
 0x1e5   :  { %2049 = vst [vmem:[#allocation7 + $0xea8] sm:$0xff] %v1537_v5  ;;  %v537_v5 = vld [vmem:[#allocation2 + $0xf68] sm:$0xff]  ;;  %v1560_v10 = vadd.f32 %v1048_v3, %v536_v2 }
 0x1e6   :  { %2050 = vst [vmem:[#allocation7 + $0xeb0] sm:$0xff] %v1538_v8  ;;  %v538_v8 = vld [vmem:[#allocation2 + $0xf70] sm:$0xff]  ;;  %v1561_v13 = vadd.f32 %v1049_v6, %v537_v5 }
 0x1e7   :  { %2051 = vst [vmem:[#allocation7 + $0xeb8] sm:$0xff] %v1539_v11  ;;  %v539_v11 = vld [vmem:[#allocation2 + $0xf78] sm:$0xff]  ;;  %v1562_v16 = vadd.f32 %v1050_v9, %v538_v8 }
 0x1e8   :  { %2052 = vst [vmem:[#allocation7 + $0xec0] sm:$0xff] %v1540_v14  ;;  %v540_v14 = vld [vmem:[#allocation2 + $0xf80] sm:$0xff]  ;;  %v1563_v19 = vadd.f32 %v1051_v12, %v539_v11 }
 0x1e9   :  { %2053 = vst [vmem:[#allocation7 + $0xec8] sm:$0xff] %v1541_v17  ;;  %v541_v17 = vld [vmem:[#allocation2 + $0xf88] sm:$0xff]  ;;  %v1564_v22 = vadd.f32 %v1052_v15, %v540_v14 }
 0x1ea   :  { %2054 = vst [vmem:[#allocation7 + $0xed0] sm:$0xff] %v1542_v20  ;;  %v542_v20 = vld [vmem:[#allocation2 + $0xf90] sm:$0xff]  ;;  %v1565_v25 = vadd.f32 %v1053_v18, %v541_v17 }
 0x1eb   :  { %2055 = vst [vmem:[#allocation7 + $0xed8] sm:$0xff] %v1543_v23  ;;  %v543_v23 = vld [vmem:[#allocation2 + $0xf98] sm:$0xff]  ;;  %v1566_v28 = vadd.f32 %v1054_v21, %v542_v20 }
 0x1ec   :  { %2056 = vst [vmem:[#allocation7 + $0xee0] sm:$0xff] %v1544_v26  ;;  %v544_v26 = vld [vmem:[#allocation2 + $0xfa0] sm:$0xff]  ;;  %v1567_v31 = vadd.f32 %v1055_v24, %v543_v23 }
 0x1ed   :  { %2057 = vst [vmem:[#allocation7 + $0xee8] sm:$0xff] %v1545_v29  ;;  %v545_v29 = vld [vmem:[#allocation2 + $0xfa8] sm:$0xff]  ;;  %v1568_v34 = vadd.f32 %v1056_v27, %v544_v26 }
 0x1ee   :  { %2058 = vst [vmem:[#allocation7 + $0xef0] sm:$0xff] %v1546_v32  ;;  %v546_v32 = vld [vmem:[#allocation2 + $0xfb0] sm:$0xff]  ;;  %v1569_v37 = vadd.f32 %v1057_v30, %v545_v29 }
 0x1ef   :  { %2059 = vst [vmem:[#allocation7 + $0xef8] sm:$0xff] %v1547_v35  ;;  %v547_v35 = vld [vmem:[#allocation2 + $0xfb8] sm:$0xff]  ;;  %v1570_v40 = vadd.f32 %v1058_v33, %v546_v32 }
 0x1f0   :  { %2060 = vst [vmem:[#allocation7 + $0xf00] sm:$0xff] %v1548_v38  ;;  %v548_v38 = vld [vmem:[#allocation2 + $0xfc0] sm:$0xff]  ;;  %v1571_v43 = vadd.f32 %v1059_v36, %v547_v35 }
 0x1f1   :  { %2061 = vst [vmem:[#allocation7 + $0xf08] sm:$0xff] %v1549_v41  ;;  %v549_v41 = vld [vmem:[#allocation2 + $0xfc8] sm:$0xff]  ;;  %v1572_v46 = vadd.f32 %v1060_v39, %v548_v38 }
 0x1f2   :  { %2062 = vst [vmem:[#allocation7 + $0xf10] sm:$0xff] %v1550_v44  ;;  %v550_v44 = vld [vmem:[#allocation2 + $0xfd0] sm:$0xff]  ;;  %v1573_v49 = vadd.f32 %v1061_v42, %v549_v41 }
 0x1f3   :  { %2063 = vst [vmem:[#allocation7 + $0xf18] sm:$0xff] %v1551_v47  ;;  %v551_v47 = vld [vmem:[#allocation2 + $0xfd8] sm:$0xff]  ;;  %v1574_v52 = vadd.f32 %v1062_v45, %v550_v44 }
 0x1f4   :  { %2064 = vst [vmem:[#allocation7 + $0xf20] sm:$0xff] %v1552_v50  ;;  %v552_v50 = vld [vmem:[#allocation2 + $0xfe0] sm:$0xff]  ;;  %v1575_v55 = vadd.f32 %v1063_v48, %v551_v47 }
 0x1f5   :  { %2065 = vst [vmem:[#allocation7 + $0xf28] sm:$0xff] %v1553_v53  ;;  %v553_v53 = vld [vmem:[#allocation2 + $0xfe8] sm:$0xff]  ;;  %v1576_v58 = vadd.f32 %v1064_v51, %v552_v50 }
 0x1f6   :  { %2066 = vst [vmem:[#allocation7 + $0xf30] sm:$0xff] %v1554_v56  ;;  %v554_v56 = vld [vmem:[#allocation2 + $0xff0] sm:$0xff]  ;;  %v1577_v61 = vadd.f32 %v1065_v54, %v553_v53 }
 0x1f7   :  { %2067 = vst [vmem:[#allocation7 + $0xf38] sm:$0xff] %v1555_v59  ;;  %v555_v59 = vld [vmem:[#allocation2 + $0xff8] sm:$0xff] }
 0x1f8   :  { %2068 = vst [vmem:[#allocation7 + $0xf40] sm:$0xff] %v1556_v62  ;;  %v1578_v62 = vadd.f32 %v1066_v57, %v554_v56  ;;  %v1579_v63 = vadd.f32 %v1067_v60, %v555_v59 }
 0x1f9   :  { %2069 = vst [vmem:[#allocation7 + $0xf48] sm:$0xff] %v1557_v1 }
 0x1fa   :  { %2070 = vst [vmem:[#allocation7 + $0xf50] sm:$0xff] %v1558_v4 }
 0x1fb   :  { %2071 = vst [vmem:[#allocation7 + $0xf58] sm:$0xff] %v1559_v7 }
 0x1fc   :  { %2072 = vst [vmem:[#allocation7 + $0xf60] sm:$0xff] %v1560_v10 }
 0x1fd   :  { %2073 = vst [vmem:[#allocation7 + $0xf68] sm:$0xff] %v1561_v13 }
 0x1fe   :  { %2074 = vst [vmem:[#allocation7 + $0xf70] sm:$0xff] %v1562_v16 }
 0x1ff   :  { %2075 = vst [vmem:[#allocation7 + $0xf78] sm:$0xff] %v1563_v19 }
 0x200   :  { %2076 = vst [vmem:[#allocation7 + $0xf80] sm:$0xff] %v1564_v22 }
 0x201   :  { %2077 = vst [vmem:[#allocation7 + $0xf88] sm:$0xff] %v1565_v25 }
 0x202   :  { %2078 = vst [vmem:[#allocation7 + $0xf90] sm:$0xff] %v1566_v28 }
 0x203   :  { %2079 = vst [vmem:[#allocation7 + $0xf98] sm:$0xff] %v1567_v31 }
 0x204   :  { %2080 = vst [vmem:[#allocation7 + $0xfa0] sm:$0xff] %v1568_v34 }
 0x205   :  { %2081 = vst [vmem:[#allocation7 + $0xfa8] sm:$0xff] %v1569_v37 }
 0x206   :  { %2082 = vst [vmem:[#allocation7 + $0xfb0] sm:$0xff] %v1570_v40 }
 0x207   :  { %2083 = vst [vmem:[#allocation7 + $0xfb8] sm:$0xff] %v1571_v43 }
 0x208   :  { %2084 = vst [vmem:[#allocation7 + $0xfc0] sm:$0xff] %v1572_v46 }
 0x209   :  { %2085 = vst [vmem:[#allocation7 + $0xfc8] sm:$0xff] %v1573_v49 }
 0x20a   :  { %2086 = vst [vmem:[#allocation7 + $0xfd0] sm:$0xff] %v1574_v52 }
 0x20b   :  { %2087 = vst [vmem:[#allocation7 + $0xfd8] sm:$0xff] %v1575_v55 }
 0x20c   :  { %2088 = vst [vmem:[#allocation7 + $0xfe0] sm:$0xff] %v1576_v58 }
 0x20d   :  { %2089 = vst [vmem:[#allocation7 + $0xfe8] sm:$0xff] %v1577_v61 }
 0x20e   :  { %2090 = vst [vmem:[#allocation7 + $0xff0] sm:$0xff] %v1578_v62 }
 0x20f   :  { %2091 = vst [vmem:[#allocation7 + $0xff8] sm:$0xff] %v1579_v63 }
 0x210   :  { %2104 = dma.vmem_to_hbm [thread:$0]  %s2097_s1, 65536, %s2099_s23, [#allocation4], %s2196_s17, %s2196_s17, %s2197_s18  }
 0x211   :  { %2193 = dma.done.wait [#allocation4], 65536  }
 0x212   :  { %2194 = vsyncadd [#allocation4], 4294901760 }
 0x213   :  { %2109 = vsyncpa [#allocation3], 1 }
 0x214   :  { %2110 = vsyncpa [#allocation6], 1 }
 0x215   :  { %2111 = vsyncpa [#allocation4], 1 }

</bundles_post_ra>
